<compile_context>
chip_gen: v5e
topology: v5e:2x2
jax: 0.10.0
libtpu: 0.0.40
codegen_flags: <defaults>
</compile_context>

<pallas_src>
import functools

import jax
import jax.numpy as jnp
from jax.experimental import pallas as pl
from jax.experimental.pallas import tpu as pltpu

EPS = 1e-5          # nn.BatchNorm2d default
NEG_SLOPE = 0.2     # nn.LeakyReLU(0.2)
_VMEM_LIMIT = 32 * 1024 * 1024


def _batch_block(batch):
    """Images per grid step: amortize per-step overhead, keep >=2 grid steps
    (megacore-shardable on v7x) and a small, generation-safe VMEM footprint."""
    for bt in (4, 2, 1):
        if batch % bt == 0 and (batch // bt >= 2 or batch == bt == 1):
            return bt
    return 1


def _cparams():
    return pltpu.CompilerParams(dimension_semantics=("parallel",),
                                vmem_limit_bytes=_VMEM_LIMIT)


# --------------------------------------------------------------------------
# XLA-side im2col (4x4 / stride 2 / pad 1) and a constant border mask.
# Patch feature order is (kh, kw, cin) with cin fastest: K = 16*Cin is
# lane-dense (>=128) for every layer except the first (K = 16*3 = 48).
# --------------------------------------------------------------------------
def _im2col(x_nhwc):
    B, H, W, C = x_nhwc.shape
    ho, wo = H // 2, W // 2
    xp = jnp.pad(x_nhwc, ((0, 0), (1, 1), (1, 1), (0, 0)))
    cols = []
    for kh in range(4):
        for kw in range(4):
            cols.append(xp[:, kh:kh + 2 * ho:2, kw:kw + 2 * wo:2, :])
    p = jnp.concatenate(cols, axis=-1)                  # (B, ho, wo, 16*C)
    return p.reshape(B, ho * wo, 16 * C).astype(jnp.bfloat16)


def _pad_mask(h, cin):
    # (Ho*Wo, 16*Cin) {0,1}: zero where the patch entry came from the zero
    # border.  Needed because the previous layer's BN shift + LeakyReLU is
    # applied to the pre-activation patches inside the next conv kernel and
    # lrelu(shift) != 0 on padded entries.  Constant-folded under jit.
    ho = h // 2
    base = 2 * jnp.arange(ho)
    taps = []
    for kh in range(4):
        rok = (base + kh - 1 >= 0) & (base + kh - 1 < h)
        for kw in range(4):
            cok = (base + kw - 1 >= 0) & (base + kw - 1 < h)
            taps.append(rok[:, None] & cok[None, :])
    m = jnp.stack(taps, axis=-1).reshape(ho * ho, 16)
    return jnp.repeat(m, cin, axis=1).astype(jnp.float32)


# --------------------------------------------------------------------------
# Pallas kernels
# --------------------------------------------------------------------------
def _conv_kernel(p_ref, w_ref, y_ref):
    # Layer 1: plain conv (its LeakyReLU is folded into layer 2's kernel).
    for b in range(p_ref.shape[0]):
        y = jnp.dot(p_ref[b], w_ref[...], preferred_element_type=jnp.float32)
        y_ref[b] = y.astype(y_ref.dtype)


def _act_conv_stats_kernel(p_ref, w_ref, sc_ref, sh_ref, m_ref, y_ref, st_ref):
    # Fused: previous layer's BN scale/shift + LeakyReLU on the patches,
    # border re-zeroed, ONE deep-K MXU dot with f32 accumulation, bf16
    # pre-BN output, plus per-block sum / sum-of-squares for this layer's BN.
    s0 = s1 = None
    for b in range(p_ref.shape[0]):
        p = p_ref[b].astype(jnp.float32)
        z = p * sc_ref[...] + sh_ref[...]
        a = jnp.where(z > 0, z, NEG_SLOPE * z) * m_ref[...]
        y = jnp.dot(a.astype(w_ref.dtype), w_ref[...],
                    preferred_element_type=jnp.float32)
        y_ref[b] = y.astype(y_ref.dtype)
        ps0 = jnp.sum(y, axis=0, keepdims=True)
        ps1 = jnp.sum(y * y, axis=0, keepdims=True)
        s0 = ps0 if s0 is None else s0 + ps0
        s1 = ps1 if s1 is None else s1 + ps1
    st_ref[0, 0:1, :] = s0
    st_ref[0, 1:2, :] = s1


def _head_kernel(y_ref, sc_ref, sh_ref, w5_ref, o_ref):
    # Layer 4 BN + LeakyReLU fused with the 4x4 valid conv (-> 1 logit/img)
    # + sigmoid; the 4x4x8F map never gets a standalone BN pass.
    for b in range(y_ref.shape[0]):
        z = y_ref[b].astype(jnp.float32) * sc_ref[...] + sh_ref[...]
        a = jnp.where(z > 0, z, NEG_SLOPE * z)
        t = jnp.sum(a * w5_ref[...], axis=1, keepdims=True)   # (16, 1)
        t = jnp.sum(t, axis=0, keepdims=True)                  # (1, 1)
        o_ref[b] = jnp.broadcast_to(jax.nn.sigmoid(t),
                                    o_ref.shape[1:]).astype(o_ref.dtype)


# --------------------------------------------------------------------------
# pallas_call wrappers (grid over batch blocks, "parallel" semantics)
# --------------------------------------------------------------------------
def conv1(p, w, cout, bt):
    B, hw, k = p.shape
    return pl.pallas_call(
        _conv_kernel,
        out_shape=jax.ShapeDtypeStruct((B, hw, cout), jnp.bfloat16),
        grid=(B // bt,),
        in_specs=[pl.BlockSpec((bt, hw, k), lambda i: (i, 0, 0)),
                  pl.BlockSpec((k, cout), lambda i: (0, 0))],
        out_specs=pl.BlockSpec((bt, hw, cout), lambda i: (i, 0, 0)),
        compiler_params=_cparams(),
    )(p, w)


def act_conv_stats(p, w, scale_k, shift_k, mask, cout, bt):
    B, hw, k = p.shape
    nblk = B // bt
    return pl.pallas_call(
        _act_conv_stats_kernel,
        out_shape=(jax.ShapeDtypeStruct((B, hw, cout), jnp.bfloat16),
                   jax.ShapeDtypeStruct((nblk, 2, cout), jnp.float32)),
        grid=(nblk,),
        in_specs=[pl.BlockSpec((bt, hw, k), lambda i: (i, 0, 0)),
                  pl.BlockSpec((k, cout), lambda i: (0, 0)),
                  pl.BlockSpec((1, k), lambda i: (0, 0)),
                  pl.BlockSpec((1, k), lambda i: (0, 0)),
                  pl.BlockSpec((hw, k), lambda i: (0, 0))],
        out_specs=(pl.BlockSpec((bt, hw, cout), lambda i: (i, 0, 0)),
                   pl.BlockSpec((1, 2, cout), lambda i: (i, 0, 0))),
        compiler_params=_cparams(),
    )(p, w, scale_k, shift_k, mask)


def head(y4, scale, shift, w5m, bt):
    B, hw, c4 = y4.shape
    return pl.pallas_call(
        _head_kernel,
        out_shape=jax.ShapeDtypeStruct((B, 1, 128), jnp.float32),
        grid=(B // bt,),
        in_specs=[pl.BlockSpec((bt, hw, c4), lambda i: (i, 0, 0)),
                  pl.BlockSpec((1, c4), lambda i: (0, 0)),
                  pl.BlockSpec((1, c4), lambda i: (0, 0)),
                  pl.BlockSpec((hw, c4), lambda i: (0, 0))],
        out_specs=pl.BlockSpec((bt, 1, 128), lambda i: (i, 0, 0)),
        compiler_params=_cparams(),
    )(y4, scale, shift, w5m)


# --------------------------------------------------------------------------
# BatchNorm affine from one-pass statistics (tiny XLA reduction)
# --------------------------------------------------------------------------
def _bn_affine(stats, gamma, beta, count):
    tot = jnp.sum(stats, axis=0)                              # (2, cout)
    mean = tot[0] / count
    var = jnp.maximum(tot[1] / count - mean * mean, 0.0)      # biased variance
    scale = gamma * jax.lax.rsqrt(var + EPS)
    shift = beta - mean * scale
    return scale[None, :], shift[None, :]                     # (1, cout) each


# --------------------------------------------------------------------------
# Parameters (DCGAN-style init: conv ~ N(0, 0.02), gamma=1, beta=0)
# --------------------------------------------------------------------------
def _prep_conv_w(w):
    # (Cout, Cin, 4, 4) -> (16*Cin, Cout); row k = (kh*4 + kw)*Cin + cin.
    cout, cin = w.shape[0], w.shape[1]
    return jnp.transpose(w, (2, 3, 1, 0)).reshape(16 * cin, cout).astype(jnp.bfloat16)


def init_params(key, in_ch, fms):
    couts = (fms, 2 * fms, 4 * fms, 8 * fms)
    cins = (in_ch,) + couts[:3]
    keys = jax.random.split(key, 5)
    params = {}
    for i in range(4):
        w = 0.02 * jax.random.normal(keys[i], (couts[i], cins[i], 4, 4), jnp.float32)
        params[f"w{i + 1}"] = _prep_conv_w(w)
    w5 = 0.02 * jax.random.normal(keys[4], (1, couts[3], 4, 4), jnp.float32)
    params["w5"] = jnp.transpose(w5, (2, 3, 1, 0)).reshape(16, couts[3])  # f32
    for li in (2, 3, 4):
        c = couts[li - 1]
        params[f"g{li}"] = jnp.ones((c,), jnp.float32)
        params[f"b{li}"] = jnp.zeros((c,), jnp.float32)
    return params


# --------------------------------------------------------------------------
# Forward pass  (input NCHW, output NCHW == (B, 1, 1, 1), matching PyTorch)
# --------------------------------------------------------------------------
@functools.partial(jax.jit, static_argnames=("fms",))
def discriminator64x64_forward(x_nchw, params, *, fms):
    x = jnp.transpose(x_nchw, (0, 2, 3, 1)).astype(jnp.float32)   # -> NHWC
    B, H = x.shape[0], x.shape[1]
    bt = _batch_block(B)
    couts = (fms, 2 * fms, 4 * fms, 8 * fms)

    # ---- layer 1: conv(4,2,1); LeakyReLU fused into layer 2's kernel -----
    y = conv1(_im2col(x), params["w1"], couts[0], bt)
    h = H // 2
    scale = jnp.ones((1, couts[0]), jnp.float32)   # identity "BN" for layer 1
    shift = jnp.zeros((1, couts[0]), jnp.float32)

    # ---- layers 2-4: (prev BN + LReLU) + conv(4,2,1) + batch stats --------
    for li in (2, 3, 4):
        cin, cout = couts[li - 2], couts[li - 1]
        p = _im2col(y.reshape(B, h, h, cin))
        mask = _pad_mask(h, cin)
        y, stats = act_conv_stats(p, params[f"w{li}"],
                                  jnp.tile(scale, (1, 16)),
                                  jnp.tile(shift, (1, 16)),
                                  mask, cout, bt)
        h //= 2
        scale, shift = _bn_affine(stats, params[f"g{li}"], params[f"b{li}"],
                                  float(B * h * h))

    # ---- layer 4 BN + LReLU, layer 5 conv(4,1,0) + Sigmoid (fused head) ---
    out = head(y, scale, shift, params["w5"], bt)          # (B, 1, 128)
    return out[:, :, :1].reshape(B, 1, 1, 1)               # -> NCHW


if __name__ == "__main__":
    # Small config: 3 input channels, fmsD=8 feature maps, batch=2.
    # Spatial size must be 64x64 (the architecture reduces 64 -> 1).
    B, C, H, W = 2, 3, 64, 64
    fmsD = 8

    key = jax.random.PRNGKey(0)
    kx, kp = jax.random.split(key)
    x = jax.random.normal(kx, (B, C, H, W), dtype=jnp.float32)
    params = init_params(kp, C, fmsD)

    out = discriminator64x64_forward(x, params, fms=fmsD)
    out = jax.block_until_ready(out)
    assert out.shape == (B, 1, 1, 1), out.shape
    assert bool(jnp.all(jnp.isfinite(out)))
    assert bool(jnp.all((out >= 0) & (out <= 1)))
    print("KERNEL_OK")
</pallas_src>

<mosaic_0001>
module attributes {stable_mosaic.version = 11 : i64} {
  func.func @_conv_kernel(%arg0: i32, %arg1: memref<1x1024x48xbf16, #tpu.memory_space<vmem>>, %arg2: memref<48x8xbf16, #tpu.memory_space<vmem>>, %arg3: memref<1x1024x8xbf16, #tpu.memory_space<vmem>>) attributes {dimension_semantics = [#tpu.dimension_semantics<parallel>], iteration_bounds = array<i64: 2>, scalar_prefetch = 0 : i64, scratch_operands = 0 : i64, tpu.core_type = #tpu.core_type<tc>, window_params = [{transform_indices = @transform_0, window_bounds = array<i64: 1, 1024, 48>}, {pipeline_mode = #tpu.pipeline_mode<synchronous>, transform_indices = @transform_1, window_bounds = array<i64: 48, 8>}, {transform_indices = @transform_2, window_bounds = array<i64: 1, 1024, 8>}]} {
    %c0 = arith.constant 0 : index
    %c0_0 = arith.constant 0 : index
    %c0_1 = arith.constant 0 : index
    %0 = vector.load %arg1[%c0, %c0_0, %c0_1] : memref<1x1024x48xbf16, #tpu.memory_space<vmem>>, vector<1x1024x48xbf16>
    %1 = vector.shape_cast %0 : vector<1x1024x48xbf16> to vector<1024x48xbf16>
    %c0_2 = arith.constant 0 : index
    %c0_3 = arith.constant 0 : index
    %2 = vector.load %arg2[%c0_2, %c0_3] : memref<48x8xbf16, #tpu.memory_space<vmem>>, vector<48x8xbf16>
    %cst = arith.constant dense<0.000000e+00> : vector<1024x8xf32>
    %3 = tpu.matmul %1, %2, %cst {dimension_numbers = #tpu.dot_dimension_numbers<[1], [0], [0], [1], [0, 0, 1, 1], [], []>} : vector<1024x48xbf16>, vector<48x8xbf16>, vector<1024x8xf32> -> vector<1024x8xf32>
    %4 = arith.truncf %3 : vector<1024x8xf32> to vector<1024x8xbf16>
    %c0_4 = arith.constant 0 : index
    %c0_5 = arith.constant 0 : index
    %c0_6 = arith.constant 0 : index
    %5 = vector.load %arg3[%c0_4, %c0_5, %c0_6] : memref<1x1024x8xbf16, #tpu.memory_space<vmem>>, vector<1x1024x8xbf16>
    %6 = vector.shape_cast %5 : vector<1x1024x8xbf16> to vector<1024x8xbf16>
    %7 = vector.shape_cast %4 : vector<1024x8xbf16> to vector<1x1024x8xbf16>
    tpu.vector_store %arg3[%c0_4, %c0_5, %c0_6], %7 {strides = array<i32>} : memref<1x1024x8xbf16, #tpu.memory_space<vmem>>, vector<1x1024x8xbf16>,
    return
  }
  func.func @transform_0(%arg0: i32) -> (i32, i32, i32) {
    %c0_i32 = arith.constant 0 : i32
    %c0_i32_0 = arith.constant 0 : i32
    %c0_i32_1 = arith.constant 0 : i32
    return %arg0, %c0_i32, %c0_i32_0 : i32, i32, i32
  }
  func.func @transform_1(%arg0: i32) -> (i32, i32) {
    %c0_i32 = arith.constant 0 : i32
    %c0_i32_0 = arith.constant 0 : i32
    %c0_i32_1 = arith.constant 0 : i32
    return %c0_i32, %c0_i32_0 : i32, i32
  }
  func.func @transform_2(%arg0: i32) -> (i32, i32, i32) {
    %c0_i32 = arith.constant 0 : i32
    %c0_i32_0 = arith.constant 0 : i32
    %c0_i32_1 = arith.constant 0 : i32
    return %arg0, %c0_i32, %c0_i32_0 : i32, i32, i32
  }
}

module attributes {stable_mosaic.version = 11 : i64} {
  func.func @_act_conv_stats_kernel(%arg0: i32, %arg1: memref<1x256x128xbf16, #tpu.memory_space<vmem>>, %arg2: memref<128x16xbf16, #tpu.memory_space<vmem>>, %arg3: memref<1x128xf32, #tpu.memory_space<vmem>>, %arg4: memref<1x128xf32, #tpu.memory_space<vmem>>, %arg5: memref<256x128xf32, #tpu.memory_space<vmem>>, %arg6: memref<1x256x16xbf16, #tpu.memory_space<vmem>>, %arg7: memref<1x2x16xf32, #tpu.memory_space<vmem>>) attributes {dimension_semantics = [#tpu.dimension_semantics<parallel>], iteration_bounds = array<i64: 2>, scalar_prefetch = 0 : i64, scratch_operands = 0 : i64, tpu.core_type = #tpu.core_type<tc>, window_params = [{transform_indices = @transform_0, window_bounds = array<i64: 1, 256, 128>}, {pipeline_mode = #tpu.pipeline_mode<synchronous>, transform_indices = @transform_1, window_bounds = array<i64: 128, 16>}, {pipeline_mode = #tpu.pipeline_mode<synchronous>, transform_indices = @transform_2, window_bounds = array<i64: 1, 128>}, {pipeline_mode = #tpu.pipeline_mode<synchronous>, transform_indices = @transform_3, window_bounds = array<i64: 1, 128>}, {pipeline_mode = #tpu.pipeline_mode<synchronous>, transform_indices = @transform_4, window_bounds = array<i64: 256, 128>}, {transform_indices = @transform_5, window_bounds = array<i64: 1, 256, 16>}, {transform_indices = @transform_6, window_bounds = array<i64: 1, 2, 16>}]} {
    %c0 = arith.constant 0 : index
    %c0_0 = arith.constant 0 : index
    %c0_1 = arith.constant 0 : index
    %0 = vector.load %arg1[%c0, %c0_0, %c0_1] : memref<1x256x128xbf16, #tpu.memory_space<vmem>>, vector<1x256x128xbf16>
    %1 = vector.shape_cast %0 : vector<1x256x128xbf16> to vector<256x128xbf16>
    %2 = arith.extf %1 : vector<256x128xbf16> to vector<256x128xf32>
    %c0_2 = arith.constant 0 : index
    %c0_3 = arith.constant 0 : index
    %3 = vector.load %arg3[%c0_2, %c0_3] : memref<1x128xf32, #tpu.memory_space<vmem>>, vector<1x128xf32>
    %4 = vector.broadcast %3 : vector<1x128xf32> to vector<256x128xf32>
    %5 = arith.mulf %2, %4 : vector<256x128xf32>
    %c0_4 = arith.constant 0 : index
    %c0_5 = arith.constant 0 : index
    %6 = vector.load %arg4[%c0_4, %c0_5] : memref<1x128xf32, #tpu.memory_space<vmem>>, vector<1x128xf32>
    %7 = vector.broadcast %6 : vector<1x128xf32> to vector<256x128xf32>
    %8 = arith.addf %5, %7 : vector<256x128xf32>
    %cst = arith.constant 0.000000e+00 : f32
    %9 = vector.broadcast %cst : f32 to vector<256x128xf32>
    %10 = arith.cmpf ogt, %8, %9 : vector<256x128xf32>
    %cst_6 = arith.constant 2.000000e-01 : f32
    %11 = vector.broadcast %cst_6 : f32 to vector<256x128xf32>
    %12 = arith.mulf %11, %8 : vector<256x128xf32>
    %13 = arith.select %10, %8, %12 : vector<256x128xi1>, vector<256x128xf32>
    %c0_7 = arith.constant 0 : index
    %c0_8 = arith.constant 0 : index
    %14 = vector.load %arg5[%c0_7, %c0_8] : memref<256x128xf32, #tpu.memory_space<vmem>>, vector<256x128xf32>
    %15 = arith.mulf %13, %14 : vector<256x128xf32>
    %16 = arith.truncf %15 : vector<256x128xf32> to vector<256x128xbf16>
    %c0_9 = arith.constant 0 : index
    %c0_10 = arith.constant 0 : index
    %17 = vector.load %arg2[%c0_9, %c0_10] : memref<128x16xbf16, #tpu.memory_space<vmem>>, vector<128x16xbf16>
    %cst_11 = arith.constant dense<0.000000e+00> : vector<256x16xf32>
    %18 = tpu.matmul %16, %17, %cst_11 {dimension_numbers = #tpu.dot_dimension_numbers<[1], [0], [0], [1], [0, 0, 1, 1], [], []>} : vector<256x128xbf16>, vector<128x16xbf16>, vector<256x16xf32> -> vector<256x16xf32>
    %19 = arith.truncf %18 : vector<256x16xf32> to vector<256x16xbf16>
    %c0_12 = arith.constant 0 : index
    %c0_13 = arith.constant 0 : index
    %c0_14 = arith.constant 0 : index
    %20 = vector.load %arg6[%c0_12, %c0_13, %c0_14] : memref<1x256x16xbf16, #tpu.memory_space<vmem>>, vector<1x256x16xbf16>
    %21 = vector.shape_cast %20 : vector<1x256x16xbf16> to vector<256x16xbf16>
    %22 = vector.shape_cast %19 : vector<256x16xbf16> to vector<1x256x16xbf16>
    tpu.vector_store %arg6[%c0_12, %c0_13, %c0_14], %22 {strides = array<i32>} : memref<1x256x16xbf16, #tpu.memory_space<vmem>>, vector<1x256x16xbf16>,
    %cst_15 = arith.constant dense<0.000000e+00> : vector<16xf32>
    %23 = vector.multi_reduction <add>, %18, %cst_15 [0] : vector<256x16xf32> to vector<16xf32>
    %24 = vector.shape_cast %23 : vector<16xf32> to vector<1x16xf32>
    %25 = arith.mulf %18, %18 : vector<256x16xf32>
    %cst_16 = arith.constant dense<0.000000e+00> : vector<16xf32>
    %26 = vector.multi_reduction <add>, %25, %cst_16 [0] : vector<256x16xf32> to vector<16xf32>
    %27 = vector.shape_cast %26 : vector<16xf32> to vector<1x16xf32>
    %c0_17 = arith.constant 0 : index
    %c0_18 = arith.constant 0 : index
    %c0_19 = arith.constant 0 : index
    %28 = vector.load %arg7[%c0_17, %c0_18, %c0_19] : memref<1x2x16xf32, #tpu.memory_space<vmem>>, vector<1x1x16xf32>
    %29 = vector.shape_cast %28 : vector<1x1x16xf32> to vector<1x16xf32>
    %30 = vector.shape_cast %24 : vector<1x16xf32> to vector<1x1x16xf32>
    tpu.vector_store %arg7[%c0_17, %c0_18, %c0_19], %30 {strides = array<i32>} : memref<1x2x16xf32, #tpu.memory_space<vmem>>, vector<1x1x16xf32>,
    %c0_20 = arith.constant 0 : index
    %c1 = arith.constant 1 : index
    %c0_21 = arith.constant 0 : index
    %31 = vector.load %arg7[%c0_20, %c1, %c0_21] : memref<1x2x16xf32, #tpu.memory_space<vmem>>, vector<1x1x16xf32>
    %32 = vector.shape_cast %31 : vector<1x1x16xf32> to vector<1x16xf32>
    %33 = vector.shape_cast %27 : vector<1x16xf32> to vector<1x1x16xf32>
    tpu.vector_store %arg7[%c0_20, %c1, %c0_21], %33 {strides = array<i32>} : memref<1x2x16xf32, #tpu.memory_space<vmem>>, vector<1x1x16xf32>,
    return
  }
  func.func @transform_0(%arg0: i32) -> (i32, i32, i32) {
    %c0_i32 = arith.constant 0 : i32
    %c0_i32_0 = arith.constant 0 : i32
    %c0_i32_1 = arith.constant 0 : i32
    return %arg0, %c0_i32, %c0_i32_0 : i32, i32, i32
  }
  func.func @transform_1(%arg0: i32) -> (i32, i32) {
    %c0_i32 = arith.constant 0 : i32
    %c0_i32_0 = arith.constant 0 : i32
    %c0_i32_1 = arith.constant 0 : i32
    return %c0_i32, %c0_i32_0 : i32, i32
  }
  func.func @transform_2(%arg0: i32) -> (i32, i32) {
    %c0_i32 = arith.constant 0 : i32
    %c0_i32_0 = arith.constant 0 : i32
    %c0_i32_1 = arith.constant 0 : i32
    return %c0_i32, %c0_i32_0 : i32, i32
  }
  func.func @transform_3(%arg0: i32) -> (i32, i32) {
    %c0_i32 = arith.constant 0 : i32
    %c0_i32_0 = arith.constant 0 : i32
    %c0_i32_1 = arith.constant 0 : i32
    return %c0_i32, %c0_i32_0 : i32, i32
  }
  func.func @transform_4(%arg0: i32) -> (i32, i32) {
    %c0_i32 = arith.constant 0 : i32
    %c0_i32_0 = arith.constant 0 : i32
    %c0_i32_1 = arith.constant 0 : i32
    return %c0_i32, %c0_i32_0 : i32, i32
  }
  func.func @transform_5(%arg0: i32) -> (i32, i32, i32) {
    %c0_i32 = arith.constant 0 : i32
    %c0_i32_0 = arith.constant 0 : i32
    %c0_i32_1 = arith.constant 0 : i32
    return %arg0, %c0_i32, %c0_i32_0 : i32, i32, i32
  }
  func.func @transform_6(%arg0: i32) -> (i32, i32, i32) {
    %c0_i32 = arith.constant 0 : i32
    %c0_i32_0 = arith.constant 0 : i32
    %c0_i32_1 = arith.constant 0 : i32
    return %arg0, %c0_i32, %c0_i32_0 : i32, i32, i32
  }
}

module attributes {stable_mosaic.version = 11 : i64} {
  func.func @_act_conv_stats_kernel(%arg0: i32, %arg1: memref<1x64x256xbf16, #tpu.memory_space<vmem>>, %arg2: memref<256x32xbf16, #tpu.memory_space<vmem>>, %arg3: memref<1x256xf32, #tpu.memory_space<vmem>>, %arg4: memref<1x256xf32, #tpu.memory_space<vmem>>, %arg5: memref<64x256xf32, #tpu.memory_space<vmem>>, %arg6: memref<1x64x32xbf16, #tpu.memory_space<vmem>>, %arg7: memref<1x2x32xf32, #tpu.memory_space<vmem>>) attributes {dimension_semantics = [#tpu.dimension_semantics<parallel>], iteration_bounds = array<i64: 2>, scalar_prefetch = 0 : i64, scratch_operands = 0 : i64, tpu.core_type = #tpu.core_type<tc>, window_params = [{transform_indices = @transform_0, window_bounds = array<i64: 1, 64, 256>}, {pipeline_mode = #tpu.pipeline_mode<synchronous>, transform_indices = @transform_1, window_bounds = array<i64: 256, 32>}, {pipeline_mode = #tpu.pipeline_mode<synchronous>, transform_indices = @transform_2, window_bounds = array<i64: 1, 256>}, {pipeline_mode = #tpu.pipeline_mode<synchronous>, transform_indices = @transform_3, window_bounds = array<i64: 1, 256>}, {pipeline_mode = #tpu.pipeline_mode<synchronous>, transform_indices = @transform_4, window_bounds = array<i64: 64, 256>}, {transform_indices = @transform_5, window_bounds = array<i64: 1, 64, 32>}, {transform_indices = @transform_6, window_bounds = array<i64: 1, 2, 32>}]} {
    %c0 = arith.constant 0 : index
    %c0_0 = arith.constant 0 : index
    %c0_1 = arith.constant 0 : index
    %0 = vector.load %arg1[%c0, %c0_0, %c0_1] : memref<1x64x256xbf16, #tpu.memory_space<vmem>>, vector<1x64x256xbf16>
    %1 = vector.shape_cast %0 : vector<1x64x256xbf16> to vector<64x256xbf16>
    %2 = arith.extf %1 : vector<64x256xbf16> to vector<64x256xf32>
    %c0_2 = arith.constant 0 : index
    %c0_3 = arith.constant 0 : index
    %3 = vector.load %arg3[%c0_2, %c0_3] : memref<1x256xf32, #tpu.memory_space<vmem>>, vector<1x256xf32>
    %4 = vector.broadcast %3 : vector<1x256xf32> to vector<64x256xf32>
    %5 = arith.mulf %2, %4 : vector<64x256xf32>
    %c0_4 = arith.constant 0 : index
    %c0_5 = arith.constant 0 : index
    %6 = vector.load %arg4[%c0_4, %c0_5] : memref<1x256xf32, #tpu.memory_space<vmem>>, vector<1x256xf32>
    %7 = vector.broadcast %6 : vector<1x256xf32> to vector<64x256xf32>
    %8 = arith.addf %5, %7 : vector<64x256xf32>
    %cst = arith.constant 0.000000e+00 : f32
    %9 = vector.broadcast %cst : f32 to vector<64x256xf32>
    %10 = arith.cmpf ogt, %8, %9 : vector<64x256xf32>
    %cst_6 = arith.constant 2.000000e-01 : f32
    %11 = vector.broadcast %cst_6 : f32 to vector<64x256xf32>
    %12 = arith.mulf %11, %8 : vector<64x256xf32>
    %13 = arith.select %10, %8, %12 : vector<64x256xi1>, vector<64x256xf32>
    %c0_7 = arith.constant 0 : index
    %c0_8 = arith.constant 0 : index
    %14 = vector.load %arg5[%c0_7, %c0_8] : memref<64x256xf32, #tpu.memory_space<vmem>>, vector<64x256xf32>
    %15 = arith.mulf %13, %14 : vector<64x256xf32>
    %16 = arith.truncf %15 : vector<64x256xf32> to vector<64x256xbf16>
    %c0_9 = arith.constant 0 : index
    %c0_10 = arith.constant 0 : index
    %17 = vector.load %arg2[%c0_9, %c0_10] : memref<256x32xbf16, #tpu.memory_space<vmem>>, vector<256x32xbf16>
    %cst_11 = arith.constant dense<0.000000e+00> : vector<64x32xf32>
    %18 = tpu.matmul %16, %17, %cst_11 {dimension_numbers = #tpu.dot_dimension_numbers<[1], [0], [0], [1], [0, 0, 1, 1], [], []>} : vector<64x256xbf16>, vector<256x32xbf16>, vector<64x32xf32> -> vector<64x32xf32>
    %19 = arith.truncf %18 : vector<64x32xf32> to vector<64x32xbf16>
    %c0_12 = arith.constant 0 : index
    %c0_13 = arith.constant 0 : index
    %c0_14 = arith.constant 0 : index
    %20 = vector.load %arg6[%c0_12, %c0_13, %c0_14] : memref<1x64x32xbf16, #tpu.memory_space<vmem>>, vector<1x64x32xbf16>
    %21 = vector.shape_cast %20 : vector<1x64x32xbf16> to vector<64x32xbf16>
    %22 = vector.shape_cast %19 : vector<64x32xbf16> to vector<1x64x32xbf16>
    tpu.vector_store %arg6[%c0_12, %c0_13, %c0_14], %22 {strides = array<i32>} : memref<1x64x32xbf16, #tpu.memory_space<vmem>>, vector<1x64x32xbf16>,
    %cst_15 = arith.constant dense<0.000000e+00> : vector<32xf32>
    %23 = vector.multi_reduction <add>, %18, %cst_15 [0] : vector<64x32xf32> to vector<32xf32>
    %24 = vector.shape_cast %23 : vector<32xf32> to vector<1x32xf32>
    %25 = arith.mulf %18, %18 : vector<64x32xf32>
    %cst_16 = arith.constant dense<0.000000e+00> : vector<32xf32>
    %26 = vector.multi_reduction <add>, %25, %cst_16 [0] : vector<64x32xf32> to vector<32xf32>
    %27 = vector.shape_cast %26 : vector<32xf32> to vector<1x32xf32>
    %c0_17 = arith.constant 0 : index
    %c0_18 = arith.constant 0 : index
    %c0_19 = arith.constant 0 : index
    %28 = vector.load %arg7[%c0_17, %c0_18, %c0_19] : memref<1x2x32xf32, #tpu.memory_space<vmem>>, vector<1x1x32xf32>
    %29 = vector.shape_cast %28 : vector<1x1x32xf32> to vector<1x32xf32>
    %30 = vector.shape_cast %24 : vector<1x32xf32> to vector<1x1x32xf32>
    tpu.vector_store %arg7[%c0_17, %c0_18, %c0_19], %30 {strides = array<i32>} : memref<1x2x32xf32, #tpu.memory_space<vmem>>, vector<1x1x32xf32>,
    %c0_20 = arith.constant 0 : index
    %c1 = arith.constant 1 : index
    %c0_21 = arith.constant 0 : index
    %31 = vector.load %arg7[%c0_20, %c1, %c0_21] : memref<1x2x32xf32, #tpu.memory_space<vmem>>, vector<1x1x32xf32>
    %32 = vector.shape_cast %31 : vector<1x1x32xf32> to vector<1x32xf32>
    %33 = vector.shape_cast %27 : vector<1x32xf32> to vector<1x1x32xf32>
    tpu.vector_store %arg7[%c0_20, %c1, %c0_21], %33 {strides = array<i32>} : memref<1x2x32xf32, #tpu.memory_space<vmem>>, vector<1x1x32xf32>,
    return
  }
  func.func @transform_0(%arg0: i32) -> (i32, i32, i32) {
    %c0_i32 = arith.constant 0 : i32
    %c0_i32_0 = arith.constant 0 : i32
    %c0_i32_1 = arith.constant 0 : i32
    return %arg0, %c0_i32, %c0_i32_0 : i32, i32, i32
  }
  func.func @transform_1(%arg0: i32) -> (i32, i32) {
    %c0_i32 = arith.constant 0 : i32
    %c0_i32_0 = arith.constant 0 : i32
    %c0_i32_1 = arith.constant 0 : i32
    return %c0_i32, %c0_i32_0 : i32, i32
  }
  func.func @transform_2(%arg0: i32) -> (i32, i32) {
    %c0_i32 = arith.constant 0 : i32
    %c0_i32_0 = arith.constant 0 : i32
    %c0_i32_1 = arith.constant 0 : i32
    return %c0_i32, %c0_i32_0 : i32, i32
  }
  func.func @transform_3(%arg0: i32) -> (i32, i32) {
    %c0_i32 = arith.constant 0 : i32
    %c0_i32_0 = arith.constant 0 : i32
    %c0_i32_1 = arith.constant 0 : i32
    return %c0_i32, %c0_i32_0 : i32, i32
  }
  func.func @transform_4(%arg0: i32) -> (i32, i32) {
    %c0_i32 = arith.constant 0 : i32
    %c0_i32_0 = arith.constant 0 : i32
    %c0_i32_1 = arith.constant 0 : i32
    return %c0_i32, %c0_i32_0 : i32, i32
  }
  func.func @transform_5(%arg0: i32) -> (i32, i32, i32) {
    %c0_i32 = arith.constant 0 : i32
    %c0_i32_0 = arith.constant 0 : i32
    %c0_i32_1 = arith.constant 0 : i32
    return %arg0, %c0_i32, %c0_i32_0 : i32, i32, i32
  }
  func.func @transform_6(%arg0: i32) -> (i32, i32, i32) {
    %c0_i32 = arith.constant 0 : i32
    %c0_i32_0 = arith.constant 0 : i32
    %c0_i32_1 = arith.constant 0 : i32
    return %arg0, %c0_i32, %c0_i32_0 : i32, i32, i32
  }
}

module attributes {stable_mosaic.version = 11 : i64} {
  func.func @_act_conv_stats_kernel(%arg0: i32, %arg1: memref<1x16x512xbf16, #tpu.memory_space<vmem>>, %arg2: memref<512x64xbf16, #tpu.memory_space<vmem>>, %arg3: memref<1x512xf32, #tpu.memory_space<vmem>>, %arg4: memref<1x512xf32, #tpu.memory_space<vmem>>, %arg5: memref<16x512xf32, #tpu.memory_space<vmem>>, %arg6: memref<1x16x64xbf16, #tpu.memory_space<vmem>>, %arg7: memref<1x2x64xf32, #tpu.memory_space<vmem>>) attributes {dimension_semantics = [#tpu.dimension_semantics<parallel>], iteration_bounds = array<i64: 2>, scalar_prefetch = 0 : i64, scratch_operands = 0 : i64, tpu.core_type = #tpu.core_type<tc>, window_params = [{transform_indices = @transform_0, window_bounds = array<i64: 1, 16, 512>}, {pipeline_mode = #tpu.pipeline_mode<synchronous>, transform_indices = @transform_1, window_bounds = array<i64: 512, 64>}, {pipeline_mode = #tpu.pipeline_mode<synchronous>, transform_indices = @transform_2, window_bounds = array<i64: 1, 512>}, {pipeline_mode = #tpu.pipeline_mode<synchronous>, transform_indices = @transform_3, window_bounds = array<i64: 1, 512>}, {pipeline_mode = #tpu.pipeline_mode<synchronous>, transform_indices = @transform_4, window_bounds = array<i64: 16, 512>}, {transform_indices = @transform_5, window_bounds = array<i64: 1, 16, 64>}, {transform_indices = @transform_6, window_bounds = array<i64: 1, 2, 64>}]} {
    %c0 = arith.constant 0 : index
    %c0_0 = arith.constant 0 : index
    %c0_1 = arith.constant 0 : index
    %0 = vector.load %arg1[%c0, %c0_0, %c0_1] : memref<1x16x512xbf16, #tpu.memory_space<vmem>>, vector<1x16x512xbf16>
    %1 = vector.shape_cast %0 : vector<1x16x512xbf16> to vector<16x512xbf16>
    %2 = arith.extf %1 : vector<16x512xbf16> to vector<16x512xf32>
    %c0_2 = arith.constant 0 : index
    %c0_3 = arith.constant 0 : index
    %3 = vector.load %arg3[%c0_2, %c0_3] : memref<1x512xf32, #tpu.memory_space<vmem>>, vector<1x512xf32>
    %4 = vector.broadcast %3 : vector<1x512xf32> to vector<16x512xf32>
    %5 = arith.mulf %2, %4 : vector<16x512xf32>
    %c0_4 = arith.constant 0 : index
    %c0_5 = arith.constant 0 : index
    %6 = vector.load %arg4[%c0_4, %c0_5] : memref<1x512xf32, #tpu.memory_space<vmem>>, vector<1x512xf32>
    %7 = vector.broadcast %6 : vector<1x512xf32> to vector<16x512xf32>
    %8 = arith.addf %5, %7 : vector<16x512xf32>
    %cst = arith.constant 0.000000e+00 : f32
    %9 = vector.broadcast %cst : f32 to vector<16x512xf32>
    %10 = arith.cmpf ogt, %8, %9 : vector<16x512xf32>
    %cst_6 = arith.constant 2.000000e-01 : f32
    %11 = vector.broadcast %cst_6 : f32 to vector<16x512xf32>
    %12 = arith.mulf %11, %8 : vector<16x512xf32>
    %13 = arith.select %10, %8, %12 : vector<16x512xi1>, vector<16x512xf32>
    %c0_7 = arith.constant 0 : index
    %c0_8 = arith.constant 0 : index
    %14 = vector.load %arg5[%c0_7, %c0_8] : memref<16x512xf32, #tpu.memory_space<vmem>>, vector<16x512xf32>
    %15 = arith.mulf %13, %14 : vector<16x512xf32>
    %16 = arith.truncf %15 : vector<16x512xf32> to vector<16x512xbf16>
    %c0_9 = arith.constant 0 : index
    %c0_10 = arith.constant 0 : index
    %17 = vector.load %arg2[%c0_9, %c0_10] : memref<512x64xbf16, #tpu.memory_space<vmem>>, vector<512x64xbf16>
    %cst_11 = arith.constant dense<0.000000e+00> : vector<16x64xf32>
    %18 = tpu.matmul %16, %17, %cst_11 {dimension_numbers = #tpu.dot_dimension_numbers<[1], [0], [0], [1], [0, 0, 1, 1], [], []>} : vector<16x512xbf16>, vector<512x64xbf16>, vector<16x64xf32> -> vector<16x64xf32>
    %19 = arith.truncf %18 : vector<16x64xf32> to vector<16x64xbf16>
    %c0_12 = arith.constant 0 : index
    %c0_13 = arith.constant 0 : index
    %c0_14 = arith.constant 0 : index
    %20 = vector.load %arg6[%c0_12, %c0_13, %c0_14] : memref<1x16x64xbf16, #tpu.memory_space<vmem>>, vector<1x16x64xbf16>
    %21 = vector.shape_cast %20 : vector<1x16x64xbf16> to vector<16x64xbf16>
    %22 = vector.shape_cast %19 : vector<16x64xbf16> to vector<1x16x64xbf16>
    tpu.vector_store %arg6[%c0_12, %c0_13, %c0_14], %22 {strides = array<i32>} : memref<1x16x64xbf16, #tpu.memory_space<vmem>>, vector<1x16x64xbf16>,
    %cst_15 = arith.constant dense<0.000000e+00> : vector<64xf32>
    %23 = vector.multi_reduction <add>, %18, %cst_15 [0] : vector<16x64xf32> to vector<64xf32>
    %24 = vector.shape_cast %23 : vector<64xf32> to vector<1x64xf32>
    %25 = arith.mulf %18, %18 : vector<16x64xf32>
    %cst_16 = arith.constant dense<0.000000e+00> : vector<64xf32>
    %26 = vector.multi_reduction <add>, %25, %cst_16 [0] : vector<16x64xf32> to vector<64xf32>
    %27 = vector.shape_cast %26 : vector<64xf32> to vector<1x64xf32>
    %c0_17 = arith.constant 0 : index
    %c0_18 = arith.constant 0 : index
    %c0_19 = arith.constant 0 : index
    %28 = vector.load %arg7[%c0_17, %c0_18, %c0_19] : memref<1x2x64xf32, #tpu.memory_space<vmem>>, vector<1x1x64xf32>
    %29 = vector.shape_cast %28 : vector<1x1x64xf32> to vector<1x64xf32>
    %30 = vector.shape_cast %24 : vector<1x64xf32> to vector<1x1x64xf32>
    tpu.vector_store %arg7[%c0_17, %c0_18, %c0_19], %30 {strides = array<i32>} : memref<1x2x64xf32, #tpu.memory_space<vmem>>, vector<1x1x64xf32>,
    %c0_20 = arith.constant 0 : index
    %c1 = arith.constant 1 : index
    %c0_21 = arith.constant 0 : index
    %31 = vector.load %arg7[%c0_20, %c1, %c0_21] : memref<1x2x64xf32, #tpu.memory_space<vmem>>, vector<1x1x64xf32>
    %32 = vector.shape_cast %31 : vector<1x1x64xf32> to vector<1x64xf32>
    %33 = vector.shape_cast %27 : vector<1x64xf32> to vector<1x1x64xf32>
    tpu.vector_store %arg7[%c0_20, %c1, %c0_21], %33 {strides = array<i32>} : memref<1x2x64xf32, #tpu.memory_space<vmem>>, vector<1x1x64xf32>,
    return
  }
  func.func @transform_0(%arg0: i32) -> (i32, i32, i32) {
    %c0_i32 = arith.constant 0 : i32
    %c0_i32_0 = arith.constant 0 : i32
    %c0_i32_1 = arith.constant 0 : i32
    return %arg0, %c0_i32, %c0_i32_0 : i32, i32, i32
  }
  func.func @transform_1(%arg0: i32) -> (i32, i32) {
    %c0_i32 = arith.constant 0 : i32
    %c0_i32_0 = arith.constant 0 : i32
    %c0_i32_1 = arith.constant 0 : i32
    return %c0_i32, %c0_i32_0 : i32, i32
  }
  func.func @transform_2(%arg0: i32) -> (i32, i32) {
    %c0_i32 = arith.constant 0 : i32
    %c0_i32_0 = arith.constant 0 : i32
    %c0_i32_1 = arith.constant 0 : i32
    return %c0_i32, %c0_i32_0 : i32, i32
  }
  func.func @transform_3(%arg0: i32) -> (i32, i32) {
    %c0_i32 = arith.constant 0 : i32
    %c0_i32_0 = arith.constant 0 : i32
    %c0_i32_1 = arith.constant 0 : i32
    return %c0_i32, %c0_i32_0 : i32, i32
  }
  func.func @transform_4(%arg0: i32) -> (i32, i32) {
    %c0_i32 = arith.constant 0 : i32
    %c0_i32_0 = arith.constant 0 : i32
    %c0_i32_1 = arith.constant 0 : i32
    return %c0_i32, %c0_i32_0 : i32, i32
  }
  func.func @transform_5(%arg0: i32) -> (i32, i32, i32) {
    %c0_i32 = arith.constant 0 : i32
    %c0_i32_0 = arith.constant 0 : i32
    %c0_i32_1 = arith.constant 0 : i32
    return %arg0, %c0_i32, %c0_i32_0 : i32, i32, i32
  }
  func.func @transform_6(%arg0: i32) -> (i32, i32, i32) {
    %c0_i32 = arith.constant 0 : i32
    %c0_i32_0 = arith.constant 0 : i32
    %c0_i32_1 = arith.constant 0 : i32
    return %arg0, %c0_i32, %c0_i32_0 : i32, i32, i32
  }
}

module attributes {stable_mosaic.version = 11 : i64} {
  func.func @_head_kernel(%arg0: i32, %arg1: memref<1x16x64xbf16, #tpu.memory_space<vmem>>, %arg2: memref<1x64xf32, #tpu.memory_space<vmem>>, %arg3: memref<1x64xf32, #tpu.memory_space<vmem>>, %arg4: memref<16x64xf32, #tpu.memory_space<vmem>>, %arg5: memref<1x1x128xf32, #tpu.memory_space<vmem>>) attributes {dimension_semantics = [#tpu.dimension_semantics<parallel>], iteration_bounds = array<i64: 2>, scalar_prefetch = 0 : i64, scratch_operands = 0 : i64, tpu.core_type = #tpu.core_type<tc>, window_params = [{transform_indices = @transform_0, window_bounds = array<i64: 1, 16, 64>}, {pipeline_mode = #tpu.pipeline_mode<synchronous>, transform_indices = @transform_1, window_bounds = array<i64: 1, 64>}, {pipeline_mode = #tpu.pipeline_mode<synchronous>, transform_indices = @transform_2, window_bounds = array<i64: 1, 64>}, {pipeline_mode = #tpu.pipeline_mode<synchronous>, transform_indices = @transform_3, window_bounds = array<i64: 16, 64>}, {transform_indices = @transform_4, window_bounds = array<i64: 1, 1, 128>}]} {
    %c0 = arith.constant 0 : index
    %c0_0 = arith.constant 0 : index
    %c0_1 = arith.constant 0 : index
    %0 = vector.load %arg1[%c0, %c0_0, %c0_1] : memref<1x16x64xbf16, #tpu.memory_space<vmem>>, vector<1x16x64xbf16>
    %1 = vector.shape_cast %0 : vector<1x16x64xbf16> to vector<16x64xbf16>
    %2 = arith.extf %1 : vector<16x64xbf16> to vector<16x64xf32>
    %c0_2 = arith.constant 0 : index
    %c0_3 = arith.constant 0 : index
    %3 = vector.load %arg2[%c0_2, %c0_3] : memref<1x64xf32, #tpu.memory_space<vmem>>, vector<1x64xf32>
    %4 = vector.broadcast %3 : vector<1x64xf32> to vector<16x64xf32>
    %5 = arith.mulf %2, %4 : vector<16x64xf32>
    %c0_4 = arith.constant 0 : index
    %c0_5 = arith.constant 0 : index
    %6 = vector.load %arg3[%c0_4, %c0_5] : memref<1x64xf32, #tpu.memory_space<vmem>>, vector<1x64xf32>
    %7 = vector.broadcast %6 : vector<1x64xf32> to vector<16x64xf32>
    %8 = arith.addf %5, %7 : vector<16x64xf32>
    %cst = arith.constant 0.000000e+00 : f32
    %9 = vector.broadcast %cst : f32 to vector<16x64xf32>
    %10 = arith.cmpf ogt, %8, %9 : vector<16x64xf32>
    %cst_6 = arith.constant 2.000000e-01 : f32
    %11 = vector.broadcast %cst_6 : f32 to vector<16x64xf32>
    %12 = arith.mulf %11, %8 : vector<16x64xf32>
    %13 = arith.select %10, %8, %12 : vector<16x64xi1>, vector<16x64xf32>
    %c0_7 = arith.constant 0 : index
    %c0_8 = arith.constant 0 : index
    %14 = vector.load %arg4[%c0_7, %c0_8] : memref<16x64xf32, #tpu.memory_space<vmem>>, vector<16x64xf32>
    %15 = arith.mulf %13, %14 : vector<16x64xf32>
    %cst_9 = arith.constant dense<0.000000e+00> : vector<16xf32>
    %16 = vector.multi_reduction <add>, %15, %cst_9 [1] : vector<16x64xf32> to vector<16xf32>
    %17 = vector.shape_cast %16 : vector<16xf32> to vector<16x1xf32>
    %cst_10 = arith.constant dense<0.000000e+00> : vector<1xf32>
    %18 = vector.multi_reduction <add>, %17, %cst_10 [0] : vector<16x1xf32> to vector<1xf32>
    %19 = vector.shape_cast %18 : vector<1xf32> to vector<1x1xf32>
    %20 = arith.negf %19 : vector<1x1xf32>
    %21 = math.exp %20 : vector<1x1xf32>
    %cst_11 = arith.constant 1.000000e+00 : f32
    %22 = vector.broadcast %cst_11 : f32 to vector<1x1xf32>
    %23 = arith.addf %22, %21 : vector<1x1xf32>
    %24 = arith.divf %22, %23 : vector<1x1xf32>
    %25 = vector.shape_cast %24 : vector<1x1xf32> to vector<1x1xf32>
    %26 = vector.broadcast %25 : vector<1x1xf32> to vector<1x128xf32>
    %c0_12 = arith.constant 0 : index
    %c0_13 = arith.constant 0 : index
    %c0_14 = arith.constant 0 : index
    %27 = vector.load %arg5[%c0_12, %c0_13, %c0_14] : memref<1x1x128xf32, #tpu.memory_space<vmem>>, vector<1x1x128xf32>
    %28 = vector.shape_cast %27 : vector<1x1x128xf32> to vector<1x128xf32>
    %29 = vector.shape_cast %26 : vector<1x128xf32> to vector<1x1x128xf32>
    tpu.vector_store %arg5[%c0_12, %c0_13, %c0_14], %29 {strides = array<i32>} : memref<1x1x128xf32, #tpu.memory_space<vmem>>, vector<1x1x128xf32>,
    return
  }
  func.func @transform_0(%arg0: i32) -> (i32, i32, i32) {
    %c0_i32 = arith.constant 0 : i32
    %c0_i32_0 = arith.constant 0 : i32
    %c0_i32_1 = arith.constant 0 : i32
    return %arg0, %c0_i32, %c0_i32_0 : i32, i32, i32
  }
  func.func @transform_1(%arg0: i32) -> (i32, i32) {
    %c0_i32 = arith.constant 0 : i32
    %c0_i32_0 = arith.constant 0 : i32
    %c0_i32_1 = arith.constant 0 : i32
    return %c0_i32, %c0_i32_0 : i32, i32
  }
  func.func @transform_2(%arg0: i32) -> (i32, i32) {
    %c0_i32 = arith.constant 0 : i32
    %c0_i32_0 = arith.constant 0 : i32
    %c0_i32_1 = arith.constant 0 : i32
    return %c0_i32, %c0_i32_0 : i32, i32
  }
  func.func @transform_3(%arg0: i32) -> (i32, i32) {
    %c0_i32 = arith.constant 0 : i32
    %c0_i32_0 = arith.constant 0 : i32
    %c0_i32_1 = arith.constant 0 : i32
    return %c0_i32, %c0_i32_0 : i32, i32
  }
  func.func @transform_4(%arg0: i32) -> (i32, i32, i32) {
    %c0_i32 = arith.constant 0 : i32
    %c0_i32_0 = arith.constant 0 : i32
    %c0_i32_1 = arith.constant 0 : i32
    return %arg0, %c0_i32, %c0_i32_0 : i32, i32, i32
  }
}

</mosaic_0001>

<bundles_post_ra>
// kernel: discriminator64x64_forward.5
= control target key start
LH: loop header
LB: loop body
LE: loop exit
PB: predicated region body
PF: predicated region fallthrough
CT: control target
= control target key end

     0   :  { %s1903_s9 = smov 0   ;;  %s2324_s0 = inlined_call_operand.vmem [shape: bf16[2,1024,48], index: 0, kind: input, shape index: {}]   ;;  %s2325_s1 = inlined_call_operand.vmem [shape: bf16[48,8], index: 1, kind: input, shape index: {}]   ;;  %s2326_s2 = inlined_call_operand.vmem [shape: bf16[2,1024,8], index: 2, kind: output, shape index: {}]  }
   0x1 LB: > { %s1451_s10 = sadd.s32 4294967295, %s1886_s9   ;;  %p1455_p0 = scmp.ge.s32.totalorder %s1886_s9, 1  ;;  %s1886_s9 = sphi %s1903_s9, %s12_s9  }
   0x2   : > { %p112_p1 = scmp.lt.s32.totalorder %s1886_s9, 3 }
   0x4   : > { %p113_p2 = pnand %p1455_p0, %p112_p1 }
   0x5   : > { %p134_p3 = scmp.lt.s32.totalorder (!%p113_p2), %s1451_s10, 1 }
   0x6   : > { %116 = sbr.rel (%p113_p2) target bundleno = 408 (0x198), region = 28 }
   0xb   : > { %v1862_v0 = vld [vmem:[%s2325_s1 + $0x10] sm:$0xff]  ;;  %v1861_v1 = vld [vmem:[%s2325_s1 + $0x8] sm:$0xff]  ;;  %s2328_s10 = smov (!%p134_p3, %s1451_s10), 1  ;;  %v1860_v2 = vld [vmem:[%s2325_s1] sm:$0xff]  ;;  %vm617_vm0 = vcmask 392192   ;;  %vm1267_vm1 = vcmask 60416  }
   0xc   : > { %815 = vmatpush.bf16.msra.mxu0 %v1862_v0  ;;  %1863 = vmatpush.bf16.msra.mxu1 %v1862_v0  ;;  %s1794_s15 = sshll.u32 %s2328_s10, 9 }
   0xd   : > { %1864 = vmatpush.bf16.msra.mxu2 %v1862_v0  ;;  %1865 = vmatpush.bf16.msra.mxu3 %v1862_v0  ;;  %s1928_s20 = scalar_lea.vmem %s2324_s0, %s1794_s15  ;;  %s2001_s23 = scalar_lea.vmem %s2326_s2, %s1794_s15 }
   0xe   : > { %v1796_v3 = vld [vmem:[%s1928_s20] sm:$0xff]  ;;  %v1797_v7 = vld [vmem:[%s1928_s20 + $0x8] sm:$0xff]  ;;  %v1798_v11 = vld [vmem:[%s1928_s20 + $0x10] sm:$0xff] }
   0xf   : > { %v1812_v4 = vld [vmem:[%s1928_s20 + $0x80] sm:$0xff]  ;;  %v1813_v8 = vld [vmem:[%s1928_s20 + $0x88] sm:$0xff]  ;;  %v1814_v12 = vld [vmem:[%s1928_s20 + $0x90] sm:$0xff] }
  0x10   : > { %816 = vmatpush.bf16.msra.mxu0 %v1861_v1  ;;  %1866 = vmatpush.bf16.msra.mxu1 %v1861_v1  ;;  %v1828_v5 = vld [vmem:[%s1928_s20 + $0x100] sm:$0xff]  ;;  %v1829_v9 = vld [vmem:[%s1928_s20 + $0x108] sm:$0xff]  ;;  %v1830_v13 = vld [vmem:[%s1928_s20 + $0x110] sm:$0xff] }
  0x11   : > { %1867 = vmatpush.bf16.msra.mxu2 %v1861_v1  ;;  %1868 = vmatpush.bf16.msra.mxu3 %v1861_v1  ;;  %v1844_v6 = vld [vmem:[%s1928_s20 + $0x180] sm:$0xff]  ;;  %v1845_v10 = vld [vmem:[%s1928_s20 + $0x188] sm:$0xff]  ;;  %v1846_v14 = vld [vmem:[%s1928_s20 + $0x190] sm:$0xff] }
  0x12   : > { %v1799_v15 = vld [vmem:[%s1928_s20 + $0x18] sm:$0xff]  ;;  %v1800_v19 = vld [vmem:[%s1928_s20 + $0x20] sm:$0xff]  ;;  %v1801_v23 = vld [vmem:[%s1928_s20 + $0x28] sm:$0xff] }
  0x13   : > { %v1815_v16 = vld [vmem:[%s1928_s20 + $0x98] sm:$0xff]  ;;  %v1816_v20 = vld [vmem:[%s1928_s20 + $0xa0] sm:$0xff]  ;;  %v1817_v24 = vld [vmem:[%s1928_s20 + $0xa8] sm:$0xff] }
  0x14   : > { %817 = vmatpush.bf16.msra.mxu0 %v1860_v2  ;;  %1869 = vmatpush.bf16.msra.mxu1 %v1860_v2  ;;  %v1831_v17 = vld [vmem:[%s1928_s20 + $0x118] sm:$0xff]  ;;  %v1832_v21 = vld [vmem:[%s1928_s20 + $0x120] sm:$0xff]  ;;  %v1833_v25 = vld [vmem:[%s1928_s20 + $0x128] sm:$0xff] }
  0x15   : > { %1870 = vmatpush.bf16.msra.mxu2 %v1860_v2  ;;  %1871 = vmatpush.bf16.msra.mxu3 %v1860_v2  ;;  %v1847_v18 = vld [vmem:[%s1928_s20 + $0x198] sm:$0xff]  ;;  %v1848_v22 = vld [vmem:[%s1928_s20 + $0x1a0] sm:$0xff]  ;;  %v1849_v26 = vld [vmem:[%s1928_s20 + $0x1a8] sm:$0xff] }
  0x16   : > { %v1802_v27 = vld [vmem:[%s1928_s20 + $0x30] sm:$0xff]  ;;  %v1803_v31 = vld [vmem:[%s1928_s20 + $0x38] sm:$0xff]  ;;  %v1804_v35 = vld [vmem:[%s1928_s20 + $0x40] sm:$0xff] }
  0x17   : > { %1728 = vmatmul.msk.bf16.vlgmr.msra.gmra.mxu0 %vm617_vm0, %v1796_v3  ;;  %1744 = vmatmul.msk.bf16.vlgmr.msra.gmra.mxu1 %vm617_vm0, %v1812_v4  ;;  %v1818_v28 = vld [vmem:[%s1928_s20 + $0xb0] sm:$0xff]  ;;  %v1819_v32 = vld [vmem:[%s1928_s20 + $0xb8] sm:$0xff]  ;;  %v1820_v36 = vld [vmem:[%s1928_s20 + $0xc0] sm:$0xff] }
  0x18   : > { %1760 = vmatmul.msk.bf16.vlgmr.msra.gmra.mxu2 %vm617_vm0, %v1828_v5  ;;  %1776 = vmatmul.msk.bf16.vlgmr.msra.gmra.mxu3 %vm617_vm0, %v1844_v6  ;;  %v1834_v29 = vld [vmem:[%s1928_s20 + $0x130] sm:$0xff]  ;;  %v1835_v33 = vld [vmem:[%s1928_s20 + $0x138] sm:$0xff]  ;;  %v1836_v39 = vld [vmem:[%s1928_s20 + $0x140] sm:$0xff] }
  0x19   : > { %v1850_v30 = vld [vmem:[%s1928_s20 + $0x1b0] sm:$0xff]  ;;  %v1851_v34 = vld [vmem:[%s1928_s20 + $0x1b8] sm:$0xff]  ;;  %v1852_v40 = vld [vmem:[%s1928_s20 + $0x1c0] sm:$0xff] }
  0x1a   : > { %v1805_v53 = vld [vmem:[%s1928_s20 + $0x48] sm:$0xff] }
  0x1b   : > { %v1821_v54 = vld [vmem:[%s1928_s20 + $0xc8] sm:$0xff] }
  0x1c   : > { %v1837_v59 = vld [vmem:[%s1928_s20 + $0x148] sm:$0xff] }
  0x1d   : > { %v1853_v60 = vld [vmem:[%s1928_s20 + $0x1c8] sm:$0xff] }
  0x27   : > { %1729 = vmatmul.msk.bf16.gmra.mxu0 %vm617_vm0, %v1797_v7  ;;  %1745 = vmatmul.msk.bf16.gmra.mxu1 %vm617_vm0, %v1813_v8 }
  0x28   : > { %1761 = vmatmul.msk.bf16.gmra.mxu2 %vm617_vm0, %v1829_v9  ;;  %1777 = vmatmul.msk.bf16.gmra.mxu3 %vm617_vm0, %v1845_v10  ;;  %v1806_v9 = vld [vmem:[%s1928_s20 + $0x50] sm:$0xff] }
  0x29   : > { %v1822_v10 = vld [vmem:[%s1928_s20 + $0xd0] sm:$0xff] }
  0x37   : > { %1730 = vmatmul.msk.bf16.gmra.mxu0 %vm617_vm0, %v1798_v11  ;;  %1746 = vmatmul.msk.bf16.gmra.mxu1 %vm617_vm0, %v1814_v12 }
  0x38   : > { %1762 = vmatmul.msk.bf16.gmra.mxu2 %vm617_vm0, %v1830_v13  ;;  %1778 = vmatmul.msk.bf16.gmra.mxu3 %vm617_vm0, %v1846_v14 }
  0x47   : > { %1731 = vmatmul.msk.bf16.gmra.mxu0 %vm617_vm0, %v1799_v15  ;;  %1747 = vmatmul.msk.bf16.gmra.mxu1 %vm617_vm0, %v1815_v16  ;;  %v1838_v15 = vld [vmem:[%s1928_s20 + $0x150] sm:$0xff] }
  0x48   : > { %1763 = vmatmul.msk.bf16.gmra.mxu2 %vm617_vm0, %v1831_v17  ;;  %1779 = vmatmul.msk.bf16.gmra.mxu3 %vm617_vm0, %v1847_v18  ;;  %v1854_v16 = vld [vmem:[%s1928_s20 + $0x1d0] sm:$0xff] }
  0x57   : > { %1732 = vmatmul.msk.bf16.gmra.mxu0 %vm617_vm0, %v1800_v19  ;;  %1748 = vmatmul.msk.bf16.gmra.mxu1 %vm617_vm0, %v1816_v20 }
  0x58   : > { %1764 = vmatmul.msk.bf16.gmra.mxu2 %vm617_vm0, %v1832_v21  ;;  %1780 = vmatmul.msk.bf16.gmra.mxu3 %vm617_vm0, %v1848_v22 }
  0x67   : > { %1733 = vmatmul.msk.bf16.gmra.mxu0 %vm617_vm0, %v1801_v23  ;;  %1749 = vmatmul.msk.bf16.gmra.mxu1 %vm617_vm0, %v1817_v24 }
  0x68   : > { %1765 = vmatmul.msk.bf16.gmra.mxu2 %vm617_vm0, %v1833_v25  ;;  %1781 = vmatmul.msk.bf16.gmra.mxu3 %vm617_vm0, %v1849_v26 }
  0x77   : > { %1734 = vmatmul.msk.bf16.gmra.mxu0 %vm617_vm0, %v1802_v27  ;;  %1750 = vmatmul.msk.bf16.gmra.mxu1 %vm617_vm0, %v1818_v28 }
  0x78   : > { %1766 = vmatmul.msk.bf16.gmra.mxu2 %vm617_vm0, %v1834_v29  ;;  %1782 = vmatmul.msk.bf16.gmra.mxu3 %vm617_vm0, %v1850_v30  ;;  %v1807_v29 = vld [vmem:[%s1928_s20 + $0x58] sm:$0xff] }
  0x79   : > { %v1823_v30 = vld [vmem:[%s1928_s20 + $0xd8] sm:$0xff] }
  0x87   : > { %1735 = vmatmul.msk.bf16.gmra.mxu0 %vm617_vm0, %v1803_v31  ;;  %1751 = vmatmul.msk.bf16.gmra.mxu1 %vm617_vm0, %v1819_v32 }
  0x88   : > { %1767 = vmatmul.msk.bf16.gmra.mxu2 %vm617_vm0, %v1835_v33  ;;  %1783 = vmatmul.msk.bf16.gmra.mxu3 %vm617_vm0, %v1851_v34 }
  0x94   : > { %v819_v37 = vpop.f32.mrf.mxu0  ;;  %v899_v38 = vpop.f32.mrf.mxu1 }
  0x95   : > { %v1139_v41 = vpack.c.bf16 %v819_v37, %v819_v37  ;;  %v1171_v42 = vpack.c.bf16 %v899_v38, %v899_v38 }
  0x97   : > { %1268 = vst.msk [vmem:[%s2001_s23] sm:$0xf] %vm1267_vm1, %v1139_v41  ;;  %1736 = vmatmul.msk.bf16.gmra.mxu0 %vm617_vm0, %v1804_v35  ;;  %1752 = vmatmul.msk.bf16.gmra.mxu1 %vm617_vm0, %v1820_v36  ;;  %v1839_v35 = vld [vmem:[%s1928_s20 + $0x158] sm:$0xff] }
  0x98   : > { %1300 = vst.msk [vmem:[%s2001_s23 + $0x80] sm:$0xf] %vm1267_vm1, %v1171_v42  ;;  %1768 = vmatmul.msk.bf16.gmra.mxu2 %vm617_vm0, %v1836_v39  ;;  %1784 = vmatmul.msk.bf16.gmra.mxu3 %vm617_vm0, %v1852_v40  ;;  %v1855_v36 = vld [vmem:[%s1928_s20 + $0x1d8] sm:$0xff] }
  0x9b   : > { %v979_v43 = vpop.f32.mrf.mxu2  ;;  %v1059_v44 = vpop.f32.mrf.mxu3 }
  0x9c   : > { %v1203_v45 = vpack.c.bf16 %v979_v43, %v979_v43  ;;  %v1235_v46 = vpack.c.bf16 %v1059_v44, %v1059_v44  ;;  %v821_v47 = vpop.f32.mrf.mxu0  ;;  %v901_v48 = vpop.f32.mrf.mxu1 }
  0x9d   : > { %v1140_v49 = vpack.c.bf16 %v821_v47, %v821_v47  ;;  %v1172_v50 = vpack.c.bf16 %v901_v48, %v901_v48 }
  0x9e   : > { %1332 = vst.msk [vmem:[%s2001_s23 + $0x100] sm:$0xf] %vm1267_vm1, %v1203_v45 }
  0x9f   : > { %1364 = vst.msk [vmem:[%s2001_s23 + $0x180] sm:$0xf] %vm1267_vm1, %v1235_v46 }
  0xa0   : > { %1269 = vst.msk [vmem:[%s2001_s23 + $0x4] sm:$0xf] %vm1267_vm1, %v1140_v49  ;;  %v1808_v49 = vld [vmem:[%s1928_s20 + $0x60] sm:$0xff] }
  0xa1   : > { %1301 = vst.msk [vmem:[%s2001_s23 + $0x84] sm:$0xf] %vm1267_vm1, %v1172_v50  ;;  %v1824_v50 = vld [vmem:[%s1928_s20 + $0xe0] sm:$0xff] }
  0xa3   : > { %v981_v51 = vpop.f32.mrf.mxu2  ;;  %v1061_v52 = vpop.f32.mrf.mxu3 }
  0xa4   : > { %v1204_v55 = vpack.c.bf16 %v981_v51, %v981_v51  ;;  %v1236_v56 = vpack.c.bf16 %v1061_v52, %v1061_v52  ;;  %v824_v57 = vpop.f32.mrf.mxu0  ;;  %v904_v58 = vpop.f32.mrf.mxu1 }
  0xa5   : > { %v1141_v61 = vpack.c.bf16 %v824_v57, %v824_v57  ;;  %v1173_v62 = vpack.c.bf16 %v904_v58, %v904_v58 }
  0xa6   : > { %1333 = vst.msk [vmem:[%s2001_s23 + $0x104] sm:$0xf] %vm1267_vm1, %v1204_v55  ;;  %v1840_v55 = vld [vmem:[%s1928_s20 + $0x160] sm:$0xff] }
  0xa7   : > { %1365 = vst.msk [vmem:[%s2001_s23 + $0x184] sm:$0xf] %vm1267_vm1, %v1236_v56  ;;  %1737 = vmatmul.msk.bf16.gmra.mxu0 %vm617_vm0, %v1805_v53  ;;  %1753 = vmatmul.msk.bf16.gmra.mxu1 %vm617_vm0, %v1821_v54  ;;  %v1856_v56 = vld [vmem:[%s1928_s20 + $0x1e0] sm:$0xff] }
  0xa8   : > { %1270 = vst.msk [vmem:[%s2001_s23 + $0x8] sm:$0xf] %vm1267_vm1, %v1141_v61  ;;  %1769 = vmatmul.msk.bf16.gmra.mxu2 %vm617_vm0, %v1837_v59  ;;  %1785 = vmatmul.msk.bf16.gmra.mxu3 %vm617_vm0, %v1853_v60 }
  0xa9   : > { %1302 = vst.msk [vmem:[%s2001_s23 + $0x88] sm:$0xf] %vm1267_vm1, %v1173_v62 }
  0xab   : > { %v984_v63 = vpop.f32.mrf.mxu2  ;;  %v1064_v0 = vpop.f32.mrf.mxu3 }
  0xac   : > { %v1205_v1 = vpack.c.bf16 %v984_v63, %v984_v63  ;;  %v1237_v2 = vpack.c.bf16 %v1064_v0, %v1064_v0  ;;  %v826_v3 = vpop.f32.mrf.mxu0  ;;  %v906_v4 = vpop.f32.mrf.mxu1 }
  0xad   : > { %v1142_v5 = vpack.c.bf16 %v826_v3, %v826_v3  ;;  %v1174_v6 = vpack.c.bf16 %v906_v4, %v906_v4 }
  0xae   : > { %1334 = vst.msk [vmem:[%s2001_s23 + $0x108] sm:$0xf] %vm1267_vm1, %v1205_v1 }
  0xaf   : > { %1366 = vst.msk [vmem:[%s2001_s23 + $0x188] sm:$0xf] %vm1267_vm1, %v1237_v2 }
  0xb0   : > { %1271 = vst.msk [vmem:[%s2001_s23 + $0xc] sm:$0xf] %vm1267_vm1, %v1142_v5  ;;  %v1809_v5 = vld [vmem:[%s1928_s20 + $0x68] sm:$0xff] }
  0xb1   : > { %1303 = vst.msk [vmem:[%s2001_s23 + $0x8c] sm:$0xf] %vm1267_vm1, %v1174_v6  ;;  %v1825_v6 = vld [vmem:[%s1928_s20 + $0xe8] sm:$0xff] }
  0xb3   : > { %v986_v7 = vpop.f32.mrf.mxu2  ;;  %v1066_v8 = vpop.f32.mrf.mxu3 }
  0xb4   : > { %v1206_v11 = vpack.c.bf16 %v986_v7, %v986_v7  ;;  %v1238_v12 = vpack.c.bf16 %v1066_v8, %v1066_v8  ;;  %v829_v13 = vpop.f32.mrf.mxu0  ;;  %v909_v14 = vpop.f32.mrf.mxu1 }
  0xb5   : > { %v1143_v17 = vpack.c.bf16 %v829_v13, %v829_v13  ;;  %v1175_v18 = vpack.c.bf16 %v909_v14, %v909_v14 }
  0xb6   : > { %1335 = vst.msk [vmem:[%s2001_s23 + $0x10c] sm:$0xf] %vm1267_vm1, %v1206_v11  ;;  %v1841_v11 = vld [vmem:[%s1928_s20 + $0x168] sm:$0xff] }
  0xb7   : > { %1367 = vst.msk [vmem:[%s2001_s23 + $0x18c] sm:$0xf] %vm1267_vm1, %v1238_v12  ;;  %1738 = vmatmul.msk.bf16.gmra.mxu0 %vm617_vm0, %v1806_v9  ;;  %1754 = vmatmul.msk.bf16.gmra.mxu1 %vm617_vm0, %v1822_v10  ;;  %v1857_v12 = vld [vmem:[%s1928_s20 + $0x1e8] sm:$0xff] }
  0xb8   : > { %1272 = vst.msk [vmem:[%s2001_s23 + $0x10] sm:$0xf] %vm1267_vm1, %v1143_v17  ;;  %1770 = vmatmul.msk.bf16.gmra.mxu2 %vm617_vm0, %v1838_v15  ;;  %1786 = vmatmul.msk.bf16.gmra.mxu3 %vm617_vm0, %v1854_v16 }
  0xb9   : > { %1304 = vst.msk [vmem:[%s2001_s23 + $0x90] sm:$0xf] %vm1267_vm1, %v1175_v18 }
  0xbb   : > { %v989_v19 = vpop.f32.mrf.mxu2  ;;  %v1069_v20 = vpop.f32.mrf.mxu3 }
  0xbc   : > { %v1207_v21 = vpack.c.bf16 %v989_v19, %v989_v19  ;;  %v1239_v22 = vpack.c.bf16 %v1069_v20, %v1069_v20  ;;  %v831_v23 = vpop.f32.mrf.mxu0  ;;  %v911_v24 = vpop.f32.mrf.mxu1 }
  0xbd   : > { %v1144_v25 = vpack.c.bf16 %v831_v23, %v831_v23  ;;  %v1176_v26 = vpack.c.bf16 %v911_v24, %v911_v24 }
  0xbe   : > { %1336 = vst.msk [vmem:[%s2001_s23 + $0x110] sm:$0xf] %vm1267_vm1, %v1207_v21 }
  0xbf   : > { %1368 = vst.msk [vmem:[%s2001_s23 + $0x190] sm:$0xf] %vm1267_vm1, %v1239_v22 }
  0xc0   : > { %1273 = vst.msk [vmem:[%s2001_s23 + $0x14] sm:$0xf] %vm1267_vm1, %v1144_v25  ;;  %v1810_v25 = vld [vmem:[%s1928_s20 + $0x70] sm:$0xff] }
  0xc1   : > { %1305 = vst.msk [vmem:[%s2001_s23 + $0x94] sm:$0xf] %vm1267_vm1, %v1176_v26  ;;  %v1826_v26 = vld [vmem:[%s1928_s20 + $0xf0] sm:$0xff] }
  0xc3   : > { %v991_v27 = vpop.f32.mrf.mxu2  ;;  %v1071_v28 = vpop.f32.mrf.mxu3 }
  0xc4   : > { %v1208_v31 = vpack.c.bf16 %v991_v27, %v991_v27  ;;  %v1240_v32 = vpack.c.bf16 %v1071_v28, %v1071_v28  ;;  %v834_v33 = vpop.f32.mrf.mxu0  ;;  %v914_v34 = vpop.f32.mrf.mxu1 }
  0xc5   : > { %v1145_v37 = vpack.c.bf16 %v834_v33, %v834_v33  ;;  %v1177_v38 = vpack.c.bf16 %v914_v34, %v914_v34 }
  0xc6   : > { %1337 = vst.msk [vmem:[%s2001_s23 + $0x114] sm:$0xf] %vm1267_vm1, %v1208_v31  ;;  %v1842_v31 = vld [vmem:[%s1928_s20 + $0x170] sm:$0xff] }
  0xc7   : > { %1369 = vst.msk [vmem:[%s2001_s23 + $0x194] sm:$0xf] %vm1267_vm1, %v1240_v32  ;;  %1739 = vmatmul.msk.bf16.gmra.mxu0 %vm617_vm0, %v1807_v29  ;;  %1755 = vmatmul.msk.bf16.gmra.mxu1 %vm617_vm0, %v1823_v30  ;;  %v1858_v32 = vld [vmem:[%s1928_s20 + $0x1f0] sm:$0xff] }
  0xc8   : > { %1274 = vst.msk [vmem:[%s2001_s23 + $0x18] sm:$0xf] %vm1267_vm1, %v1145_v37  ;;  %1771 = vmatmul.msk.bf16.gmra.mxu2 %vm617_vm0, %v1839_v35  ;;  %1787 = vmatmul.msk.bf16.gmra.mxu3 %vm617_vm0, %v1855_v36 }
  0xc9   : > { %1306 = vst.msk [vmem:[%s2001_s23 + $0x98] sm:$0xf] %vm1267_vm1, %v1177_v38 }
  0xcb   : > { %v994_v39 = vpop.f32.mrf.mxu2  ;;  %v1074_v40 = vpop.f32.mrf.mxu3 }
  0xcc   : > { %v1209_v41 = vpack.c.bf16 %v994_v39, %v994_v39  ;;  %v1241_v42 = vpack.c.bf16 %v1074_v40, %v1074_v40  ;;  %v836_v43 = vpop.f32.mrf.mxu0  ;;  %v916_v44 = vpop.f32.mrf.mxu1 }
  0xcd   : > { %v1146_v45 = vpack.c.bf16 %v836_v43, %v836_v43  ;;  %v1178_v46 = vpack.c.bf16 %v916_v44, %v916_v44 }
  0xce   : > { %1338 = vst.msk [vmem:[%s2001_s23 + $0x118] sm:$0xf] %vm1267_vm1, %v1209_v41 }
  0xcf   : > { %1370 = vst.msk [vmem:[%s2001_s23 + $0x198] sm:$0xf] %vm1267_vm1, %v1241_v42 }
  0xd0   : > { %1275 = vst.msk [vmem:[%s2001_s23 + $0x1c] sm:$0xf] %vm1267_vm1, %v1146_v45  ;;  %v1811_v45 = vld [vmem:[%s1928_s20 + $0x78] sm:$0xff] }
  0xd1   : > { %1307 = vst.msk [vmem:[%s2001_s23 + $0x9c] sm:$0xf] %vm1267_vm1, %v1178_v46  ;;  %v1827_v46 = vld [vmem:[%s1928_s20 + $0xf8] sm:$0xff] }
  0xd3   : > { %v996_v47 = vpop.f32.mrf.mxu2  ;;  %v1076_v48 = vpop.f32.mrf.mxu3 }
  0xd4   : > { %v1210_v51 = vpack.c.bf16 %v996_v47, %v996_v47  ;;  %v1242_v52 = vpack.c.bf16 %v1076_v48, %v1076_v48  ;;  %v839_v53 = vpop.f32.mrf.mxu0  ;;  %v919_v54 = vpop.f32.mrf.mxu1 }
  0xd5   : > { %v1147_v57 = vpack.c.bf16 %v839_v53, %v839_v53  ;;  %v1179_v58 = vpack.c.bf16 %v919_v54, %v919_v54 }
  0xd6   : > { %1339 = vst.msk [vmem:[%s2001_s23 + $0x11c] sm:$0xf] %vm1267_vm1, %v1210_v51  ;;  %v1843_v51 = vld [vmem:[%s1928_s20 + $0x178] sm:$0xff] }
  0xd7   : > { %1371 = vst.msk [vmem:[%s2001_s23 + $0x19c] sm:$0xf] %vm1267_vm1, %v1242_v52  ;;  %1740 = vmatmul.msk.bf16.gmra.mxu0 %vm617_vm0, %v1808_v49  ;;  %1756 = vmatmul.msk.bf16.gmra.mxu1 %vm617_vm0, %v1824_v50  ;;  %v1859_v52 = vld [vmem:[%s1928_s20 + $0x1f8] sm:$0xff] }
  0xd8   : > { %1276 = vst.msk [vmem:[%s2001_s23 + $0x20] sm:$0xf] %vm1267_vm1, %v1147_v57  ;;  %1772 = vmatmul.msk.bf16.gmra.mxu2 %vm617_vm0, %v1840_v55  ;;  %1788 = vmatmul.msk.bf16.gmra.mxu3 %vm617_vm0, %v1856_v56 }
  0xd9   : > { %1308 = vst.msk [vmem:[%s2001_s23 + $0xa0] sm:$0xf] %vm1267_vm1, %v1179_v58 }
  0xdb   : > { %v999_v59 = vpop.f32.mrf.mxu2  ;;  %v1079_v60 = vpop.f32.mrf.mxu3 }
  0xdc   : > { %v1211_v61 = vpack.c.bf16 %v999_v59, %v999_v59  ;;  %v1243_v62 = vpack.c.bf16 %v1079_v60, %v1079_v60  ;;  %v841_v63 = vpop.f32.mrf.mxu0  ;;  %v921_v0 = vpop.f32.mrf.mxu1 }
  0xdd   : > { %v1148_v1 = vpack.c.bf16 %v841_v63, %v841_v63  ;;  %v1180_v2 = vpack.c.bf16 %v921_v0, %v921_v0 }
  0xde   : > { %1340 = vst.msk [vmem:[%s2001_s23 + $0x120] sm:$0xf] %vm1267_vm1, %v1211_v61 }
  0xdf   : > { %1372 = vst.msk [vmem:[%s2001_s23 + $0x1a0] sm:$0xf] %vm1267_vm1, %v1243_v62 }
  0xe0   : > { %1277 = vst.msk [vmem:[%s2001_s23 + $0x24] sm:$0xf] %vm1267_vm1, %v1148_v1 }
  0xe1   : > { %1309 = vst.msk [vmem:[%s2001_s23 + $0xa4] sm:$0xf] %vm1267_vm1, %v1180_v2 }
  0xe3   : > { %v1001_v3 = vpop.f32.mrf.mxu2  ;;  %v1081_v4 = vpop.f32.mrf.mxu3 }
  0xe4   : > { %v1212_v7 = vpack.c.bf16 %v1001_v3, %v1001_v3  ;;  %v1244_v8 = vpack.c.bf16 %v1081_v4, %v1081_v4  ;;  %v844_v9 = vpop.f32.mrf.mxu0  ;;  %v924_v10 = vpop.f32.mrf.mxu1 }
  0xe5   : > { %v1149_v13 = vpack.c.bf16 %v844_v9, %v844_v9  ;;  %v1181_v14 = vpack.c.bf16 %v924_v10, %v924_v10 }
  0xe6   : > { %1341 = vst.msk [vmem:[%s2001_s23 + $0x124] sm:$0xf] %vm1267_vm1, %v1212_v7 }
  0xe7   : > { %1373 = vst.msk [vmem:[%s2001_s23 + $0x1a4] sm:$0xf] %vm1267_vm1, %v1244_v8  ;;  %1741 = vmatmul.msk.bf16.gmra.mxu0 %vm617_vm0, %v1809_v5  ;;  %1757 = vmatmul.msk.bf16.gmra.mxu1 %vm617_vm0, %v1825_v6 }
  0xe8   : > { %1278 = vst.msk [vmem:[%s2001_s23 + $0x28] sm:$0xf] %vm1267_vm1, %v1149_v13  ;;  %1773 = vmatmul.msk.bf16.gmra.mxu2 %vm617_vm0, %v1841_v11  ;;  %1789 = vmatmul.msk.bf16.gmra.mxu3 %vm617_vm0, %v1857_v12 }
  0xe9   : > { %1310 = vst.msk [vmem:[%s2001_s23 + $0xa8] sm:$0xf] %vm1267_vm1, %v1181_v14 }
  0xeb   : > { %v1004_v15 = vpop.f32.mrf.mxu2  ;;  %v1084_v16 = vpop.f32.mrf.mxu3 }
  0xec   : > { %v1213_v17 = vpack.c.bf16 %v1004_v15, %v1004_v15  ;;  %v1245_v18 = vpack.c.bf16 %v1084_v16, %v1084_v16  ;;  %v846_v19 = vpop.f32.mrf.mxu0  ;;  %v926_v20 = vpop.f32.mrf.mxu1 }
  0xed   : > { %v1150_v21 = vpack.c.bf16 %v846_v19, %v846_v19  ;;  %v1182_v22 = vpack.c.bf16 %v926_v20, %v926_v20 }
  0xee   : > { %1342 = vst.msk [vmem:[%s2001_s23 + $0x128] sm:$0xf] %vm1267_vm1, %v1213_v17 }
  0xef   : > { %1374 = vst.msk [vmem:[%s2001_s23 + $0x1a8] sm:$0xf] %vm1267_vm1, %v1245_v18 }
  0xf0   : > { %1279 = vst.msk [vmem:[%s2001_s23 + $0x2c] sm:$0xf] %vm1267_vm1, %v1150_v21 }
  0xf1   : > { %1311 = vst.msk [vmem:[%s2001_s23 + $0xac] sm:$0xf] %vm1267_vm1, %v1182_v22 }
  0xf3   : > { %v1006_v23 = vpop.f32.mrf.mxu2  ;;  %v1086_v24 = vpop.f32.mrf.mxu3 }
  0xf4   : > { %v1214_v27 = vpack.c.bf16 %v1006_v23, %v1006_v23  ;;  %v1246_v28 = vpack.c.bf16 %v1086_v24, %v1086_v24  ;;  %v849_v29 = vpop.f32.mrf.mxu0  ;;  %v929_v30 = vpop.f32.mrf.mxu1 }
  0xf5   : > { %v1151_v33 = vpack.c.bf16 %v849_v29, %v849_v29  ;;  %v1183_v34 = vpack.c.bf16 %v929_v30, %v929_v30 }
  0xf6   : > { %1343 = vst.msk [vmem:[%s2001_s23 + $0x12c] sm:$0xf] %vm1267_vm1, %v1214_v27 }
  0xf7   : > { %1375 = vst.msk [vmem:[%s2001_s23 + $0x1ac] sm:$0xf] %vm1267_vm1, %v1246_v28  ;;  %1742 = vmatmul.msk.bf16.gmra.mxu0 %vm617_vm0, %v1810_v25  ;;  %1758 = vmatmul.msk.bf16.gmra.mxu1 %vm617_vm0, %v1826_v26 }
  0xf8   : > { %1280 = vst.msk [vmem:[%s2001_s23 + $0x30] sm:$0xf] %vm1267_vm1, %v1151_v33  ;;  %1774 = vmatmul.msk.bf16.gmra.mxu2 %vm617_vm0, %v1842_v31  ;;  %1790 = vmatmul.msk.bf16.gmra.mxu3 %vm617_vm0, %v1858_v32 }
  0xf9   : > { %1312 = vst.msk [vmem:[%s2001_s23 + $0xb0] sm:$0xf] %vm1267_vm1, %v1183_v34 }
  0xfb   : > { %v1009_v35 = vpop.f32.mrf.mxu2  ;;  %v1089_v36 = vpop.f32.mrf.mxu3 }
  0xfc   : > { %v1215_v37 = vpack.c.bf16 %v1009_v35, %v1009_v35  ;;  %v1247_v38 = vpack.c.bf16 %v1089_v36, %v1089_v36  ;;  %v851_v39 = vpop.f32.mrf.mxu0  ;;  %v931_v40 = vpop.f32.mrf.mxu1 }
  0xfd   : > { %v1152_v41 = vpack.c.bf16 %v851_v39, %v851_v39  ;;  %v1184_v42 = vpack.c.bf16 %v931_v40, %v931_v40 }
  0xfe   : > { %1344 = vst.msk [vmem:[%s2001_s23 + $0x130] sm:$0xf] %vm1267_vm1, %v1215_v37 }
  0xff   : > { %1376 = vst.msk [vmem:[%s2001_s23 + $0x1b0] sm:$0xf] %vm1267_vm1, %v1247_v38 }
 0x100   : > { %1281 = vst.msk [vmem:[%s2001_s23 + $0x34] sm:$0xf] %vm1267_vm1, %v1152_v41 }
 0x101   : > { %1313 = vst.msk [vmem:[%s2001_s23 + $0xb4] sm:$0xf] %vm1267_vm1, %v1184_v42 }
 0x103   : > { %v1011_v43 = vpop.f32.mrf.mxu2  ;;  %v1091_v44 = vpop.f32.mrf.mxu3 }
 0x104   : > { %v1216_v47 = vpack.c.bf16 %v1011_v43, %v1011_v43  ;;  %v1248_v48 = vpack.c.bf16 %v1091_v44, %v1091_v44  ;;  %v854_v49 = vpop.f32.mrf.mxu0  ;;  %v934_v50 = vpop.f32.mrf.mxu1 }
 0x105   : > { %v1153_v53 = vpack.c.bf16 %v854_v49, %v854_v49  ;;  %v1185_v54 = vpack.c.bf16 %v934_v50, %v934_v50 }
 0x106   : > { %1345 = vst.msk [vmem:[%s2001_s23 + $0x134] sm:$0xf] %vm1267_vm1, %v1216_v47 }
 0x107   : > { %1377 = vst.msk [vmem:[%s2001_s23 + $0x1b4] sm:$0xf] %vm1267_vm1, %v1248_v48  ;;  %1743 = vmatmul.msk.bf16.gmra.mxu0 %vm617_vm0, %v1811_v45  ;;  %1759 = vmatmul.msk.bf16.gmra.mxu1 %vm617_vm0, %v1827_v46 }
 0x108   : > { %1282 = vst.msk [vmem:[%s2001_s23 + $0x38] sm:$0xf] %vm1267_vm1, %v1153_v53  ;;  %1775 = vmatmul.msk.bf16.gmra.mxu2 %vm617_vm0, %v1843_v51  ;;  %1791 = vmatmul.msk.bf16.gmra.mxu3 %vm617_vm0, %v1859_v52 }
 0x109   : > { %1314 = vst.msk [vmem:[%s2001_s23 + $0xb8] sm:$0xf] %vm1267_vm1, %v1185_v54 }
 0x10b   : > { %v1014_v55 = vpop.f32.mrf.mxu2  ;;  %v1094_v56 = vpop.f32.mrf.mxu3 }
 0x10c   : > { %v1217_v57 = vpack.c.bf16 %v1014_v55, %v1014_v55  ;;  %v1249_v58 = vpack.c.bf16 %v1094_v56, %v1094_v56  ;;  %v856_v59 = vpop.f32.mrf.mxu0  ;;  %v936_v60 = vpop.f32.mrf.mxu1 }
 0x10d   : > { %v1154_v61 = vpack.c.bf16 %v856_v59, %v856_v59  ;;  %v1186_v62 = vpack.c.bf16 %v936_v60, %v936_v60 }
 0x10e   : > { %1346 = vst.msk [vmem:[%s2001_s23 + $0x138] sm:$0xf] %vm1267_vm1, %v1217_v57 }
 0x10f   : > { %1378 = vst.msk [vmem:[%s2001_s23 + $0x1b8] sm:$0xf] %vm1267_vm1, %v1249_v58 }
 0x110   : > { %1283 = vst.msk [vmem:[%s2001_s23 + $0x3c] sm:$0xf] %vm1267_vm1, %v1154_v61 }
 0x111   : > { %1315 = vst.msk [vmem:[%s2001_s23 + $0xbc] sm:$0xf] %vm1267_vm1, %v1186_v62 }
 0x113   : > { %v1016_v63 = vpop.f32.mrf.mxu2  ;;  %v1096_v0 = vpop.f32.mrf.mxu3 }
 0x114   : > { %v1218_v1 = vpack.c.bf16 %v1016_v63, %v1016_v63  ;;  %v1250_v2 = vpack.c.bf16 %v1096_v0, %v1096_v0  ;;  %v859_v3 = vpop.f32.mrf.mxu0  ;;  %v939_v4 = vpop.f32.mrf.mxu1 }
 0x115   : > { %v1155_v5 = vpack.c.bf16 %v859_v3, %v859_v3  ;;  %v1187_v6 = vpack.c.bf16 %v939_v4, %v939_v4 }
 0x116   : > { %1347 = vst.msk [vmem:[%s2001_s23 + $0x13c] sm:$0xf] %vm1267_vm1, %v1218_v1 }
 0x117   : > { %1379 = vst.msk [vmem:[%s2001_s23 + $0x1bc] sm:$0xf] %vm1267_vm1, %v1250_v2 }
 0x118   : > { %1284 = vst.msk [vmem:[%s2001_s23 + $0x40] sm:$0xf] %vm1267_vm1, %v1155_v5 }
 0x119   : > { %1316 = vst.msk [vmem:[%s2001_s23 + $0xc0] sm:$0xf] %vm1267_vm1, %v1187_v6 }
 0x11b   : > { %v1019_v7 = vpop.f32.mrf.mxu2  ;;  %v1099_v8 = vpop.f32.mrf.mxu3 }
 0x11c   : > { %v1219_v9 = vpack.c.bf16 %v1019_v7, %v1019_v7  ;;  %v1251_v10 = vpack.c.bf16 %v1099_v8, %v1099_v8  ;;  %v861_v11 = vpop.f32.mrf.mxu0  ;;  %v941_v12 = vpop.f32.mrf.mxu1 }
 0x11d   : > { %v1156_v13 = vpack.c.bf16 %v861_v11, %v861_v11  ;;  %v1188_v14 = vpack.c.bf16 %v941_v12, %v941_v12 }
 0x11e   : > { %1348 = vst.msk [vmem:[%s2001_s23 + $0x140] sm:$0xf] %vm1267_vm1, %v1219_v9 }
 0x11f   : > { %1380 = vst.msk [vmem:[%s2001_s23 + $0x1c0] sm:$0xf] %vm1267_vm1, %v1251_v10 }
 0x120   : > { %1285 = vst.msk [vmem:[%s2001_s23 + $0x44] sm:$0xf] %vm1267_vm1, %v1156_v13 }
 0x121   : > { %1317 = vst.msk [vmem:[%s2001_s23 + $0xc4] sm:$0xf] %vm1267_vm1, %v1188_v14 }
 0x123   : > { %v1021_v15 = vpop.f32.mrf.mxu2  ;;  %v1101_v16 = vpop.f32.mrf.mxu3 }
 0x124   : > { %v1220_v17 = vpack.c.bf16 %v1021_v15, %v1021_v15  ;;  %v1252_v18 = vpack.c.bf16 %v1101_v16, %v1101_v16  ;;  %v864_v19 = vpop.f32.mrf.mxu0  ;;  %v944_v20 = vpop.f32.mrf.mxu1 }
 0x125   : > { %v1157_v21 = vpack.c.bf16 %v864_v19, %v864_v19  ;;  %v1189_v22 = vpack.c.bf16 %v944_v20, %v944_v20 }
 0x126   : > { %1349 = vst.msk [vmem:[%s2001_s23 + $0x144] sm:$0xf] %vm1267_vm1, %v1220_v17 }
 0x127   : > { %1381 = vst.msk [vmem:[%s2001_s23 + $0x1c4] sm:$0xf] %vm1267_vm1, %v1252_v18 }
 0x128   : > { %1286 = vst.msk [vmem:[%s2001_s23 + $0x48] sm:$0xf] %vm1267_vm1, %v1157_v21 }
 0x129   : > { %1318 = vst.msk [vmem:[%s2001_s23 + $0xc8] sm:$0xf] %vm1267_vm1, %v1189_v22 }
 0x12b   : > { %v1024_v23 = vpop.f32.mrf.mxu2  ;;  %v1104_v24 = vpop.f32.mrf.mxu3 }
 0x12c   : > { %v1221_v25 = vpack.c.bf16 %v1024_v23, %v1024_v23  ;;  %v1253_v26 = vpack.c.bf16 %v1104_v24, %v1104_v24  ;;  %v866_v27 = vpop.f32.mrf.mxu0  ;;  %v946_v28 = vpop.f32.mrf.mxu1 }
 0x12d   : > { %v1158_v29 = vpack.c.bf16 %v866_v27, %v866_v27  ;;  %v1190_v30 = vpack.c.bf16 %v946_v28, %v946_v28 }
 0x12e   : > { %1350 = vst.msk [vmem:[%s2001_s23 + $0x148] sm:$0xf] %vm1267_vm1, %v1221_v25 }
 0x12f   : > { %1382 = vst.msk [vmem:[%s2001_s23 + $0x1c8] sm:$0xf] %vm1267_vm1, %v1253_v26 }
 0x130   : > { %1287 = vst.msk [vmem:[%s2001_s23 + $0x4c] sm:$0xf] %vm1267_vm1, %v1158_v29 }
 0x131   : > { %1319 = vst.msk [vmem:[%s2001_s23 + $0xcc] sm:$0xf] %vm1267_vm1, %v1190_v30 }
 0x133   : > { %v1026_v31 = vpop.f32.mrf.mxu2  ;;  %v1106_v32 = vpop.f32.mrf.mxu3 }
 0x134   : > { %v1222_v33 = vpack.c.bf16 %v1026_v31, %v1026_v31  ;;  %v1254_v34 = vpack.c.bf16 %v1106_v32, %v1106_v32  ;;  %v869_v35 = vpop.f32.mrf.mxu0  ;;  %v949_v36 = vpop.f32.mrf.mxu1 }
 0x135   : > { %v1159_v37 = vpack.c.bf16 %v869_v35, %v869_v35  ;;  %v1191_v38 = vpack.c.bf16 %v949_v36, %v949_v36 }
 0x136   : > { %1351 = vst.msk [vmem:[%s2001_s23 + $0x14c] sm:$0xf] %vm1267_vm1, %v1222_v33 }
 0x137   : > { %1383 = vst.msk [vmem:[%s2001_s23 + $0x1cc] sm:$0xf] %vm1267_vm1, %v1254_v34 }
 0x138   : > { %1288 = vst.msk [vmem:[%s2001_s23 + $0x50] sm:$0xf] %vm1267_vm1, %v1159_v37 }
 0x139   : > { %1320 = vst.msk [vmem:[%s2001_s23 + $0xd0] sm:$0xf] %vm1267_vm1, %v1191_v38 }
 0x13b   : > { %v1029_v39 = vpop.f32.mrf.mxu2  ;;  %v1109_v40 = vpop.f32.mrf.mxu3 }
 0x13c   : > { %v1223_v41 = vpack.c.bf16 %v1029_v39, %v1029_v39  ;;  %v1255_v42 = vpack.c.bf16 %v1109_v40, %v1109_v40  ;;  %v871_v43 = vpop.f32.mrf.mxu0  ;;  %v951_v44 = vpop.f32.mrf.mxu1 }
 0x13d   : > { %v1160_v45 = vpack.c.bf16 %v871_v43, %v871_v43  ;;  %v1192_v46 = vpack.c.bf16 %v951_v44, %v951_v44 }
 0x13e   : > { %1352 = vst.msk [vmem:[%s2001_s23 + $0x150] sm:$0xf] %vm1267_vm1, %v1223_v41 }
 0x13f   : > { %1384 = vst.msk [vmem:[%s2001_s23 + $0x1d0] sm:$0xf] %vm1267_vm1, %v1255_v42 }
 0x140   : > { %1289 = vst.msk [vmem:[%s2001_s23 + $0x54] sm:$0xf] %vm1267_vm1, %v1160_v45 }
 0x141   : > { %1321 = vst.msk [vmem:[%s2001_s23 + $0xd4] sm:$0xf] %vm1267_vm1, %v1192_v46 }
 0x143   : > { %v1031_v47 = vpop.f32.mrf.mxu2  ;;  %v1111_v48 = vpop.f32.mrf.mxu3 }
 0x144   : > { %v1224_v49 = vpack.c.bf16 %v1031_v47, %v1031_v47  ;;  %v1256_v50 = vpack.c.bf16 %v1111_v48, %v1111_v48  ;;  %v874_v51 = vpop.f32.mrf.mxu0  ;;  %v954_v52 = vpop.f32.mrf.mxu1 }
 0x145   : > { %v1161_v53 = vpack.c.bf16 %v874_v51, %v874_v51  ;;  %v1193_v54 = vpack.c.bf16 %v954_v52, %v954_v52 }
 0x146   : > { %1353 = vst.msk [vmem:[%s2001_s23 + $0x154] sm:$0xf] %vm1267_vm1, %v1224_v49 }
 0x147   : > { %1385 = vst.msk [vmem:[%s2001_s23 + $0x1d4] sm:$0xf] %vm1267_vm1, %v1256_v50 }
 0x148   : > { %1290 = vst.msk [vmem:[%s2001_s23 + $0x58] sm:$0xf] %vm1267_vm1, %v1161_v53 }
 0x149   : > { %1322 = vst.msk [vmem:[%s2001_s23 + $0xd8] sm:$0xf] %vm1267_vm1, %v1193_v54 }
 0x14b   : > { %v1034_v55 = vpop.f32.mrf.mxu2  ;;  %v1114_v56 = vpop.f32.mrf.mxu3 }
 0x14c   : > { %v1225_v57 = vpack.c.bf16 %v1034_v55, %v1034_v55  ;;  %v1257_v58 = vpack.c.bf16 %v1114_v56, %v1114_v56  ;;  %v876_v59 = vpop.f32.mrf.mxu0  ;;  %v956_v60 = vpop.f32.mrf.mxu1 }
 0x14d   : > { %v1162_v61 = vpack.c.bf16 %v876_v59, %v876_v59  ;;  %v1194_v62 = vpack.c.bf16 %v956_v60, %v956_v60 }
 0x14e   : > { %1354 = vst.msk [vmem:[%s2001_s23 + $0x158] sm:$0xf] %vm1267_vm1, %v1225_v57 }
 0x14f   : > { %1386 = vst.msk [vmem:[%s2001_s23 + $0x1d8] sm:$0xf] %vm1267_vm1, %v1257_v58 }
 0x150   : > { %1291 = vst.msk [vmem:[%s2001_s23 + $0x5c] sm:$0xf] %vm1267_vm1, %v1162_v61 }
 0x151   : > { %1323 = vst.msk [vmem:[%s2001_s23 + $0xdc] sm:$0xf] %vm1267_vm1, %v1194_v62 }
 0x153   : > { %v1036_v63 = vpop.f32.mrf.mxu2  ;;  %v1116_v0 = vpop.f32.mrf.mxu3 }
 0x154   : > { %v1226_v1 = vpack.c.bf16 %v1036_v63, %v1036_v63  ;;  %v1258_v2 = vpack.c.bf16 %v1116_v0, %v1116_v0  ;;  %v879_v3 = vpop.f32.mrf.mxu0  ;;  %v959_v4 = vpop.f32.mrf.mxu1 }
 0x155   : > { %v1163_v5 = vpack.c.bf16 %v879_v3, %v879_v3  ;;  %v1195_v6 = vpack.c.bf16 %v959_v4, %v959_v4 }
 0x156   : > { %1355 = vst.msk [vmem:[%s2001_s23 + $0x15c] sm:$0xf] %vm1267_vm1, %v1226_v1 }
 0x157   : > { %1387 = vst.msk [vmem:[%s2001_s23 + $0x1dc] sm:$0xf] %vm1267_vm1, %v1258_v2 }
 0x158   : > { %1292 = vst.msk [vmem:[%s2001_s23 + $0x60] sm:$0xf] %vm1267_vm1, %v1163_v5 }
 0x159   : > { %1324 = vst.msk [vmem:[%s2001_s23 + $0xe0] sm:$0xf] %vm1267_vm1, %v1195_v6 }
 0x15b   : > { %v1039_v7 = vpop.f32.mrf.mxu2  ;;  %v1119_v8 = vpop.f32.mrf.mxu3 }
 0x15c   : > { %v1227_v9 = vpack.c.bf16 %v1039_v7, %v1039_v7  ;;  %v1259_v10 = vpack.c.bf16 %v1119_v8, %v1119_v8  ;;  %v881_v11 = vpop.f32.mrf.mxu0  ;;  %v961_v12 = vpop.f32.mrf.mxu1 }
 0x15d   : > { %v1164_v13 = vpack.c.bf16 %v881_v11, %v881_v11  ;;  %v1196_v14 = vpack.c.bf16 %v961_v12, %v961_v12 }
 0x15e   : > { %1356 = vst.msk [vmem:[%s2001_s23 + $0x160] sm:$0xf] %vm1267_vm1, %v1227_v9 }
 0x15f   : > { %1388 = vst.msk [vmem:[%s2001_s23 + $0x1e0] sm:$0xf] %vm1267_vm1, %v1259_v10 }
 0x160   : > { %1293 = vst.msk [vmem:[%s2001_s23 + $0x64] sm:$0xf] %vm1267_vm1, %v1164_v13 }
 0x161   : > { %1325 = vst.msk [vmem:[%s2001_s23 + $0xe4] sm:$0xf] %vm1267_vm1, %v1196_v14 }
 0x163   : > { %v1041_v15 = vpop.f32.mrf.mxu2  ;;  %v1121_v16 = vpop.f32.mrf.mxu3 }
 0x164   : > { %v1228_v17 = vpack.c.bf16 %v1041_v15, %v1041_v15  ;;  %v1260_v18 = vpack.c.bf16 %v1121_v16, %v1121_v16  ;;  %v884_v19 = vpop.f32.mrf.mxu0  ;;  %v964_v20 = vpop.f32.mrf.mxu1 }
 0x165   : > { %v1165_v21 = vpack.c.bf16 %v884_v19, %v884_v19  ;;  %v1197_v22 = vpack.c.bf16 %v964_v20, %v964_v20 }
 0x166   : > { %1357 = vst.msk [vmem:[%s2001_s23 + $0x164] sm:$0xf] %vm1267_vm1, %v1228_v17 }
 0x167   : > { %1389 = vst.msk [vmem:[%s2001_s23 + $0x1e4] sm:$0xf] %vm1267_vm1, %v1260_v18 }
 0x168   : > { %1294 = vst.msk [vmem:[%s2001_s23 + $0x68] sm:$0xf] %vm1267_vm1, %v1165_v21 }
 0x169   : > { %1326 = vst.msk [vmem:[%s2001_s23 + $0xe8] sm:$0xf] %vm1267_vm1, %v1197_v22 }
 0x16b   : > { %v1044_v23 = vpop.f32.mrf.mxu2  ;;  %v1124_v24 = vpop.f32.mrf.mxu3 }
 0x16c   : > { %v1229_v25 = vpack.c.bf16 %v1044_v23, %v1044_v23  ;;  %v1261_v26 = vpack.c.bf16 %v1124_v24, %v1124_v24  ;;  %v886_v27 = vpop.f32.mrf.mxu0  ;;  %v966_v28 = vpop.f32.mrf.mxu1 }
 0x16d   : > { %v1166_v29 = vpack.c.bf16 %v886_v27, %v886_v27  ;;  %v1198_v30 = vpack.c.bf16 %v966_v28, %v966_v28 }
 0x16e   : > { %1358 = vst.msk [vmem:[%s2001_s23 + $0x168] sm:$0xf] %vm1267_vm1, %v1229_v25 }
 0x16f   : > { %1390 = vst.msk [vmem:[%s2001_s23 + $0x1e8] sm:$0xf] %vm1267_vm1, %v1261_v26 }
 0x170   : > { %1295 = vst.msk [vmem:[%s2001_s23 + $0x6c] sm:$0xf] %vm1267_vm1, %v1166_v29 }
 0x171   : > { %1327 = vst.msk [vmem:[%s2001_s23 + $0xec] sm:$0xf] %vm1267_vm1, %v1198_v30 }
 0x173   : > { %v1046_v31 = vpop.f32.mrf.mxu2  ;;  %v1126_v32 = vpop.f32.mrf.mxu3 }
 0x174   : > { %v1230_v33 = vpack.c.bf16 %v1046_v31, %v1046_v31  ;;  %v1262_v34 = vpack.c.bf16 %v1126_v32, %v1126_v32  ;;  %v889_v35 = vpop.f32.mrf.mxu0  ;;  %v969_v36 = vpop.f32.mrf.mxu1 }
 0x175   : > { %v1167_v37 = vpack.c.bf16 %v889_v35, %v889_v35  ;;  %v1199_v38 = vpack.c.bf16 %v969_v36, %v969_v36 }
 0x176   : > { %1359 = vst.msk [vmem:[%s2001_s23 + $0x16c] sm:$0xf] %vm1267_vm1, %v1230_v33 }
 0x177   : > { %1391 = vst.msk [vmem:[%s2001_s23 + $0x1ec] sm:$0xf] %vm1267_vm1, %v1262_v34 }
 0x178   : > { %1296 = vst.msk [vmem:[%s2001_s23 + $0x70] sm:$0xf] %vm1267_vm1, %v1167_v37 }
 0x179   : > { %1328 = vst.msk [vmem:[%s2001_s23 + $0xf0] sm:$0xf] %vm1267_vm1, %v1199_v38 }
 0x17b   : > { %v1049_v39 = vpop.f32.mrf.mxu2  ;;  %v1129_v40 = vpop.f32.mrf.mxu3 }
 0x17c   : > { %v1231_v41 = vpack.c.bf16 %v1049_v39, %v1049_v39  ;;  %v1263_v42 = vpack.c.bf16 %v1129_v40, %v1129_v40  ;;  %v891_v43 = vpop.f32.mrf.mxu0  ;;  %v971_v44 = vpop.f32.mrf.mxu1 }
 0x17d   : > { %v1168_v45 = vpack.c.bf16 %v891_v43, %v891_v43  ;;  %v1200_v46 = vpack.c.bf16 %v971_v44, %v971_v44 }
 0x17e   : > { %1360 = vst.msk [vmem:[%s2001_s23 + $0x170] sm:$0xf] %vm1267_vm1, %v1231_v41 }
 0x17f   : > { %1392 = vst.msk [vmem:[%s2001_s23 + $0x1f0] sm:$0xf] %vm1267_vm1, %v1263_v42 }
 0x180   : > { %1297 = vst.msk [vmem:[%s2001_s23 + $0x74] sm:$0xf] %vm1267_vm1, %v1168_v45 }
 0x181   : > { %1329 = vst.msk [vmem:[%s2001_s23 + $0xf4] sm:$0xf] %vm1267_vm1, %v1200_v46 }
 0x183   : > { %v1051_v47 = vpop.f32.mrf.mxu2  ;;  %v1131_v48 = vpop.f32.mrf.mxu3 }
 0x184   : > { %v1232_v49 = vpack.c.bf16 %v1051_v47, %v1051_v47  ;;  %v1264_v50 = vpack.c.bf16 %v1131_v48, %v1131_v48  ;;  %v894_v51 = vpop.f32.mrf.mxu0  ;;  %v974_v52 = vpop.f32.mrf.mxu1 }
 0x185   : > { %v1169_v53 = vpack.c.bf16 %v894_v51, %v894_v51  ;;  %v1201_v54 = vpack.c.bf16 %v974_v52, %v974_v52 }
 0x186   : > { %1361 = vst.msk [vmem:[%s2001_s23 + $0x174] sm:$0xf] %vm1267_vm1, %v1232_v49 }
 0x187   : > { %1393 = vst.msk [vmem:[%s2001_s23 + $0x1f4] sm:$0xf] %vm1267_vm1, %v1264_v50 }
 0x188   : > { %1298 = vst.msk [vmem:[%s2001_s23 + $0x78] sm:$0xf] %vm1267_vm1, %v1169_v53 }
 0x189   : > { %1330 = vst.msk [vmem:[%s2001_s23 + $0xf8] sm:$0xf] %vm1267_vm1, %v1201_v54 }
 0x18b   : > { %v1054_v55 = vpop.f32.mrf.mxu2  ;;  %v1134_v56 = vpop.f32.mrf.mxu3 }
 0x18c   : > { %v1233_v57 = vpack.c.bf16 %v1054_v55, %v1054_v55  ;;  %v1265_v58 = vpack.c.bf16 %v1134_v56, %v1134_v56  ;;  %v896_v59 = vpop.f32.mrf.mxu0  ;;  %v976_v60 = vpop.f32.mrf.mxu1 }
 0x18d   : > { %v1170_v61 = vpack.c.bf16 %v896_v59, %v896_v59  ;;  %v1202_v62 = vpack.c.bf16 %v976_v60, %v976_v60 }
 0x18e   : > { %1362 = vst.msk [vmem:[%s2001_s23 + $0x178] sm:$0xf] %vm1267_vm1, %v1233_v57 }
 0x18f   : > { %1394 = vst.msk [vmem:[%s2001_s23 + $0x1f8] sm:$0xf] %vm1267_vm1, %v1265_v58 }
 0x190   : > { %1299 = vst.msk [vmem:[%s2001_s23 + $0x7c] sm:$0xf] %vm1267_vm1, %v1170_v61 }
 0x191   : > { %1331 = vst.msk [vmem:[%s2001_s23 + $0xfc] sm:$0xf] %vm1267_vm1, %v1202_v62 }
 0x193   : > { %v1056_v63 = vpop.f32.mrf.mxu2  ;;  %v1136_v0 = vpop.f32.mrf.mxu3 }
 0x194   : > { %v1234_v1 = vpack.c.bf16 %v1056_v63, %v1056_v63  ;;  %v1266_v2 = vpack.c.bf16 %v1136_v0, %v1136_v0 }
 0x196   : > { %1363 = vst.msk [vmem:[%s2001_s23 + $0x17c] sm:$0xf] %vm1267_vm1, %v1234_v1 }
 0x197   : > { %1395 = vst.msk [vmem:[%s2001_s23 + $0x1fc] sm:$0xf] %vm1267_vm1, %v1266_v2 }
 0x198 PF: > { %s12_s9 = sadd.s32 1, %s1886_s9  }
 0x199   : > { %p9_p4 = scmp.ge.s32.totalorder %s12_s9, 4  }
 0x19b   :  { %11 = sbr.rel (!%p9_p4) target bundleno = 1 (0x1), region = 58 }

// kernel: tile.18
= control target key start
LH: loop header
LB: loop body
LE: loop exit
PB: predicated region body
PF: predicated region fallthrough
CT: control target
= control target key end

     0   :  { %s20_s0 = inlined_call_operand.<no memory space> [shape: f32[], index: 0, kind: input, shape index: {}]   ;;  %s21_s1 = inlined_call_operand.vmem [shape: f32[1,128], index: 1, kind: output, shape index: {}]  }
   0x1   :  { %v2_v0 = vstv %s20_s0 }
   0x2   :  { %3 = vst [vmem:[%s21_s1] sm:$0x1] %v2_v0 }

// kernel: discriminator64x64_forward.6
= control target key start
LH: loop header
LB: loop body
LE: loop exit
PB: predicated region body
PF: predicated region fallthrough
CT: control target
= control target key end

     0   :  { %s1263_s21 = smov 0   ;;  %s1822_s0 = inlined_call_operand.vmem [shape: bf16[2,256,128], index: 0, kind: input, shape index: {}]   ;;  %s1823_s1 = inlined_call_operand.vmem [shape: bf16[128,16], index: 1, kind: input, shape index: {}]   ;;  %s1824_s2 = inlined_call_operand.vmem [shape: f32[1,128], index: 2, kind: input, shape index: {}]   ;;  %s1825_s3 = inlined_call_operand.vmem [shape: f32[1,128], index: 3, kind: input, shape index: {}]   ;;  %s1826_s4 = inlined_call_operand.vmem [shape: f32[256,128], index: 4, kind: input, shape index: {}]   ;;  %s1827_s5 = inlined_call_operand.vmem [shape: bf16[2,256,16], index: 5, kind: output, shape index: {0}]   ;;  %s1828_s6 = inlined_call_operand.vmem [shape: f32[2,2,16], index: 6, kind: output, shape index: {1}]  }
   0x1 LB: > { %s1053_s22 = sadd.s32 4294967295, %s1226_s21   ;;  %p1057_p0 = scmp.ge.s32.totalorder %s1226_s21, 1  ;;  %s1226_s21 = sphi %s1263_s21, %s17_s21  }
   0x2   : > { %p215_p1 = scmp.lt.s32.totalorder %s1226_s21, 3 }
   0x4   : > { %p216_p2 = pnand %p1057_p0, %p215_p1 }
   0x5   : > { %p249_p3 = scmp.lt.s32.totalorder (!%p216_p2), %s1053_s22, 1 }
   0x6   : > { %219 = sbr.rel (%p216_p2) target bundleno = 291 (0x123), region = 40 }
   0xb   : > { %v1106_v0 = vld [vmem:[%s1823_s1 + $0x38] sm:$0xff]  ;;  %v1105_v1 = vld [vmem:[%s1823_s1 + $0x30] sm:$0xff]  ;;  %s1830_s22 = smov (!%p249_p3, %s1053_s22), 1  ;;  %v1290_v2 = vld [vmem:[%s1824_s2] ss:$0 sm:$0xff] }
   0xc   : > { %639 = vmatpush.bf16.msra.mxu0 %v1106_v0  ;;  %1186 = vmatpush.bf16.msra.mxu1 %v1106_v0  ;;  %s1097_s27 = sshll.u32 %s1830_s22, 7  ;;  %v1104_v3 = vld [vmem:[%s1823_s1 + $0x28] sm:$0xff]  ;;  %v1301_v11 = vld [vmem:[%s1825_s3] ss:$0 sm:$0xff]  ;;  %v1102_v26 = vld [vmem:[%s1823_s1 + $0x18] sm:$0xff] }
   0xd   : > { %1187 = vmatpush.bf16.msra.mxu2 %v1106_v0  ;;  %1188 = vmatpush.bf16.msra.mxu3 %v1106_v0  ;;  %s1285_s30 = scalar_lea.vmem %s1822_s0, %s1097_s27  ;;  %v1103_v18 = vld [vmem:[%s1823_s1 + $0x20] sm:$0xff]  ;;  %v1101_v36 = vld [vmem:[%s1823_s1 + $0x10] sm:$0xff]  ;;  %v1100_v42 = vld [vmem:[%s1823_s1 + $0x8] sm:$0xff]  ;;  %s1517_s8 = scalar_lea.vmem %s1827_s5, %s1097_s27 }
   0xe   : > { %v1108_v4 = vld [vmem:[%s1285_s30] sm:$0xff]   ;;  %v1171_v12 = vld [vmem:[%s1285_s30 + $0x8] sm:$0xff]   ;;  %v1172_v59 = vld [vmem:[%s1285_s30 + $0x10] sm:$0xff]   ;;  %s1062_s27 = sshll.u32 %s1830_s22, 1 }
   0xf   : > { %v1174_v5 = vld [vmem:[%s1285_s30 + $0x20] sm:$0xff]   ;;  %v1109_v6 = vunpack.c.l.bf16 %v1108_v4  ;;  %v1110_v7 = vunpack.c.h.bf16 %v1108_v4  ;;  %v1113_v21 = vunpack.c.l.bf16 %v1171_v12  ;;  %v1114_v29 = vunpack.c.h.bf16 %v1171_v12  ;;  %v1175_v33 = vld [vmem:[%s1285_s30 + $0x28] sm:$0xff]  }
  0x10   : > { %640 = vmatpush.bf16.msra.mxu0 %v1105_v1  ;;  %1189 = vmatpush.bf16.msra.mxu1 %v1105_v1  ;;  %v1125_v8 = vunpack.c.l.bf16 %v1174_v5  ;;  %v1126_v9 = vunpack.c.h.bf16 %v1174_v5  ;;  %v1178_v10 = vld [vmem:[%s1285_s30 + $0x40] sm:$0xff]   ;;  %v1129_v41 = vunpack.c.l.bf16 %v1175_v33  ;;  %v496_v46 = vld [vmem:[%s1826_s4 + $0x8] sm:$0xff]  ;;  %v1130_v57 = vunpack.c.h.bf16 %v1175_v33  ;;  %v498_v33 = vld [vmem:[%s1826_s4 + $0x18] sm:$0xff] }
  0x11   : > { %1190 = vmatpush.bf16.msra.mxu2 %v1105_v1  ;;  %1191 = vmatpush.bf16.msra.mxu3 %v1105_v1  ;;  %v1141_v13 = vunpack.c.l.bf16 %v1178_v10  ;;  %v331_v14 = vmul.f32 %v1290_v2, %v1109_v6  ;;  %v332_v15 = vmul.f32 %v1290_v2, %v1110_v7  ;;  %v1142_v19 = vunpack.c.h.bf16 %v1178_v10  ;;  %v495_v45 = vld [vmem:[%s1826_s4] sm:$0xff]  ;;  %v504_v51 = vld [vmem:[%s1826_s4 + $0x48] sm:$0xff] }
  0x12   : > { %v339_v16 = vmul.f32 %v1290_v2, %v1125_v8  ;;  %v340_v17 = vmul.f32 %v1290_v2, %v1126_v9  ;;  %v333_v30 = vmul.f32 %v1290_v2, %v1113_v21  ;;  %v334_v39 = vmul.f32 %v1290_v2, %v1114_v29  ;;  %v503_v50 = vld [vmem:[%s1826_s4 + $0x40] sm:$0xff]  ;;  %v1179_v52 = vld [vmem:[%s1285_s30 + $0x48] sm:$0xff]   ;;  %v497_v21 = vld [vmem:[%s1826_s4 + $0x10] sm:$0xff] }
  0x13   : > { %v347_v20 = vmul.f32 %v1290_v2, %v1141_v13  ;;  %v367_v22 = vadd.f32 %v1301_v11, %v331_v14  ;;  %v368_v23 = vadd.f32 %v1301_v11, %v332_v15  ;;  %v348_v27 = vmul.f32 %v1290_v2, %v1142_v19  ;;  %v511_v55 = vld [vmem:[%s1826_s4 + $0x80] sm:$0xff]  ;;  %v512_v56 = vld [vmem:[%s1826_s4 + $0x88] sm:$0xff] }
  0x14   : > { %641 = vmatpush.bf16.msra.mxu0 %v1104_v3  ;;  %1192 = vmatpush.bf16.msra.mxu1 %v1104_v3  ;;  %v375_v24 = vadd.f32 %v1301_v11, %v339_v16  ;;  %v376_v25 = vadd.f32 %v1301_v11, %v340_v17  ;;  %v369_v40 = vadd.f32 %v1301_v11, %v333_v30  ;;  %v1182_v63 = vld [vmem:[%s1285_s30 + $0x60] sm:$0xff]   ;;  %v1146_v4 = vunpack.c.h.bf16 %v1179_v52 }
  0x15   : > { %1193 = vmatpush.bf16.msra.mxu2 %v1104_v3  ;;  %1194 = vmatpush.bf16.msra.mxu3 %v1104_v3  ;;  %v383_v28 = vadd.f32 %v1301_v11, %v347_v20  ;;  %v431_v31 = vmul.f32 0.2, %v367_v22  ;;  %v432_v32 = vmul.f32 0.2, %v368_v23  ;;  %vm399_vm0 = vcmp.gt.f32.partialorder %v367_v22, 0.0  ;;  %v1099_v9 = vld [vmem:[%s1823_s1] sm:$0xff] }
  0x16   : > { %vm400_vm1 = vcmp.gt.f32.partialorder %v368_v23, 0.0  ;;  %v439_v34 = vmul.f32 0.2, %v375_v24  ;;  %v440_v35 = vmul.f32 0.2, %v376_v25  ;;  %vm407_vm2 = vcmp.gt.f32.partialorder %v375_v24, 0.0 }
  0x17   : > { %vm408_vm3 = vcmp.gt.f32.partialorder %v376_v25, 0.0  ;;  %v384_v37 = vadd.f32 %v1301_v11, %v348_v27  ;;  %v447_v38 = vmul.f32 0.2, %v383_v28  ;;  %vm415_vm4 = vcmp.gt.f32.partialorder %v383_v28, 0.0 }
  0x18   : > { %642 = vmatpush.bf16.msra.mxu0 %v1103_v18  ;;  %1195 = vmatpush.bf16.msra.mxu1 %v1103_v18  ;;  %v463_v43 = vsel %vm399_vm0, %v367_v22, %v431_v31  ;;  %v464_v44 = vsel %vm400_vm1, %v368_v23, %v432_v32  ;;  %v471_v48 = vsel %vm407_vm2, %v375_v24, %v439_v34  ;;  %vm401_vm6 = vcmp.gt.f32.partialorder %v369_v40, 0.0 }
  0x19   : > { %1196 = vmatpush.bf16.msra.mxu2 %v1103_v18  ;;  %1197 = vmatpush.bf16.msra.mxu3 %v1103_v18  ;;  %vm416_vm5 = vcmp.gt.f32.partialorder %v384_v37, 0.0  ;;  %v448_v47 = vmul.f32 0.2, %v384_v37  ;;  %v472_v49 = vsel %vm408_vm3, %v376_v25, %v440_v35  ;;  %v479_v53 = vsel %vm415_vm4, %v383_v28, %v447_v38 }
  0x1a   : > { %v341_v58 = vmul.f32 %v1290_v2, %v1129_v41  ;;  %v527_v60 = vmul.f32 %v495_v45, %v463_v43  ;;  %v528_v61 = vmul.f32 %v496_v46, %v464_v44  ;;  %v370_v62 = vadd.f32 %v1301_v11, %v334_v39  ;;  %v505_v41 = vld [vmem:[%s1826_s4 + $0x50] sm:$0xff] }
  0x1b   : > { %v480_v54 = vsel %vm416_vm5, %v384_v37, %v448_v47  ;;  %v535_v0 = vmul.f32 %v503_v50, %v471_v48  ;;  %v536_v1 = vmul.f32 %v504_v51, %v472_v49  ;;  %v1145_v3 = vunpack.c.l.bf16 %v1179_v52  ;;  %v519_v47 = vld [vmem:[%s1826_s4 + $0xc0] sm:$0xff]  ;;  %v520_v49 = vld [vmem:[%s1826_s4 + $0xc8] sm:$0xff] }
  0x1c   : > { %643 = vmatpush.bf16.msra.mxu0 %v1102_v26  ;;  %1198 = vmatpush.bf16.msra.mxu1 %v1102_v26  ;;  %v433_v5 = vmul.f32 0.2, %v369_v40  ;;  %v543_v6 = vmul.f32 %v511_v55, %v479_v53  ;;  %v544_v7 = vmul.f32 %v512_v56, %v480_v54  ;;  %v1117_v8 = vunpack.c.l.bf16 %v1172_v59  ;;  %v506_v53 = vld [vmem:[%s1826_s4 + $0x58] sm:$0xff]  ;;  %v513_v56 = vld [vmem:[%s1826_s4 + $0x90] sm:$0xff] }
  0x1d   : > { %1199 = vmatpush.bf16.msra.mxu2 %v1102_v26  ;;  %1200 = vmatpush.bf16.msra.mxu3 %v1102_v26  ;;  %v342_v10 = vmul.f32 %v1290_v2, %v1130_v57  ;;  %v377_v12 = vadd.f32 %v1301_v11, %v341_v58  ;;  %v349_v13 = vmul.f32 %v1290_v2, %v1145_v3  ;;  %v1157_v14 = vunpack.c.l.bf16 %v1182_v63 }
  0x1e   : > { %vm402_vm7 = vcmp.gt.f32.partialorder %v370_v62, 0.0  ;;  %v350_v15 = vmul.f32 %v1290_v2, %v1146_v4  ;;  %v559_v16 = vpack.c.bf16 %v528_v61, %v527_v60  ;;  %v563_v17 = vpack.c.bf16 %v536_v1, %v535_v0  ;;  %v514_v60 = vld [vmem:[%s1826_s4 + $0x98] sm:$0xff] }
  0x1f   : > { %v434_v18 = vmul.f32 0.2, %v370_v62  ;;  %v1118_v19 = vunpack.c.h.bf16 %v1172_v59  ;;  %v465_v20 = vsel %vm401_vm6, %v369_v40, %v433_v5  ;;  %v567_v22 = vpack.c.bf16 %v544_v7, %v543_v6  ;;  %v1176_v40 = vld [vmem:[%s1285_s30 + $0x30] sm:$0xff]   ;;  %v1183_v7 = vld [vmem:[%s1285_s30 + $0x68] sm:$0xff]  }
  0x20   : > { %644 = vmatpush.bf16.msra.mxu0 %v1101_v36  ;;  %1201 = vmatpush.bf16.msra.mxu1 %v1101_v36  ;;  %v335_v23 = vmul.f32 %v1290_v2, %v1117_v8  ;;  %v1158_v24 = vunpack.c.h.bf16 %v1182_v63  ;;  %v378_v25 = vadd.f32 %v1301_v11, %v342_v10  ;;  %v441_v26 = vmul.f32 0.2, %v377_v12  ;;  %v1180_v63 = vld [vmem:[%s1285_s30 + $0x50] sm:$0xff]  }
  0x21   : > { %1202 = vmatpush.bf16.msra.mxu2 %v1101_v36  ;;  %1203 = vmatpush.bf16.msra.mxu3 %v1101_v36  ;;  %v385_v27 = vadd.f32 %v1301_v11, %v349_v13  ;;  %v355_v28 = vmul.f32 %v1290_v2, %v1157_v14  ;;  %vm409_vm8 = vcmp.gt.f32.partialorder %v377_v12, 0.0  ;;  %v386_v29 = vadd.f32 %v1301_v11, %v350_v15 }
  0x22   : > { %v466_v30 = vsel %vm402_vm7, %v370_v62, %v434_v18  ;;  %v1377_v31 = vmul.f32 %v497_v21, %v465_v20  ;;  %v336_v32 = vmul.f32 %v1290_v2, %v1118_v19  ;;  %v371_v34 = vadd.f32 %v1301_v11, %v335_v23  ;;  %v499_v21 = vld [vmem:[%s1826_s4 + $0x20] sm:$0xff] }
  0x23   : > { %v356_v35 = vmul.f32 %v1290_v2, %v1158_v24  ;;  %v391_v36 = vadd.f32 %v1301_v11, %v355_v28  ;;  %vm410_vm9 = vcmp.gt.f32.partialorder %v378_v25, 0.0  ;;  %v442_v37 = vmul.f32 0.2, %v378_v25 }
  0x24   : > { %645 = vmatpush.bf16.msra.mxu0 %v1100_v42  ;;  %1204 = vmatpush.bf16.msra.mxu1 %v1100_v42  ;;  %v473_v38 = vsel %vm409_vm8, %v377_v12, %v441_v26  ;;  %v449_v39 = vmul.f32 0.2, %v385_v27  ;;  %vm417_vm10 = vcmp.gt.f32.partialorder %v385_v27, 0.0  ;;  %v530_v44 = vmul.f32 %v498_v33, %v466_v30 }
  0x25   : > { %1205 = vmatpush.bf16.msra.mxu2 %v1100_v42  ;;  %1206 = vmatpush.bf16.msra.mxu3 %v1100_v42  ;;  %v450_v42 = vmul.f32 0.2, %v386_v29  ;;  %v392_v43 = vadd.f32 %v1301_v11, %v356_v35  ;;  %vm423_vm11 = vcmp.gt.f32.partialorder %v391_v36, 0.0  ;;  %v372_v45 = vadd.f32 %v1301_v11, %v336_v32 }
  0x26   : > { %vm418_vm12 = vcmp.gt.f32.partialorder %v386_v29, 0.0  ;;  %v455_v46 = vmul.f32 0.2, %v391_v36  ;;  %v1133_v50 = vunpack.c.l.bf16 %v1176_v40  ;;  %v1134_v51 = vunpack.c.h.bf16 %v1176_v40  ;;  %v521_v40 = vld [vmem:[%s1826_s4 + $0xd0] sm:$0xff] }
  0x27   : > { %vm424_vm13 = vcmp.gt.f32.partialorder %v392_v43, 0.0  ;;  %v456_v48 = vmul.f32 0.2, %v392_v43  ;;  %v474_v52 = vsel %vm410_vm9, %v378_v25, %v442_v37  ;;  %v537_v54 = vmul.f32 %v505_v41, %v473_v38  ;;  %v1177_v41 = vld [vmem:[%s1285_s30 + $0x38] sm:$0xff]  }
  0x28   : > { %646 = vmatpush.bf16.msra.mxu0 %v1099_v9  ;;  %1207 = vmatpush.bf16.msra.mxu1 %v1099_v9  ;;  %v481_v55 = vsel %vm417_vm10, %v385_v27, %v449_v39  ;;  %v487_v57 = vsel %vm423_vm11, %v391_v36, %v455_v46  ;;  %v435_v58 = vmul.f32 0.2, %v371_v34  ;;  %v482_v59 = vsel %vm418_vm12, %v386_v29, %v450_v42 }
  0x29   : > { %1208 = vmatpush.bf16.msra.mxu2 %v1099_v9  ;;  %1209 = vmatpush.bf16.msra.mxu3 %v1099_v9  ;;  %v488_v61 = vsel %vm424_vm13, %v392_v43, %v456_v48  ;;  %v551_v62 = vmul.f32 %v519_v47, %v487_v57  ;;  %vm403_vm14 = vcmp.gt.f32.partialorder %v371_v34, 0.0  ;;  %vm404_vm15 = vcmp.gt.f32.partialorder %v372_v45, 0.0 }
  0x2a   : > { %v436_v0 = vmul.f32 0.2, %v372_v45  ;;  %v552_v1 = vmul.f32 %v520_v49, %v488_v61  ;;  %v538_v3 = vmul.f32 %v506_v53, %v474_v52  ;;  %v545_v4 = vmul.f32 %v513_v56, %v481_v55  ;;  %v515_v61 = vld [vmem:[%s1826_s4 + $0xa0] sm:$0xff] }
  0x2b   : > { %647 = vmatmul.bf16.vlgmr.msra.gmra.mxu0 %v559_v16  ;;  %667 = vmatmul.bf16.vlgmr.msra.gmra.mxu1 %v563_v17  ;;  %v343_v5 = vmul.f32 %v1290_v2, %v1133_v50  ;;  %v344_v6 = vmul.f32 %v1290_v2, %v1134_v51  ;;  %v546_v8 = vmul.f32 %v514_v60, %v482_v59  ;;  %v1149_v10 = vunpack.c.l.bf16 %v1180_v63  ;;  %v1173_v16 = vld [vmem:[%s1285_s30 + $0x18] sm:$0xff]   ;;  %v507_v50 = vld [vmem:[%s1826_s4 + $0x60] sm:$0xff]  ;;  %v508_v51 = vld [vmem:[%s1826_s4 + $0x68] sm:$0xff] }
  0x2c   : > { %687 = vmatmul.bf16.vlgmr.msra.gmra.mxu2 %v567_v22  ;;  %v571_v9 = vpack.c.bf16 %v552_v1, %v551_v62  ;;  %v1150_v12 = vunpack.c.h.bf16 %v1180_v63  ;;  %v560_v13 = vpack.c.bf16 %v530_v44, %v1377_v31  ;;  %v467_v14 = vsel %vm403_vm14, %v371_v34, %v435_v58  ;;  %v500_v22 = vld [vmem:[%s1826_s4 + $0x28] sm:$0xff]  ;;  %v522_v44 = vld [vmem:[%s1826_s4 + $0xd8] sm:$0xff] }
  0x2d   : > { %v468_v15 = vsel %vm404_vm15, %v372_v45, %v436_v0  ;;  %v351_v17 = vmul.f32 %v1290_v2, %v1149_v10  ;;  %v1161_v19 = vunpack.c.l.bf16 %v1183_v7  ;;  %v564_v20 = vpack.c.bf16 %v538_v3, %v537_v54  ;;  %v1181_v45 = vld [vmem:[%s1285_s30 + $0x58] sm:$0xff]   ;;  %v1184_v54 = vld [vmem:[%s1285_s30 + $0x70] sm:$0xff]   ;;  %v516_v62 = vld [vmem:[%s1826_s4 + $0xa8] sm:$0xff] }
  0x2e   : > { %707 = vmatmul.bf16.vlgmr.msra.gmra.mxu3 %v571_v9  ;;  %v352_v18 = vmul.f32 %v1290_v2, %v1150_v12  ;;  %v379_v23 = vadd.f32 %v1301_v11, %v343_v5  ;;  %v380_v24 = vadd.f32 %v1301_v11, %v344_v6  ;;  %v1162_v25 = vunpack.c.h.bf16 %v1183_v7 }
  0x2f   : > { %v568_v26 = vpack.c.bf16 %v546_v8, %v545_v4  ;;  %v387_v27 = vadd.f32 %v1301_v11, %v351_v17  ;;  %v357_v28 = vmul.f32 %v1290_v2, %v1161_v19  ;;  %v1121_v29 = vunpack.c.l.bf16 %v1173_v16 }
  0x30   : > { %v388_v30 = vadd.f32 %v1301_v11, %v352_v18  ;;  %v358_v31 = vmul.f32 %v1290_v2, %v1162_v25  ;;  %v1430_v32 = vmul.f32 %v499_v21, %v467_v14  ;;  %v1432_v33 = vmul.f32 %v500_v22, %v468_v15 }
  0x31   : > { %v443_v34 = vmul.f32 0.2, %v379_v23  ;;  %v444_v35 = vmul.f32 0.2, %v380_v24  ;;  %v393_v36 = vadd.f32 %v1301_v11, %v357_v28  ;;  %vm411_vm0 = vcmp.gt.f32.partialorder %v379_v23, 0.0  ;;  %v1185_v28 = vld [vmem:[%s1285_s30 + $0x78] sm:$0xff]   ;;  %s262_s30 = scalar_lea.vmem %s1828_s6, %s1062_s27 }
  0x32   : > { %v394_v37 = vadd.f32 %v1301_v11, %v358_v31  ;;  %vm412_vm1 = vcmp.gt.f32.partialorder %v380_v24, 0.0  ;;  %v1122_v38 = vunpack.c.h.bf16 %v1173_v16  ;;  %v451_v39 = vmul.f32 0.2, %v387_v27 }
  0x33   : > { %v337_v42 = vmul.f32 %v1290_v2, %v1121_v29  ;;  %v452_v43 = vmul.f32 0.2, %v388_v30  ;;  %vm425_vm2 = vcmp.gt.f32.partialorder %v393_v36, 0.0  ;;  %vm419_vm4 = vcmp.gt.f32.partialorder %v387_v27, 0.0 }
  0x34   : > { %vm426_vm3 = vcmp.gt.f32.partialorder %v394_v37, 0.0  ;;  %vm420_vm5 = vcmp.gt.f32.partialorder %v388_v30, 0.0  ;;  %v457_v46 = vmul.f32 0.2, %v393_v36  ;;  %v458_v47 = vmul.f32 0.2, %v394_v37 }
  0x35   : > { %v475_v48 = vsel %vm411_vm0, %v379_v23, %v443_v34  ;;  %v476_v49 = vsel %vm412_vm1, %v380_v24, %v444_v35  ;;  %v1137_v52 = vunpack.c.l.bf16 %v1177_v41  ;;  %v1138_v53 = vunpack.c.h.bf16 %v1177_v41  ;;  %v523_v35 = vld [vmem:[%s1826_s4 + $0xe0] sm:$0xff] }
  0x36   : > { %v489_v55 = vsel %vm425_vm2, %v393_v36, %v457_v46  ;;  %v490_v56 = vsel %vm426_vm3, %v394_v37, %v458_v47  ;;  %v1153_v57 = vunpack.c.l.bf16 %v1181_v45  ;;  %v1154_v58 = vunpack.c.h.bf16 %v1181_v45  ;;  %v524_v36 = vld [vmem:[%s1826_s4 + $0xe8] sm:$0xff]  ;;  %v501_v47 = vld [vmem:[%s1826_s4 + $0x30] sm:$0xff] }
  0x37   : > { %v483_v59 = vsel %vm419_vm4, %v387_v27, %v451_v39  ;;  %v484_v60 = vsel %vm420_vm5, %v388_v30, %v452_v43  ;;  %v553_v63 = vmul.f32 %v521_v40, %v489_v55  ;;  %v554_v0 = vmul.f32 %v522_v44, %v490_v56 }
  0x38   : > { %v539_v1 = vmul.f32 %v507_v50, %v475_v48  ;;  %v540_v3 = vmul.f32 %v508_v51, %v476_v49  ;;  %v338_v4 = vmul.f32 %v1290_v2, %v1122_v38  ;;  %v1165_v5 = vunpack.c.l.bf16 %v1184_v54  ;;  %v502_v48 = vld [vmem:[%s1826_s4 + $0x38] sm:$0xff] }
  0x39   : > { %v572_v6 = vpack.c.bf16 %v554_v0, %v553_v63  ;;  %v345_v7 = vmul.f32 %v1290_v2, %v1137_v52  ;;  %v346_v8 = vmul.f32 %v1290_v2, %v1138_v53  ;;  %v1166_v9 = vunpack.c.h.bf16 %v1184_v54  ;;  %v509_v53 = vld [vmem:[%s1826_s4 + $0x70] sm:$0xff]  ;;  %v510_v54 = vld [vmem:[%s1826_s4 + $0x78] sm:$0xff] }
  0x3a   : > { %v547_v10 = vmul.f32 %v515_v61, %v483_v59  ;;  %v548_v12 = vmul.f32 %v516_v62, %v484_v60  ;;  %v354_v14 = vmul.f32 %v1290_v2, %v1154_v58  ;;  %v359_v15 = vmul.f32 %v1290_v2, %v1165_v5 }
  0x3b   : > { %652 = vmatmul.bf16.gmra.mxu0 %v560_v13  ;;  %672 = vmatmul.bf16.gmra.mxu1 %v564_v20  ;;  %v353_v13 = vmul.f32 %v1290_v2, %v1153_v57  ;;  %v360_v16 = vmul.f32 %v1290_v2, %v1166_v9  ;;  %v561_v17 = vpack.c.bf16 %v1432_v33, %v1430_v32  ;;  %v1169_v37 = vunpack.c.l.bf16 %v1185_v28  ;;  %v517_v57 = vld [vmem:[%s1826_s4 + $0xb0] sm:$0xff] }
  0x3c   : > { %692 = vmatmul.bf16.gmra.mxu2 %v568_v26  ;;  %v373_v18 = vadd.f32 %v1301_v11, %v337_v42  ;;  %v374_v19 = vadd.f32 %v1301_v11, %v338_v4  ;;  %v565_v20 = vpack.c.bf16 %v540_v3, %v539_v1  ;;  %v381_v21 = vadd.f32 %v1301_v11, %v345_v7 }
  0x3d   : > { %v395_v22 = vadd.f32 %v1301_v11, %v359_v15  ;;  %v396_v23 = vadd.f32 %v1301_v11, %v360_v16  ;;  %v569_v24 = vpack.c.bf16 %v548_v12, %v547_v10  ;;  %v382_v25 = vadd.f32 %v1301_v11, %v346_v8  ;;  %v525_v12 = vld [vmem:[%s1826_s4 + $0xf0] sm:$0xff] }
  0x3e   : > { %712 = vmatmul.bf16.gmra.mxu3 %v572_v6  ;;  %v389_v26 = vadd.f32 %v1301_v11, %v353_v13  ;;  %v390_v27 = vadd.f32 %v1301_v11, %v354_v14  ;;  %v437_v31 = vmul.f32 0.2, %v373_v18  ;;  %v438_v32 = vmul.f32 0.2, %v374_v19 }
  0x3f   : > { %vm427_vm6 = vcmp.gt.f32.partialorder %v395_v22, 0.0  ;;  %vm428_vm7 = vcmp.gt.f32.partialorder %v396_v23, 0.0  ;;  %v459_v29 = vmul.f32 0.2, %v395_v22  ;;  %v460_v30 = vmul.f32 0.2, %v396_v23 }
  0x40   : > { %v1170_v38 = vunpack.c.h.bf16 %v1185_v28  ;;  %vm405_vm8 = vcmp.gt.f32.partialorder %v373_v18, 0.0  ;;  %vm406_vm9 = vcmp.gt.f32.partialorder %v374_v19, 0.0  ;;  %v445_v39 = vmul.f32 0.2, %v381_v21 }
  0x41   : > { %v491_v33 = vsel %vm427_vm6, %v395_v22, %v459_v29  ;;  %v492_v34 = vsel %vm428_vm7, %v396_v23, %v460_v30  ;;  %v446_v40 = vmul.f32 0.2, %v382_v25  ;;  %vm413_vm10 = vcmp.gt.f32.partialorder %v381_v21, 0.0 }
  0x42   : > { %vm414_vm11 = vcmp.gt.f32.partialorder %v382_v25, 0.0  ;;  %v453_v41 = vmul.f32 0.2, %v389_v26  ;;  %v454_v42 = vmul.f32 0.2, %v390_v27  ;;  %vm421_vm12 = vcmp.gt.f32.partialorder %v389_v26, 0.0 }
  0x43   : > { %vm422_vm13 = vcmp.gt.f32.partialorder %v390_v27, 0.0  ;;  %v555_v43 = vmul.f32 %v523_v35, %v491_v33  ;;  %v556_v44 = vmul.f32 %v524_v36, %v492_v34  ;;  %v469_v45 = vsel %vm405_vm8, %v373_v18, %v437_v31 }
  0x44   : > { %v470_v46 = vsel %vm406_vm9, %v374_v19, %v438_v32  ;;  %v361_v49 = vmul.f32 %v1290_v2, %v1169_v37  ;;  %v362_v50 = vmul.f32 %v1290_v2, %v1170_v38  ;;  %v477_v51 = vsel %vm413_vm10, %v381_v21, %v445_v39  ;;  %v518_v2 = vld [vmem:[%s1826_s4 + $0xb8] sm:$0xff] }
  0x45   : > { %v478_v52 = vsel %vm414_vm11, %v382_v25, %v446_v40  ;;  %v485_v55 = vsel %vm421_vm12, %v389_v26, %v453_v41  ;;  %v486_v56 = vsel %vm422_vm13, %v390_v27, %v454_v42  ;;  %v533_v58 = vmul.f32 %v501_v47, %v469_v45 }
  0x46   : > { %v534_v59 = vmul.f32 %v502_v48, %v470_v46  ;;  %v573_v60 = vpack.c.bf16 %v556_v44, %v555_v43  ;;  %v541_v61 = vmul.f32 %v509_v53, %v477_v51  ;;  %v542_v62 = vmul.f32 %v510_v54, %v478_v52 }
  0x47   : > { %v397_v63 = vadd.f32 %v1301_v11, %v361_v49  ;;  %v398_v0 = vadd.f32 %v1301_v11, %v362_v50  ;;  %v549_v1 = vmul.f32 %v517_v57, %v485_v55  ;;  %v550_v3 = vmul.f32 %v518_v2, %v486_v56  ;;  %v526_v11 = vld [vmem:[%s1826_s4 + $0xf8] sm:$0xff] }
  0x48   : > { %v562_v4 = vpack.c.bf16 %v534_v59, %v533_v58  ;;  %v566_v5 = vpack.c.bf16 %v542_v62, %v541_v61  ;;  %vm760_vm0 = vcmask 125952   ;;  %vm793_vm1 = vcmask 130048  }
  0x49   : > { %v461_v6 = vmul.f32 0.2, %v397_v63  ;;  %v462_v7 = vmul.f32 0.2, %v398_v0  ;;  %v570_v8 = vpack.c.bf16 %v550_v3, %v549_v1  ;;  %vm429_vm14 = vcmp.gt.f32.partialorder %v397_v63, 0.0 }
  0x4a   : > { %vm430_vm15 = vcmp.gt.f32.partialorder %v398_v0, 0.0  ;;  %vm964_vm2 = vcmask 122880  }
  0x4b   : > { %657 = vmatmul.bf16.gmra.mxu0 %v561_v17  ;;  %677 = vmatmul.bf16.gmra.mxu1 %v565_v20  ;;  %v493_v9 = vsel %vm429_vm14, %v397_v63, %v461_v6  ;;  %v494_v10 = vsel %vm430_vm15, %v398_v0, %v462_v7 }
  0x4c   : > { %697 = vmatmul.bf16.gmra.mxu2 %v569_v24  ;;  %v557_v13 = vmul.f32 %v525_v12, %v493_v9  ;;  %v558_v14 = vmul.f32 %v526_v11, %v494_v10 }
  0x4e   : > { %717 = vmatmul.bf16.gmra.mxu3 %v573_v60  ;;  %v574_v15 = vpack.c.bf16 %v558_v14, %v557_v13 }
  0x5b   : > { %662 = vmatmul.bf16.gmra.mxu0 %v562_v4  ;;  %682 = vmatmul.bf16.gmra.mxu1 %v566_v5 }
  0x5c   : > { %702 = vmatmul.bf16.gmra.mxu2 %v570_v8 }
  0x5e   : > { %722 = vmatmul.bf16.gmra.mxu3 %v574_v15 }
  0xa8   : > { %v1519_v16 = vpop.f32.mrf.mxu0  ;;  %v1521_v17 = vpop.f32.mrf.mxu1 }
  0xa9   : > { %v728_v18 = vpack.c.bf16 %v1519_v16, %v1519_v16  ;;  %v736_v19 = vpack.c.bf16 %v1521_v17, %v1521_v17  ;;  %v863_v2 = vmul.f32 %v1519_v16, %v1519_v16  ;;  %v794_v62 = vsel %vm793_vm1, %v1519_v16, 0.0 }
  0xab   : > { %761 = vst.msk [vmem:[%s1517_s8] sm:$0xf] %vm760_vm0, %v728_v18  ;;  %v895_v3 = vsel %vm793_vm1, %v863_v2, 0.0 }
  0xac   : > { %769 = vst.msk [vmem:[%s1517_s8 + $0x20] sm:$0xf] %vm760_vm0, %v736_v19 }
  0xaf   : > { %v1531_v20 = vpop.f32.mrf.mxu2 }
  0xb0   : > { %v650_v21 = vpop.f32.mrf.mxu0  ;;  %v1533_v22 = vpop.f32.mrf.mxu1  ;;  %v744_v23 = vpack.c.bf16 %v1531_v20, %v1531_v20 }
  0xb1   : > { %v729_v24 = vpack.c.bf16 %v650_v21, %v650_v21  ;;  %v737_v25 = vpack.c.bf16 %v1533_v22, %v1533_v22  ;;  %v1553_v32 = vpop.f32.mrf.mxu3  ;;  %v864_v54 = vmul.f32 %v650_v21, %v650_v21  ;;  %v795_v58 = vsel %vm793_vm1, %v650_v21, 0.0 }
  0xb2   : > { %777 = vst.msk [vmem:[%s1517_s8 + $0x40] sm:$0xf] %vm760_vm0, %v744_v23  ;;  %v752_v33 = vpack.c.bf16 %v1553_v32, %v1553_v32  ;;  %v796_v1 = vadd.f32 %v795_v58, %v794_v62 }
  0xb3   : > { %762 = vst.msk [vmem:[%s1517_s8 + $0x4] sm:$0xf] %vm760_vm0, %v729_v24  ;;  %v896_v63 = vsel %vm793_vm1, %v864_v54, 0.0 }
  0xb4   : > { %770 = vst.msk [vmem:[%s1517_s8 + $0x24] sm:$0xf] %vm760_vm0, %v737_v25  ;;  %v897_v8 = vadd.f32 %v896_v63, %v895_v3 }
  0xb5   : > { %785 = vst.msk [vmem:[%s1517_s8 + $0x60] sm:$0xf] %vm760_vm0, %v752_v33 }
  0xb7   : > { %v1545_v26 = vpop.f32.mrf.mxu2 }
  0xb8   : > { %v653_v27 = vpop.f32.mrf.mxu0  ;;  %v1547_v28 = vpop.f32.mrf.mxu1  ;;  %v745_v29 = vpack.c.bf16 %v1545_v26, %v1545_v26 }
  0xb9   : > { %v730_v30 = vpack.c.bf16 %v653_v27, %v653_v27  ;;  %v738_v31 = vpack.c.bf16 %v1547_v28, %v1547_v28  ;;  %v1573_v40 = vpop.f32.mrf.mxu3  ;;  %v865_v59 = vmul.f32 %v653_v27, %v653_v27  ;;  %v797_v0 = vsel %vm793_vm1, %v653_v27, 0.0 }
  0xba   : > { %778 = vst.msk [vmem:[%s1517_s8 + $0x44] sm:$0xf] %vm760_vm0, %v745_v29  ;;  %v753_v41 = vpack.c.bf16 %v1573_v40, %v1573_v40  ;;  %v798_v9 = vadd.f32 %v797_v0, %v796_v1 }
  0xbb   : > { %763 = vst.msk [vmem:[%s1517_s8 + $0x8] sm:$0xf] %vm760_vm0, %v730_v30  ;;  %v898_v4 = vsel %vm793_vm1, %v865_v59, 0.0 }
  0xbc   : > { %771 = vst.msk [vmem:[%s1517_s8 + $0x28] sm:$0xf] %vm760_vm0, %v738_v31  ;;  %v899_v21 = vadd.f32 %v898_v4, %v897_v8  ;;  %v811_v4 = vsel %vm793_vm1, %v1533_v22, 0.0 }
  0xbd   : > { %786 = vst.msk [vmem:[%s1517_s8 + $0x64] sm:$0xf] %vm760_vm0, %v753_v41 }
  0xbf   : > { %v1565_v34 = vpop.f32.mrf.mxu2 }
  0xc0   : > { %v655_v35 = vpop.f32.mrf.mxu0  ;;  %v1567_v36 = vpop.f32.mrf.mxu1  ;;  %v746_v37 = vpack.c.bf16 %v1565_v34, %v1565_v34 }
  0xc1   : > { %v731_v38 = vpack.c.bf16 %v655_v35, %v655_v35  ;;  %v739_v39 = vpack.c.bf16 %v1567_v36, %v1567_v36  ;;  %v1593_v48 = vpop.f32.mrf.mxu3  ;;  %v866_v61 = vmul.f32 %v655_v35, %v655_v35  ;;  %v799_v5 = vsel %vm793_vm1, %v655_v35, 0.0 }
  0xc2   : > { %779 = vst.msk [vmem:[%s1517_s8 + $0x48] sm:$0xf] %vm760_vm0, %v746_v37  ;;  %v754_v49 = vpack.c.bf16 %v1593_v48, %v1593_v48  ;;  %v800_v23 = vadd.f32 %v799_v5, %v798_v9  ;;  %v813_v9 = vsel %vm793_vm1, %v1547_v28, 0.0 }
  0xc3   : > { %764 = vst.msk [vmem:[%s1517_s8 + $0xc] sm:$0xf] %vm760_vm0, %v731_v38  ;;  %v900_v10 = vsel %vm793_vm1, %v866_v61, 0.0  ;;  %v872_v61 = vmul.f32 %v1533_v22, %v1533_v22 }
  0xc4   : > { %772 = vst.msk [vmem:[%s1517_s8 + $0x2c] sm:$0xf] %vm760_vm0, %v739_v39  ;;  %v901_v30 = vadd.f32 %v900_v10, %v899_v21  ;;  %v874_v10 = vmul.f32 %v1567_v36, %v1567_v36 }
  0xc5   : > { %787 = vst.msk [vmem:[%s1517_s8 + $0x68] sm:$0xf] %vm760_vm0, %v754_v49  ;;  %v912_v8 = vsel %vm793_vm1, %v872_v61, 0.0 }
  0xc7   : > { %v1585_v42 = vpop.f32.mrf.mxu2 }
  0xc8   : > { %v658_v43 = vpop.f32.mrf.mxu0  ;;  %v1587_v44 = vpop.f32.mrf.mxu1  ;;  %v747_v45 = vpack.c.bf16 %v1585_v42, %v1585_v42 }
  0xc9   : > { %v732_v46 = vpack.c.bf16 %v658_v43, %v658_v43  ;;  %v740_v47 = vpack.c.bf16 %v1587_v44, %v1587_v44  ;;  %v1613_v57 = vpop.f32.mrf.mxu3  ;;  %v867_v6 = vmul.f32 %v658_v43, %v658_v43  ;;  %v801_v14 = vsel %vm793_vm1, %v658_v43, 0.0 }
  0xca   : > { %780 = vst.msk [vmem:[%s1517_s8 + $0x4c] sm:$0xf] %vm760_vm0, %v747_v45  ;;  %v755_v60 = vpack.c.bf16 %v1613_v57, %v1613_v57  ;;  %v802_v31 = vadd.f32 %v801_v14, %v800_v23  ;;  %v871_v43 = vmul.f32 %v1521_v17, %v1521_v17 }
  0xcb   : > { %765 = vst.msk [vmem:[%s1517_s8 + $0x10] sm:$0xf] %vm760_vm0, %v732_v46  ;;  %v902_v24 = vsel %vm793_vm1, %v867_v6, 0.0 }
  0xcc   : > { %773 = vst.msk [vmem:[%s1517_s8 + $0x30] sm:$0xf] %vm760_vm0, %v740_v47  ;;  %v903_v37 = vadd.f32 %v902_v24, %v901_v30  ;;  %v910_v3 = vsel %vm793_vm1, %v871_v43, 0.0 }
  0xcd   : > { %788 = vst.msk [vmem:[%s1517_s8 + $0x6c] sm:$0xf] %vm760_vm0, %v755_v60  ;;  %v809_v60 = vsel %vm793_vm1, %v1521_v17, 0.0  ;;  %v873_v17 = vmul.f32 %v1547_v28, %v1547_v28 }
  0xcf   : > { %v1605_v50 = vpop.f32.mrf.mxu2 }
  0xd0   : > { %v660_v51 = vpop.f32.mrf.mxu0  ;;  %v1607_v52 = vpop.f32.mrf.mxu1  ;;  %v748_v53 = vpack.c.bf16 %v1605_v50, %v1605_v50 }
  0xd1   : > { %v733_v55 = vpack.c.bf16 %v660_v51, %v660_v51  ;;  %v741_v56 = vpack.c.bf16 %v1607_v52, %v1607_v52  ;;  %v868_v15 = vmul.f32 %v660_v51, %v660_v51  ;;  %v1645_v19 = vpop.f32.mrf.mxu3  ;;  %v803_v25 = vsel %vm793_vm1, %v660_v51, 0.0 }
  0xd2   : > { %781 = vst.msk [vmem:[%s1517_s8 + $0x50] sm:$0xf] %vm760_vm0, %v748_v53  ;;  %v756_v29 = vpack.c.bf16 %v1645_v19, %v1645_v19  ;;  %v804_v38 = vadd.f32 %v803_v25, %v802_v31  ;;  %v916_v25 = vsel %vm793_vm1, %v874_v10, 0.0 }
  0xd3   : > { %766 = vst.msk [vmem:[%s1517_s8 + $0x14] sm:$0xf] %vm760_vm0, %v733_v55  ;;  %v904_v33 = vsel %vm793_vm1, %v868_v15, 0.0  ;;  %v914_v15 = vsel %vm793_vm1, %v873_v17, 0.0 }
  0xd4   : > { %774 = vst.msk [vmem:[%s1517_s8 + $0x34] sm:$0xf] %vm760_vm0, %v741_v56  ;;  %v905_v45 = vadd.f32 %v904_v33, %v903_v37  ;;  %v819_v33 = vsel %vm793_vm1, %v1607_v52, 0.0 }
  0xd5   : > { %789 = vst.msk [vmem:[%s1517_s8 + $0x70] sm:$0xf] %vm760_vm0, %v756_v29 }
  0xd7   : > { %v1635_v7 = vpop.f32.mrf.mxu2 }
  0xd8   : > { %v663_v12 = vpop.f32.mrf.mxu0  ;;  %v1638_v11 = vpop.f32.mrf.mxu1  ;;  %v749_v13 = vpack.c.bf16 %v1635_v7, %v1635_v7 }
  0xd9   : > { %v734_v16 = vpack.c.bf16 %v663_v12, %v663_v12  ;;  %v742_v18 = vpack.c.bf16 %v1638_v11, %v1638_v11  ;;  %v869_v27 = vmul.f32 %v663_v12, %v663_v12  ;;  %v805_v35 = vsel %vm793_vm1, %v663_v12, 0.0  ;;  %v1669_v2 = vpop.f32.mrf.mxu3 }
  0xda   : > { %782 = vst.msk [vmem:[%s1517_s8 + $0x54] sm:$0xf] %vm760_vm0, %v749_v13  ;;  %v806_v46 = vadd.f32 %v805_v35, %v804_v38  ;;  %v757_v63 = vpack.c.bf16 %v1669_v2, %v1669_v2  ;;  %v877_v35 = vmul.f32 %v1638_v11, %v1638_v11 }
  0xdb   : > { %767 = vst.msk [vmem:[%s1517_s8 + $0x18] sm:$0xf] %vm760_vm0, %v734_v16  ;;  %v906_v39 = vsel %vm793_vm1, %v869_v27, 0.0  ;;  %v815_v16 = vsel %vm793_vm1, %v1567_v36, 0.0  ;;  %v817_v27 = vsel %vm793_vm1, %v1587_v44, 0.0  ;;  %v876_v36 = vmul.f32 %v1607_v52, %v1607_v52 }
  0xdc   : > { %775 = vst.msk [vmem:[%s1517_s8 + $0x38] sm:$0xf] %vm760_vm0, %v742_v18  ;;  %v907_v58 = vadd.f32 %v906_v39, %v905_v45  ;;  %v875_v18 = vmul.f32 %v1587_v44, %v1587_v44  ;;  %v821_v44 = vsel %vm793_vm1, %v1638_v11, 0.0  ;;  %v825_v11 = vsel %vm793_vm1, %v1531_v20, 0.0 }
  0xdd   : > { %790 = vst.msk [vmem:[%s1517_s8 + $0x74] sm:$0xf] %vm760_vm0, %v757_v63  ;;  %v920_v39 = vsel %vm793_vm1, %v876_v36, 0.0  ;;  %v881_v63 = vmul.f32 %v1565_v34, %v1565_v34 }
  0xde   : > { %v918_v31 = vsel %vm793_vm1, %v875_v18, 0.0 }
  0xdf   : > { %v1662_v41 = vpop.f32.mrf.mxu2 }
  0xe0   : > { %v665_v47 = vpop.f32.mrf.mxu0  ;;  %v685_v49 = vpop.f32.mrf.mxu1  ;;  %v750_v51 = vpack.c.bf16 %v1662_v41, %v1662_v41  ;;  %v885_v18 = vmul.f32 %v1662_v41, %v1662_v41 }
  0xe1   : > { %v735_v53 = vpack.c.bf16 %v665_v47, %v665_v47  ;;  %v807_v54 = vsel %vm793_vm1, %v665_v47, 0.0  ;;  %v870_v55 = vmul.f32 %v665_v47, %v665_v47  ;;  %v743_v56 = vpack.c.bf16 %v685_v49, %v685_v49  ;;  %v1705_v28 = vpop.f32.mrf.mxu3 }
  0xe2   : > { %v808_v59 = vadd.f32 %v807_v54, %v806_v46  ;;  %783 = vst.msk [vmem:[%s1517_s8 + $0x58] sm:$0xf] %vm760_vm0, %v750_v51  ;;  %v758_v24 = vpack.c.bf16 %v1705_v28, %v1705_v28  ;;  %v878_v43 = vmul.f32 %v685_v49, %v685_v49  ;;  %v879_v47 = vmul.f32 %v1531_v20, %v1531_v20 }
  0xe3   : > { %768 = vst.msk [vmem:[%s1517_s8 + $0x1c] sm:$0xf] %vm760_vm0, %v735_v53  ;;  %v908_v62 = vsel %vm793_vm1, %v870_v55, 0.0  ;;  %v922_v51 = vsel %vm793_vm1, %v877_v35, 0.0  ;;  %v823_v52 = vsel %vm793_vm1, %v685_v49, 0.0  ;;  %v841_v35 = vsel %vm793_vm1, %v1553_v32, 0.0 }
  0xe4   : > { %v810_v0 = vadd.f32 %v809_v60, %v808_v59  ;;  %v909_v1 = vadd.f32 %v908_v62, %v907_v58  ;;  %776 = vst.msk [vmem:[%s1517_s8 + $0x3c] sm:$0xf] %vm760_vm0, %v743_v56  ;;  %v880_v58 = vmul.f32 %v1545_v26, %v1545_v26  ;;  %v924_v59 = vsel %vm793_vm1, %v878_v43, 0.0 }
  0xe5   : > { %791 = vst.msk [vmem:[%s1517_s8 + $0x78] sm:$0xf] %vm760_vm0, %v758_v24  ;;  %v926_v49 = vsel %vm793_vm1, %v879_v47, 0.0  ;;  %v827_v62 = vsel %vm793_vm1, %v1545_v26, 0.0  ;;  %v831_v26 = vsel %vm793_vm1, %v1585_v42, 0.0  ;;  %v843_v43 = vsel %vm793_vm1, %v1573_v40, 0.0 }
  0xe6   : > { %v812_v5 = vadd.f32 %v811_v4, %v810_v0  ;;  %v911_v6 = vadd.f32 %v910_v3, %v909_v1  ;;  %v928_v20 = vsel %vm793_vm1, %v880_v58, 0.0  ;;  %v829_v3 = vsel %vm793_vm1, %v1565_v34, 0.0 }
  0xe7   : > { %v1696_v12 = vpop.f32.mrf.mxu2  ;;  %v882_v4 = vmul.f32 %v1585_v42, %v1585_v42  ;;  %v833_v34 = vsel %vm793_vm1, %v1605_v50, 0.0  ;;  %v835_v42 = vsel %vm793_vm1, %v1635_v7, 0.0 }
  0xe8   : > { %v814_v13 = vadd.f32 %v813_v9, %v812_v5  ;;  %v913_v22 = vadd.f32 %v912_v8, %v911_v6  ;;  %v751_v14 = vpack.c.bf16 %v1696_v12, %v1696_v12  ;;  %v930_v6 = vsel %vm793_vm1, %v881_v63, 0.0 }
  0xe9   : > { %v1730_v53 = vpop.f32.mrf.mxu3  ;;  %v883_v8 = vmul.f32 %v1605_v50, %v1605_v50  ;;  %v837_v50 = vsel %vm793_vm1, %v1662_v41, 0.0  ;;  %v888_v41 = vmul.f32 %v1573_v40, %v1573_v40  ;;  %v847_v40 = vsel %vm793_vm1, %v1613_v57, 0.0 }
  0xea   : > { %v915_v21 = vadd.f32 %v914_v15, %v913_v22  ;;  %v816_v23 = vadd.f32 %v815_v16, %v814_v13  ;;  %784 = vst.msk [vmem:[%s1517_s8 + $0x5c] sm:$0xf] %vm760_vm0, %v751_v14  ;;  %v759_v56 = vpack.c.bf16 %v1730_v53, %v1730_v53  ;;  %v932_v13 = vsel %vm793_vm1, %v882_v4, 0.0 }
  0xeb   : > { %v884_v22 = vmul.f32 %v1635_v7, %v1635_v7  ;;  %v934_v16 = vsel %vm793_vm1, %v883_v8, 0.0  ;;  %v938_v7 = vsel %vm793_vm1, %v885_v18, 0.0  ;;  %v944_v47 = vsel %vm793_vm1, %v888_v41, 0.0 }
  0xec   : > { %v818_v29 = vadd.f32 %v817_v27, %v816_v23  ;;  %v917_v30 = vadd.f32 %v916_v25, %v915_v21  ;;  %792 = vst.msk [vmem:[%s1517_s8 + $0x7c] sm:$0xf] %vm760_vm0, %v759_v56  ;;  %v886_v25 = vmul.f32 %v1696_v12, %v1696_v12  ;;  %v891_v56 = vmul.f32 %v1645_v19, %v1645_v19 }
  0xed   : > { %v936_v24 = vsel %vm793_vm1, %v884_v22, 0.0  ;;  %v893_v63 = vmul.f32 %v1705_v28, %v1705_v28 }
  0xee   : > { %v820_v37 = vadd.f32 %v819_v33, %v818_v29  ;;  %v919_v38 = vadd.f32 %v918_v31, %v917_v30  ;;  %v887_v29 = vmul.f32 %v1553_v32, %v1553_v32  ;;  %v839_v30 = vsel %vm793_vm1, %v1696_v12, 0.0 }
  0xef   : > { %v889_v12 = vmul.f32 %v1593_v48, %v1593_v48  ;;  %v845_v32 = vsel %vm793_vm1, %v1593_v48, 0.0  ;;  %v849_v48 = vsel %vm793_vm1, %v1645_v19, 0.0  ;;  %v853_v19 = vsel %vm793_vm1, %v1705_v28, 0.0 }
  0xf0   : > { %v822_v45 = vadd.f32 %v821_v44, %v820_v37  ;;  %v921_v46 = vadd.f32 %v920_v39, %v919_v38  ;;  %v940_v37 = vsel %vm793_vm1, %v886_v25, 0.0  ;;  %v942_v44 = vsel %vm793_vm1, %v887_v29, 0.0 }
  0xf2   : > { %v923_v54 = vadd.f32 %v922_v51, %v921_v46  ;;  %v824_v55 = vadd.f32 %v823_v52, %v822_v45  ;;  %v890_v51 = vmul.f32 %v1613_v57, %v1613_v57  ;;  %v851_v57 = vsel %vm793_vm1, %v1669_v2, 0.0 }
  0xf4   : > { %v826_v60 = vadd.f32 %v825_v11, %v824_v55  ;;  %v925_v61 = vadd.f32 %v924_v59, %v923_v54  ;;  %v946_v55 = vsel %vm793_vm1, %v889_v12, 0.0  ;;  %v948_v59 = vsel %vm793_vm1, %v890_v51, 0.0 }
  0xf6   : > { %v828_v0 = vadd.f32 %v827_v62, %v826_v60  ;;  %v927_v1 = vadd.f32 %v926_v49, %v925_v61  ;;  %v892_v60 = vmul.f32 %v1669_v2, %v1669_v2  ;;  %v950_v62 = vsel %vm793_vm1, %v891_v56, 0.0 }
  0xf7   : > { %v855_v2 = vsel %vm793_vm1, %v1730_v53, 0.0 }
  0xf8   : > { %v830_v17 = vadd.f32 %v829_v3, %v828_v0  ;;  %v929_v5 = vadd.f32 %v928_v20, %v927_v1  ;;  %v952_v20 = vsel %vm793_vm1, %v892_v60, 0.0  ;;  %v894_v3 = vmul.f32 %v1730_v53, %v1730_v53 }
  0xfa   : > { %v931_v9 = vadd.f32 %v930_v6, %v929_v5  ;;  %v832_v10 = vadd.f32 %v831_v26, %v830_v17  ;;  %v954_v5 = vsel %vm793_vm1, %v893_v63, 0.0  ;;  %v956_v8 = vsel %vm793_vm1, %v894_v3, 0.0 }
  0xfc   : > { %v834_v14 = vadd.f32 %v833_v34, %v832_v10  ;;  %v933_v15 = vadd.f32 %v932_v13, %v931_v9 }
  0xfe   : > { %v836_v21 = vadd.f32 %v835_v42, %v834_v14  ;;  %v935_v23 = vadd.f32 %v934_v16, %v933_v15 }
 0x100   : > { %v937_v27 = vadd.f32 %v936_v24, %v935_v23  ;;  %v838_v36 = vadd.f32 %v837_v50, %v836_v21 }
 0x102   : > { %v939_v31 = vadd.f32 %v938_v7, %v937_v27  ;;  %v840_v33 = vadd.f32 %v839_v30, %v838_v36 }
 0x104   : > { %v842_v38 = vadd.f32 %v841_v35, %v840_v33  ;;  %v941_v39 = vadd.f32 %v940_v37, %v939_v31 }
 0x106   : > { %v844_v45 = vadd.f32 %v843_v43, %v842_v38  ;;  %v943_v46 = vadd.f32 %v942_v44, %v941_v39 }
 0x108   : > { %v846_v52 = vadd.f32 %v845_v32, %v844_v45  ;;  %v945_v54 = vadd.f32 %v944_v47, %v943_v46 }
 0x10a   : > { %v947_v11 = vadd.f32 %v946_v55, %v945_v54  ;;  %v848_v58 = vadd.f32 %v847_v40, %v846_v52 }
 0x10c   : > { %v850_v61 = vadd.f32 %v849_v48, %v848_v58  ;;  %v949_v49 = vadd.f32 %v948_v59, %v947_v11 }
 0x10e   : > { %v852_v0 = vadd.f32 %v851_v57, %v850_v61  ;;  %v951_v1 = vadd.f32 %v950_v62, %v949_v49 }
 0x110   : > { %v953_v4 = vadd.f32 %v952_v20, %v951_v1  ;;  %v854_v17 = vadd.f32 %v853_v19, %v852_v0 }
 0x112   : > { %v955_v6 = vadd.f32 %v954_v5, %v953_v4  ;;  %v856_v26 = vadd.f32 %v855_v2, %v854_v17 }
 0x114   : > { %v857_v9 = vrot.slane %v856_v26, 4  ;;  %v957_v10 = vadd.f32 %v956_v8, %v955_v6 }
 0x116   : > { %v858_v13 = vadd.f32 %v857_v9, %v856_v26  ;;  %v958_v34 = vrot.slane %v957_v10, 4 }
 0x118   : > { %v859_v22 = vrot.slane %v858_v13, 2  ;;  %v959_v28 = vadd.f32 %v958_v34, %v957_v10 }
 0x11a   : > { %v860_v14 = vadd.f32 %v859_v22, %v858_v13  ;;  %v960_v15 = vrot.slane %v959_v28, 2 }
 0x11c   : > { %v861_v16 = vrot.slane %v860_v14, 1  ;;  %v961_v42 = vadd.f32 %v960_v15, %v959_v28 }
 0x11e   : > { %v862_v53 = vadd.f32 %v861_v16, %v860_v14  ;;  %v962_v18 = vrot.slane %v961_v42, 1 }
 0x120   : > { %v963_v21 = vadd.f32 %v962_v18, %v961_v42  ;;  %965 = vst.msk [vmem:[%s262_s30] sm:$0x1] %vm964_vm2, %v862_v53 }
 0x122   : > { %966 = vst.msk [vmem:[%s262_s30 + $0x1] sm:$0x1] %vm964_vm2, %v963_v21 }
 0x123 PF: > { %s17_s21 = sadd.s32 1, %s1226_s21  }
 0x124   : > { %p14_p4 = scmp.ge.s32.totalorder %s17_s21, 4  }
 0x126   :  { %16 = sbr.rel (!%p14_p4) target bundleno = 1 (0x1), region = 82 }

// kernel: discriminator64x64_forward.7
= control target key start
LH: loop header
LB: loop body
LE: loop exit
PB: predicated region body
PF: predicated region fallthrough
CT: control target
= control target key end

     0   :  { %s923_s21 = smov 0   ;;  %s1162_s0 = inlined_call_operand.vmem [shape: bf16[2,64,256], index: 0, kind: input, shape index: {}]   ;;  %s1163_s1 = inlined_call_operand.vmem [shape: bf16[256,32], index: 1, kind: input, shape index: {}]   ;;  %s1164_s2 = inlined_call_operand.vmem [shape: f32[1,256], index: 2, kind: input, shape index: {}]   ;;  %s1165_s3 = inlined_call_operand.vmem [shape: f32[1,256], index: 3, kind: input, shape index: {}]   ;;  %s1166_s4 = inlined_call_operand.vmem [shape: f32[64,256], index: 4, kind: input, shape index: {}]   ;;  %s1167_s5 = inlined_call_operand.vmem [shape: bf16[2,64,32], index: 5, kind: output, shape index: {0}]   ;;  %s1168_s6 = inlined_call_operand.vmem [shape: f32[2,2,32], index: 6, kind: output, shape index: {1}]  }
   0x1 LB: > { %s762_s22 = sadd.s32 4294967295, %s886_s21   ;;  %p766_p0 = scmp.ge.s32.totalorder %s886_s21, 1  ;;  %s886_s21 = sphi %s923_s21, %s17_s21  }
   0x2   : > { %p215_p1 = scmp.lt.s32.totalorder %s886_s21, 3 }
   0x4   : > { %p216_p2 = pnand %p766_p0, %p215_p1 }
   0x5   : > { %p249_p3 = scmp.lt.s32.totalorder (!%p216_p2), %s762_s22, 1 }
   0x6   : > { %219 = sbr.rel (%p216_p2) target bundleno = 222 (0xde), region = 40 }
   0xb   : > { %v847_v0 = vld [vmem:[%s1163_s1 + $0x38] sm:$0xff]  ;;  %v846_v2 = vld [vmem:[%s1163_s1 + $0x30] sm:$0xff]  ;;  %s1170_s22 = smov (!%p249_p3, %s762_s22), 1  ;;  %v287_v4 = vld [vmem:[%s1164_s2] sm:$0x3] }
   0xc   : > { %v855_v1 = vld [vmem:[%s1163_s1 + $0x78] sm:$0xff]  ;;  %547 = vmatpush.bf16.msra.mxu0 %v847_v0  ;;  %856 = vmatpush.bf16.msra.mxu2 %v847_v0  ;;  %v854_v3 = vld [vmem:[%s1163_s1 + $0x70] sm:$0xff]  ;;  %s838_s7 = sshll.u32 %s1170_s22, 6  ;;  %v309_v5 = vld [vmem:[%s1165_s3] sm:$0x3]  ;;  %v962_v9 = vperm.slane %v287_v4, 0 }
   0xd   : > { %576 = vmatpush.bf16.msra.mxu1 %v855_v1  ;;  %864 = vmatpush.bf16.msra.mxu3 %v855_v1  ;;  %s949_s10 = scalar_lea.vmem %s1162_s0, %s838_s7  ;;  %v845_v6 = vld [vmem:[%s1163_s1 + $0x28] sm:$0xff]  ;;  %v964_v10 = vperm.slane %v309_v5, 0  ;;  %v966_v11 = vperm.slane %v287_v4, 1  ;;  %v973_v21 = vperm.slane %v309_v5, 1  ;;  %v844_v26 = vld [vmem:[%s1163_s1 + $0x20] sm:$0xff]  ;;  %v843_v37 = vld [vmem:[%s1163_s1 + $0x18] sm:$0xff] }
   0xe   : > { %v263_v7 = vld [vmem:[%s949_s10] sm:$0xff]  ;;  %v264_v8 = vld [vmem:[%s949_s10 + $0x8] sm:$0xff]  ;;  %v851_v38 = vld [vmem:[%s1163_s1 + $0x58] sm:$0xff]  ;;  %s839_s29 = sshll.u32 %s1170_s22, 5  ;;  %s771_s9 = sshll.u32 %s1170_s22, 1 }
   0xf   : > { %v853_v12 = vld [vmem:[%s1163_s1 + $0x68] sm:$0xff]  ;;  %v271_v13 = vunpack.c.l.bf16 %v263_v7  ;;  %v273_v14 = vunpack.c.l.bf16 %v264_v8  ;;  %v267_v15 = vld [vmem:[%s949_s10 + $0x20] sm:$0xff]  ;;  %v272_v17 = vunpack.c.h.bf16 %v263_v7  ;;  %v274_v18 = vunpack.c.h.bf16 %v264_v8  ;;  %v1002_v42 = vld [vmem:[%s949_s10 + $0x10] sm:$0xff]  ;;  %s1121_s8 = scalar_lea.vmem %s1167_s5, %s839_s29  ;;  %s262_s13 = scalar_lea.vmem %s1168_s6, %s771_s9 }
  0x10   : > { %548 = vmatpush.bf16.msra.mxu0 %v846_v2  ;;  %857 = vmatpush.bf16.msra.mxu2 %v846_v2  ;;  %v268_v16 = vld [vmem:[%s949_s10 + $0x28] sm:$0xff]  ;;  %v279_v19 = vunpack.c.l.bf16 %v267_v15  ;;  %v280_v25 = vunpack.c.h.bf16 %v267_v15  ;;  %v852_v31 = vld [vmem:[%s1163_s1 + $0x60] sm:$0xff]  ;;  %v1005_v48 = vld [vmem:[%s949_s10 + $0x18] sm:$0xff]  ;;  %v275_v49 = vunpack.c.l.bf16 %v1002_v42 }
  0x11   : > { %577 = vmatpush.bf16.msra.mxu1 %v854_v3  ;;  %865 = vmatpush.bf16.msra.mxu3 %v854_v3  ;;  %v281_v20 = vunpack.c.l.bf16 %v268_v16  ;;  %v293_v22 = vmul.f32 %v962_v9, %v271_v13  ;;  %v295_v23 = vmul.f32 %v962_v9, %v273_v14  ;;  %v294_v24 = vmul.f32 %v966_v11, %v272_v17  ;;  %v842_v50 = vld [vmem:[%s1163_s1 + $0x10] sm:$0xff]  ;;  %v379_v58 = vld [vmem:[%s1166_s4] sm:$0xff]  ;;  %v1026_v60 = vld [vmem:[%s949_s10 + $0x38] sm:$0xff] }
  0x12   : > { %v301_v27 = vmul.f32 %v962_v9, %v279_v19  ;;  %v296_v29 = vmul.f32 %v966_v11, %v274_v18  ;;  %v282_v30 = vunpack.c.h.bf16 %v268_v16  ;;  %v302_v40 = vmul.f32 %v966_v11, %v280_v25  ;;  %v1014_v54 = vld [vmem:[%s949_s10 + $0x30] sm:$0xff]  ;;  %v387_v63 = vld [vmem:[%s1166_s4 + $0x40] sm:$0xff]  ;;  %v380_v3 = vld [vmem:[%s1166_s4 + $0x8] sm:$0xff] }
  0x13   : > { %v303_v28 = vmul.f32 %v962_v9, %v281_v20  ;;  %v315_v32 = vadd.f32 %v964_v10, %v293_v22  ;;  %v317_v33 = vadd.f32 %v964_v10, %v295_v23  ;;  %v316_v36 = vadd.f32 %v973_v21, %v294_v24  ;;  %v850_v55 = vld [vmem:[%s1163_s1 + $0x50] sm:$0xff]  ;;  %v841_v7 = vld [vmem:[%s1163_s1 + $0x8] sm:$0xff]  ;;  %v382_v13 = vld [vmem:[%s1166_s4 + $0x18] sm:$0xff] }
  0x14   : > { %549 = vmatpush.bf16.msra.mxu0 %v845_v6  ;;  %858 = vmatpush.bf16.msra.mxu2 %v845_v6  ;;  %v323_v34 = vadd.f32 %v964_v10, %v301_v27  ;;  %v318_v39 = vadd.f32 %v973_v21, %v296_v29  ;;  %v304_v41 = vmul.f32 %v966_v11, %v282_v30  ;;  %v381_v61 = vld [vmem:[%s1166_s4 + $0x10] sm:$0xff]  ;;  %v277_v0 = vunpack.c.l.bf16 %v1005_v48  ;;  %v849_v15 = vld [vmem:[%s1163_s1 + $0x48] sm:$0xff]  ;;  %v390_v19 = vld [vmem:[%s1166_s4 + $0x58] sm:$0xff] }
  0x15   : > { %578 = vmatpush.bf16.msra.mxu1 %v853_v12  ;;  %866 = vmatpush.bf16.msra.mxu3 %v853_v12  ;;  %v325_v35 = vadd.f32 %v964_v10, %v303_v28  ;;  %v347_v43 = vmul.f32 0.2, %v315_v32  ;;  %v349_v44 = vmul.f32 0.2, %v317_v33  ;;  %vm331_vm0 = vcmp.gt.f32.partialorder %v315_v32, 0.0  ;;  %v389_v1 = vld [vmem:[%s1166_s4 + $0x50] sm:$0xff] }
  0x16   : > { %v355_v45 = vmul.f32 0.2, %v323_v34  ;;  %vm333_vm1 = vcmp.gt.f32.partialorder %v317_v33, 0.0  ;;  %vm339_vm2 = vcmp.gt.f32.partialorder %v323_v34, 0.0  ;;  %v348_v47 = vmul.f32 0.2, %v316_v36 }
  0x17   : > { %v357_v46 = vmul.f32 0.2, %v325_v35  ;;  %vm341_vm3 = vcmp.gt.f32.partialorder %v325_v35, 0.0  ;;  %vm332_vm4 = vcmp.gt.f32.partialorder %v316_v36, 0.0  ;;  %v350_v51 = vmul.f32 0.2, %v318_v39 }
  0x18   : > { %550 = vmatpush.bf16.msra.mxu0 %v844_v26  ;;  %859 = vmatpush.bf16.msra.mxu2 %v844_v26  ;;  %v324_v52 = vadd.f32 %v973_v21, %v302_v40  ;;  %v326_v53 = vadd.f32 %v973_v21, %v304_v41  ;;  %v363_v56 = vsel %vm331_vm0, %v315_v32, %v347_v43  ;;  %vm334_vm5 = vcmp.gt.f32.partialorder %v318_v39, 0.0  ;;  %v388_v18 = vld [vmem:[%s1166_s4 + $0x48] sm:$0xff] }
  0x19   : > { %579 = vmatpush.bf16.msra.mxu1 %v852_v31  ;;  %867 = vmatpush.bf16.msra.mxu3 %v852_v31  ;;  %v365_v57 = vsel %vm333_vm1, %v317_v33, %v349_v44  ;;  %v371_v59 = vsel %vm339_vm2, %v323_v34, %v355_v45  ;;  %v373_v62 = vsel %vm341_vm3, %v325_v35, %v357_v46  ;;  %v283_v6 = vunpack.c.l.bf16 %v1014_v54  ;;  %v840_v31 = vld [vmem:[%s1163_s1] sm:$0xff] }
  0x1a   : > { %vm340_vm6 = vcmp.gt.f32.partialorder %v324_v52, 0.0  ;;  %vm342_vm7 = vcmp.gt.f32.partialorder %v326_v53, 0.0  ;;  %v364_v2 = vsel %vm332_vm4, %v316_v36, %v348_v47  ;;  %v356_v4 = vmul.f32 0.2, %v324_v52  ;;  %v848_v35 = vld [vmem:[%s1163_s1 + $0x40] sm:$0xff] }
  0x1b   : > { %v358_v5 = vmul.f32 0.2, %v326_v53  ;;  %v395_v8 = vmul.f32 %v379_v58, %v363_v56  ;;  %v366_v12 = vsel %vm334_vm5, %v318_v39, %v350_v51  ;;  %v285_v14 = vunpack.c.l.bf16 %v1026_v60  ;;  %v383_v58 = vld [vmem:[%s1166_s4 + $0x20] sm:$0xff] }
  0x1c   : > { %551 = vmatpush.bf16.msra.mxu0 %v843_v37  ;;  %860 = vmatpush.bf16.msra.mxu2 %v843_v37  ;;  %v372_v16 = vsel %vm340_vm6, %v324_v52, %v356_v4  ;;  %v276_v20 = vunpack.c.h.bf16 %v1002_v42  ;;  %v278_v22 = vunpack.c.h.bf16 %v1005_v48  ;;  %v397_v23 = vmul.f32 %v381_v61, %v365_v57 }
  0x1d   : > { %580 = vmatpush.bf16.msra.mxu1 %v851_v38  ;;  %868 = vmatpush.bf16.msra.mxu3 %v851_v38  ;;  %v374_v17 = vsel %vm342_vm7, %v326_v53, %v358_v5  ;;  %v403_v24 = vmul.f32 %v387_v63, %v371_v59  ;;  %v405_v25 = vmul.f32 %v389_v1, %v373_v62  ;;  %v284_v45 = vunpack.c.h.bf16 %v1014_v54  ;;  %v385_v59 = vld [vmem:[%s1166_s4 + $0x30] sm:$0xff]  ;;  %v386_v5 = vld [vmem:[%s1166_s4 + $0x38] sm:$0xff] }
  0x1e   : > { %v396_v26 = vmul.f32 %v380_v3, %v364_v2  ;;  %v398_v27 = vmul.f32 %v382_v13, %v366_v12  ;;  %v297_v28 = vmul.f32 %v962_v9, %v275_v49  ;;  %v299_v29 = vmul.f32 %v962_v9, %v277_v0  ;;  %v391_v0 = vld [vmem:[%s1166_s4 + $0x60] sm:$0xff]  ;;  %v393_v1 = vld [vmem:[%s1166_s4 + $0x70] sm:$0xff]  ;;  %v384_v2 = vld [vmem:[%s1166_s4 + $0x28] sm:$0xff] }
  0x1f   : > { %v305_v30 = vmul.f32 %v962_v9, %v283_v6  ;;  %v404_v32 = vmul.f32 %v388_v18, %v372_v16  ;;  %v406_v33 = vmul.f32 %v390_v19, %v374_v17  ;;  %v307_v34 = vmul.f32 %v962_v9, %v285_v14  ;;  %v394_v12 = vld [vmem:[%s1166_s4 + $0x78] sm:$0xff] }
  0x20   : > { %552 = vmatpush.bf16.msra.mxu0 %v842_v50  ;;  %861 = vmatpush.bf16.msra.mxu2 %v842_v50  ;;  %v298_v36 = vmul.f32 %v966_v11, %v276_v20  ;;  %v300_v37 = vmul.f32 %v966_v11, %v278_v22  ;;  %v411_v38 = vpack.c.bf16 %v397_v23, %v395_v8  ;;  %v286_v46 = vunpack.c.h.bf16 %v1026_v60  ;;  %v392_v8 = vld [vmem:[%s1166_s4 + $0x68] sm:$0xff] }
  0x21   : > { %581 = vmatpush.bf16.msra.mxu1 %v850_v55  ;;  %869 = vmatpush.bf16.msra.mxu3 %v850_v55  ;;  %v415_v39 = vpack.c.bf16 %v405_v25, %v403_v24  ;;  %v412_v40 = vpack.c.bf16 %v398_v27, %v396_v26  ;;  %v319_v41 = vadd.f32 %v964_v10, %v297_v28  ;;  %vm613_vm0 = vcmask 257024  }
  0x22   : > { %v321_v42 = vadd.f32 %v964_v10, %v299_v29  ;;  %v327_v43 = vadd.f32 %v964_v10, %v305_v30  ;;  %v416_v9 = vpack.c.bf16 %v406_v33, %v404_v32  ;;  %v329_v44 = vadd.f32 %v964_v10, %v307_v34 }
  0x23   : > { %v320_v47 = vadd.f32 %v973_v21, %v298_v36  ;;  %v322_v48 = vadd.f32 %v973_v21, %v300_v37  ;;  %v306_v49 = vmul.f32 %v966_v11, %v284_v45  ;;  %v308_v50 = vmul.f32 %v966_v11, %v286_v46 }
  0x24   : > { %553 = vmatpush.bf16.msra.mxu0 %v841_v7  ;;  %862 = vmatpush.bf16.msra.mxu2 %v841_v7  ;;  %vm335_vm8 = vcmp.gt.f32.partialorder %v319_v41, 0.0  ;;  %vm337_vm9 = vcmp.gt.f32.partialorder %v321_v42, 0.0  ;;  %v351_v51 = vmul.f32 0.2, %v319_v41  ;;  %v353_v10 = vmul.f32 0.2, %v321_v42 }
  0x25   : > { %582 = vmatpush.bf16.msra.mxu1 %v849_v15  ;;  %870 = vmatpush.bf16.msra.mxu3 %v849_v15  ;;  %vm343_vm10 = vcmp.gt.f32.partialorder %v327_v43, 0.0  ;;  %v359_v52 = vmul.f32 0.2, %v327_v43  ;;  %v361_v53 = vmul.f32 0.2, %v329_v44  ;;  %v328_v54 = vadd.f32 %v973_v21, %v306_v49 }
  0x26   : > { %vm345_vm11 = vcmp.gt.f32.partialorder %v329_v44, 0.0  ;;  %v352_v55 = vmul.f32 0.2, %v320_v47  ;;  %v354_v56 = vmul.f32 0.2, %v322_v48  ;;  %v330_v57 = vadd.f32 %v973_v21, %v308_v50 }
  0x27   : > { %vm336_vm12 = vcmp.gt.f32.partialorder %v320_v47, 0.0  ;;  %vm338_vm13 = vcmp.gt.f32.partialorder %v322_v48, 0.0  ;;  %vm344_vm14 = vcmp.gt.f32.partialorder %v328_v54, 0.0  ;;  %v360_v11 = vmul.f32 0.2, %v328_v54 }
  0x28   : > { %554 = vmatpush.bf16.msra.mxu0 %v840_v31  ;;  %863 = vmatpush.bf16.msra.mxu2 %v840_v31  ;;  %vm346_vm15 = vcmp.gt.f32.partialorder %v330_v57, 0.0  ;;  %v362_v60 = vmul.f32 0.2, %v330_v57  ;;  %v367_v61 = vsel %vm335_vm8, %v319_v41, %v351_v51  ;;  %v369_v62 = vsel %vm337_vm9, %v321_v42, %v353_v10 }
  0x29   : > { %583 = vmatpush.bf16.msra.mxu1 %v848_v35  ;;  %871 = vmatpush.bf16.msra.mxu3 %v848_v35  ;;  %v375_v21 = vsel %vm343_vm10, %v327_v43, %v359_v52  ;;  %v377_v63 = vsel %vm345_vm11, %v329_v44, %v361_v53  ;;  %v368_v3 = vsel %vm336_vm12, %v320_v47, %v352_v55  ;;  %vm622_vm1 = vcmask 261120  }
  0x2a   : > { %v370_v4 = vsel %vm338_vm13, %v322_v48, %v354_v56  ;;  %v376_v6 = vsel %vm344_vm14, %v328_v54, %v360_v11  ;;  %v378_v7 = vsel %vm346_vm15, %v330_v57, %v362_v60  ;;  %v399_v13 = vmul.f32 %v383_v58, %v367_v61 }
  0x2b   : > { %555 = vmatmul.bf16.vlgmr.msra.gmra.mxu0 %v411_v38  ;;  %565 = vmatmul.bf16.vlgmr.msra.gmra.mxu2 %v415_v39  ;;  %v401_v14 = vmul.f32 %v385_v59, %v369_v62  ;;  %v407_v15 = vmul.f32 %v391_v0, %v375_v21  ;;  %v409_v16 = vmul.f32 %v393_v1, %v377_v63  ;;  %vm673_vm2 = vcmask 253952  }
  0x2c   : > { %584 = vmatmul.bf16.vlgmr.msra.gmra.mxu1 %v412_v40  ;;  %594 = vmatmul.bf16.vlgmr.msra.gmra.mxu3 %v416_v9  ;;  %v400_v17 = vmul.f32 %v384_v2, %v368_v3  ;;  %v402_v18 = vmul.f32 %v386_v5, %v370_v4  ;;  %v408_v19 = vmul.f32 %v392_v8, %v376_v6 }
  0x2d   : > { %v410_v20 = vmul.f32 %v394_v12, %v378_v7  ;;  %v413_v22 = vpack.c.bf16 %v401_v14, %v399_v13  ;;  %v417_v23 = vpack.c.bf16 %v409_v16, %v407_v15 }
  0x2e   : > { %v414_v24 = vpack.c.bf16 %v402_v18, %v400_v17 }
  0x2f   : > { %v418_v25 = vpack.c.bf16 %v410_v20, %v408_v19 }
  0x3b   : > { %560 = vmatmul.bf16.gmra.mxu0 %v413_v22  ;;  %570 = vmatmul.bf16.gmra.mxu2 %v417_v23 }
  0x3c   : > { %589 = vmatmul.bf16.gmra.mxu1 %v414_v24  ;;  %599 = vmatmul.bf16.gmra.mxu3 %v418_v25 }
  0xa8   : > { %v556_v26 = vpop.f32.mrf.mxu0 }
  0xa9   : > { %v585_v27 = vpop.f32.mrf.mxu1 }
  0xaa   : > { %v586_v28 = vadd.f32 %v585_v27, %v556_v26 }
  0xac   : > { %v605_v29 = vpack.c.bf16 %v586_v28, %v586_v28  ;;  %v644_v46 = vmul.f32 %v586_v28, %v586_v28  ;;  %v623_v51 = vsel %vm622_vm1, %v586_v28, 0.0 }
  0xae   : > { %614 = vst.msk [vmem:[%s1121_s8] sm:$0xf] %vm613_vm0, %v605_v29  ;;  %v566_v30 = vpop.f32.mrf.mxu2  ;;  %v652_v57 = vsel %vm622_vm1, %v644_v46, 0.0 }
  0xaf   : > { %v595_v31 = vpop.f32.mrf.mxu3 }
  0xb0   : > { %v596_v32 = vadd.f32 %v595_v31, %v566_v30  ;;  %v558_v33 = vpop.f32.mrf.mxu0 }
  0xb1   : > { %v587_v34 = vpop.f32.mrf.mxu1 }
  0xb2   : > { %v609_v35 = vpack.c.bf16 %v596_v32, %v596_v32  ;;  %v588_v36 = vadd.f32 %v587_v34, %v558_v33  ;;  %v648_v62 = vmul.f32 %v596_v32, %v596_v32  ;;  %v630_v3 = vsel %vm622_vm1, %v596_v32, 0.0 }
  0xb4   : > { %618 = vst.msk [vmem:[%s1121_s8 + $0x10] sm:$0xf] %vm613_vm0, %v609_v35  ;;  %v606_v37 = vpack.c.bf16 %v588_v36, %v588_v36  ;;  %v645_v44 = vmul.f32 %v588_v36, %v588_v36  ;;  %v624_v47 = vsel %vm622_vm1, %v588_v36, 0.0  ;;  %v659_v13 = vsel %vm622_vm1, %v648_v62, 0.0 }
  0xb5   : > { %v625_v55 = vadd.f32 %v624_v47, %v623_v51 }
  0xb6   : > { %615 = vst.msk [vmem:[%s1121_s8 + $0x4] sm:$0xf] %vm613_vm0, %v606_v37  ;;  %v568_v38 = vpop.f32.mrf.mxu2  ;;  %v653_v10 = vsel %vm622_vm1, %v645_v44, 0.0 }
  0xb7   : > { %v597_v39 = vpop.f32.mrf.mxu3  ;;  %v654_v60 = vadd.f32 %v653_v10, %v652_v57 }
  0xb8   : > { %v598_v40 = vadd.f32 %v597_v39, %v568_v38  ;;  %v561_v41 = vpop.f32.mrf.mxu0 }
  0xb9   : > { %v590_v42 = vpop.f32.mrf.mxu1 }
  0xba   : > { %v610_v43 = vpack.c.bf16 %v598_v40, %v598_v40  ;;  %v591_v9 = vadd.f32 %v590_v42, %v561_v41  ;;  %v649_v4 = vmul.f32 %v598_v40, %v598_v40  ;;  %v632_v14 = vsel %vm622_vm1, %v598_v40, 0.0 }
  0xbc   : > { %619 = vst.msk [vmem:[%s1121_s8 + $0x14] sm:$0xf] %vm613_vm0, %v610_v43  ;;  %v607_v45 = vpack.c.bf16 %v591_v9, %v591_v9  ;;  %v646_v48 = vmul.f32 %v591_v9, %v591_v9  ;;  %v626_v52 = vsel %vm622_vm1, %v591_v9, 0.0  ;;  %v661_v19 = vsel %vm622_vm1, %v649_v4, 0.0 }
  0xbd   : > { %v627_v61 = vadd.f32 %v626_v52, %v625_v55 }
  0xbe   : > { %616 = vst.msk [vmem:[%s1121_s8 + $0x8] sm:$0xf] %vm613_vm0, %v607_v45  ;;  %v571_v49 = vpop.f32.mrf.mxu2  ;;  %v655_v11 = vsel %vm622_vm1, %v646_v48, 0.0 }
  0xbf   : > { %v600_v50 = vpop.f32.mrf.mxu3  ;;  %v656_v1 = vadd.f32 %v655_v11, %v654_v60 }
  0xc0   : > { %v601_v53 = vadd.f32 %v600_v50, %v571_v49  ;;  %v563_v54 = vpop.f32.mrf.mxu0 }
  0xc1   : > { %v592_v56 = vpop.f32.mrf.mxu1 }
  0xc2   : > { %v611_v58 = vpack.c.bf16 %v601_v53, %v601_v53  ;;  %v593_v59 = vadd.f32 %v592_v56, %v563_v54  ;;  %v650_v15 = vmul.f32 %v601_v53, %v601_v53  ;;  %v634_v20 = vsel %vm622_vm1, %v601_v53, 0.0 }
  0xc4   : > { %620 = vst.msk [vmem:[%s1121_s8 + $0x18] sm:$0xf] %vm613_vm0, %v611_v58  ;;  %v608_v21 = vpack.c.bf16 %v593_v59, %v593_v59  ;;  %v628_v63 = vsel %vm622_vm1, %v593_v59, 0.0  ;;  %v647_v0 = vmul.f32 %v593_v59, %v593_v59  ;;  %v663_v26 = vsel %vm622_vm1, %v650_v15, 0.0 }
  0xc5   : > { %v629_v2 = vadd.f32 %v628_v63, %v627_v61 }
  0xc6   : > { %617 = vst.msk [vmem:[%s1121_s8 + $0xc] sm:$0xf] %vm613_vm0, %v608_v21  ;;  %v657_v5 = vsel %vm622_vm1, %v647_v0, 0.0  ;;  %v573_v6 = vpop.f32.mrf.mxu2 }
  0xc7   : > { %v631_v7 = vadd.f32 %v630_v3, %v629_v2  ;;  %v658_v8 = vadd.f32 %v657_v5, %v656_v1  ;;  %v602_v12 = vpop.f32.mrf.mxu3 }
  0xc8   : > { %v603_v16 = vadd.f32 %v602_v12, %v573_v6 }
  0xc9   : > { %v660_v17 = vadd.f32 %v659_v13, %v658_v8  ;;  %v633_v18 = vadd.f32 %v632_v14, %v631_v7 }
  0xca   : > { %v612_v22 = vpack.c.bf16 %v603_v16, %v603_v16  ;;  %v651_v23 = vmul.f32 %v603_v16, %v603_v16  ;;  %v636_v27 = vsel %vm622_vm1, %v603_v16, 0.0 }
  0xcb   : > { %v635_v24 = vadd.f32 %v634_v20, %v633_v18  ;;  %v662_v25 = vadd.f32 %v661_v19, %v660_v17 }
  0xcc   : > { %621 = vst.msk [vmem:[%s1121_s8 + $0x1c] sm:$0xf] %vm613_vm0, %v612_v22  ;;  %v665_v30 = vsel %vm622_vm1, %v651_v23, 0.0 }
  0xcd   : > { %v637_v28 = vadd.f32 %v636_v27, %v635_v24  ;;  %v664_v29 = vadd.f32 %v663_v26, %v662_v25 }
  0xcf   : > { %v638_v31 = vrot.slane %v637_v28, 4  ;;  %v666_v32 = vadd.f32 %v665_v30, %v664_v29 }
  0xd1   : > { %v639_v33 = vadd.f32 %v638_v31, %v637_v28  ;;  %v667_v34 = vrot.slane %v666_v32, 4 }
  0xd3   : > { %v640_v35 = vrot.slane %v639_v33, 2  ;;  %v668_v36 = vadd.f32 %v667_v34, %v666_v32 }
  0xd5   : > { %v641_v37 = vadd.f32 %v640_v35, %v639_v33  ;;  %v669_v38 = vrot.slane %v668_v36, 2 }
  0xd7   : > { %v642_v39 = vrot.slane %v641_v37, 1  ;;  %v670_v40 = vadd.f32 %v669_v38, %v668_v36 }
  0xd9   : > { %v643_v41 = vadd.f32 %v642_v39, %v641_v37  ;;  %v671_v42 = vrot.slane %v670_v40, 1 }
  0xdb   : > { %v672_v43 = vadd.f32 %v671_v42, %v670_v40  ;;  %674 = vst.msk [vmem:[%s262_s13] sm:$0x1] %vm673_vm2, %v643_v41 }
  0xdd   : > { %675 = vst.msk [vmem:[%s262_s13 + $0x1] sm:$0x1] %vm673_vm2, %v672_v43 }
  0xde PF: > { %s17_s21 = sadd.s32 1, %s886_s21  }
  0xdf   : > { %p14_p4 = scmp.ge.s32.totalorder %s17_s21, 4  }
  0xe1   :  { %16 = sbr.rel (!%p14_p4) target bundleno = 1 (0x1), region = 82 }

// kernel: discriminator64x64_forward.8
= control target key start
LH: loop header
LB: loop body
LE: loop exit
PB: predicated region body
PF: predicated region fallthrough
CT: control target
= control target key end

     0   :  { %s1007_s21 = smov 0   ;;  %s1184_s0 = inlined_call_operand.vmem [shape: bf16[2,16,512], index: 0, kind: input, shape index: {}]   ;;  %s1185_s1 = inlined_call_operand.vmem [shape: bf16[512,64], index: 1, kind: input, shape index: {}]   ;;  %s1186_s2 = inlined_call_operand.vmem [shape: f32[1,512], index: 2, kind: input, shape index: {}]   ;;  %s1187_s3 = inlined_call_operand.vmem [shape: f32[1,512], index: 3, kind: input, shape index: {}]   ;;  %s1188_s4 = inlined_call_operand.vmem [shape: f32[16,512], index: 4, kind: input, shape index: {}]   ;;  %s1189_s5 = inlined_call_operand.vmem [shape: bf16[2,16,64], index: 5, kind: output, shape index: {0}]   ;;  %s1190_s6 = inlined_call_operand.vmem [shape: f32[2,2,64], index: 6, kind: output, shape index: {1}]  }
   0x1 LB: > { %s782_s22 = sadd.s32 4294967295, %s970_s21   ;;  %p786_p0 = scmp.ge.s32.totalorder %s970_s21, 1  ;;  %s970_s21 = sphi %s1007_s21, %s17_s21  }
   0x2   : > { %p215_p1 = scmp.lt.s32.totalorder %s970_s21, 3 }
   0x4   : > { %p216_p2 = pnand %p786_p0, %p215_p1 }
   0x5   : > { %p249_p3 = scmp.lt.s32.totalorder (!%p216_p2), %s782_s22, 1 }
   0x6   : > { %219 = sbr.rel (%p216_p2) target bundleno = 207 (0xcf), region = 40 }
   0xb   : > { %v931_v0 = vld [vmem:[%s1185_s1 + $0x38] sm:$0xff]  ;;  %v930_v4 = vld [vmem:[%s1185_s1 + $0x30] sm:$0xff]  ;;  %s1192_s22 = smov (!%p249_p3, %s782_s22), 1  ;;  %v929_v8 = vld [vmem:[%s1185_s1 + $0x28] sm:$0xff]  ;;  %vm669_vm8 = vcmask 519168   ;;  %vm672_vm9 = vcmask 523264  }
   0xc   : > { %v939_v1 = vld [vmem:[%s1185_s1 + $0x78] sm:$0xff]  ;;  %611 = vmatpush.bf16.msra.mxu0 %v931_v0  ;;  %v938_v5 = vld [vmem:[%s1185_s1 + $0x70] sm:$0xff]  ;;  %s922_s15 = sshll.u32 %s1192_s22, 5  ;;  %v937_v9 = vld [vmem:[%s1185_s1 + $0x68] sm:$0xff]  ;;  %s923_s23 = sshll.u32 %s1192_s22, 3  ;;  %vm693_vm10 = vcmask 516096  }
   0xd   : > { %v947_v2 = vld [vmem:[%s1185_s1 + $0xb8] sm:$0xff]  ;;  %625 = vmatpush.bf16.msra.mxu1 %v939_v1  ;;  %v946_v6 = vld [vmem:[%s1185_s1 + $0xb0] sm:$0xff]  ;;  %v945_v10 = vld [vmem:[%s1185_s1 + $0xa8] sm:$0xff]  ;;  %s253_s28 = scalar_lea.vmem %s1184_s0, %s922_s15  ;;  %s258_s26 = scalar_lea.vmem %s1189_s5, %s923_s23 }
   0xe   : > { %v955_v3 = vld [vmem:[%s1185_s1 + $0xf8] sm:$0xff]  ;;  %639 = vmatpush.bf16.msra.mxu2 %v947_v2  ;;  %v954_v7 = vld [vmem:[%s1185_s1 + $0xf0] sm:$0xff]  ;;  %v953_v11 = vld [vmem:[%s1185_s1 + $0xe8] sm:$0xff]  ;;  %s791_s27 = sshll.u32 %s1192_s22, 1 }
   0xf   : > { %653 = vmatpush.bf16.msra.mxu3 %v955_v3  ;;  %v928_v12 = vld [vmem:[%s1185_s1 + $0x20] sm:$0xff]  ;;  %v265_v17 = vld [vmem:[%s253_s28 + $0x10] sm:$0xff]  ;;  %v1083_v28 = vld [vmem:[%s253_s28 + $0x8] sm:$0xff]  ;;  %s262_s30 = scalar_lea.vmem %s1190_s6, %s791_s27 }
  0x10   : > { %612 = vmatpush.bf16.msra.mxu0 %v930_v4  ;;  %v936_v13 = vld [vmem:[%s1185_s1 + $0x60] sm:$0xff]  ;;  %v271_v22 = vunpack.c.l.bf16 %v265_v17  ;;  %v272_v25 = vunpack.c.h.bf16 %v265_v17  ;;  %v1085_v29 = vld [vmem:[%s253_s28 + $0x18] sm:$0xff]  ;;  %v269_v35 = vunpack.c.l.bf16 %v1083_v28  ;;  %v926_v42 = vld [vmem:[%s1185_s1 + $0x10] sm:$0xff]  ;;  %v270_v52 = vunpack.c.h.bf16 %v1083_v28 }
  0x11   : > { %626 = vmatpush.bf16.msra.mxu1 %v938_v5  ;;  %v944_v14 = vld [vmem:[%s1185_s1 + $0xa0] sm:$0xff]  ;;  %v927_v31 = vld [vmem:[%s1185_s1 + $0x18] sm:$0xff]  ;;  %v273_v36 = vunpack.c.l.bf16 %v1085_v29  ;;  %v934_v47 = vld [vmem:[%s1185_s1 + $0x50] sm:$0xff]  ;;  %v274_v62 = vunpack.c.h.bf16 %v1085_v29 }
  0x12   : > { %640 = vmatpush.bf16.msra.mxu2 %v946_v6  ;;  %v952_v15 = vld [vmem:[%s1185_s1 + $0xe0] sm:$0xff]  ;;  %v935_v32 = vld [vmem:[%s1185_s1 + $0x58] sm:$0xff]  ;;  %v942_v48 = vld [vmem:[%s1185_s1 + $0x90] sm:$0xff] }
  0x13   : > { %654 = vmatpush.bf16.msra.mxu3 %v954_v7  ;;  %v263_v16 = vld [vmem:[%s253_s28] sm:$0xff]  ;;  %v943_v37 = vld [vmem:[%s1185_s1 + $0x98] sm:$0xff]  ;;  %v950_v49 = vld [vmem:[%s1185_s1 + $0xd0] sm:$0xff] }
  0x14   : > { %613 = vmatpush.bf16.msra.mxu0 %v929_v8  ;;  %v267_v18 = vunpack.c.l.bf16 %v263_v16  ;;  %v1072_v19 = vld [vmem:[%s1186_s2] sm:$0xf]  ;;  %v268_v21 = vunpack.c.h.bf16 %v263_v16  ;;  %v951_v38 = vld [vmem:[%s1185_s1 + $0xd8] sm:$0xff]  ;;  %v925_v58 = vld [vmem:[%s1185_s1 + $0x8] sm:$0xff] }
  0x15   : > { %627 = vmatpush.bf16.msra.mxu1 %v937_v9  ;;  %v1077_v20 = vld [vmem:[%s1187_s3] sm:$0xf]  ;;  %v277_v23 = vperm.slane %v1072_v19, 0  ;;  %v278_v26 = vperm.slane %v1072_v19, 1  ;;  %v279_v30 = vperm.slane %v1072_v19, 2  ;;  %v280_v53 = vperm.slane %v1072_v19, 3 }
  0x16   : > { %641 = vmatpush.bf16.msra.mxu2 %v945_v10  ;;  %v295_v24 = vperm.slane %v1077_v20, 0  ;;  %v296_v27 = vperm.slane %v1077_v20, 1  ;;  %v297_v41 = vperm.slane %v1077_v20, 2  ;;  %v933_v59 = vld [vmem:[%s1185_s1 + $0x48] sm:$0xff]  ;;  %v335_v2 = vld [vmem:[%s1188_s4] sm:$0xff]  ;;  %v298_v17 = vperm.slane %v1077_v20, 3 }
  0x17   : > { %655 = vmatpush.bf16.msra.mxu3 %v953_v11  ;;  %v285_v33 = vmul.f32 %v277_v23, %v267_v18  ;;  %v289_v34 = vmul.f32 %v277_v23, %v271_v22  ;;  %v286_v39 = vmul.f32 %v278_v26, %v268_v21  ;;  %v290_v40 = vmul.f32 %v278_v26, %v272_v25  ;;  %v941_v63 = vld [vmem:[%s1185_s1 + $0x88] sm:$0xff]  ;;  %v339_v3 = vld [vmem:[%s1188_s4 + $0x20] sm:$0xff]  ;;  %v337_v11 = vld [vmem:[%s1188_s4 + $0x10] sm:$0xff] }
  0x18   : > { %614 = vmatpush.bf16.msra.mxu0 %v928_v12  ;;  %v287_v45 = vmul.f32 %v279_v30, %v269_v35  ;;  %v291_v46 = vmul.f32 %v279_v30, %v273_v36  ;;  %v949_v4 = vld [vmem:[%s1185_s1 + $0xc8] sm:$0xff]  ;;  %v341_v12 = vld [vmem:[%s1188_s4 + $0x30] sm:$0xff]  ;;  %v292_v16 = vmul.f32 %v280_v53, %v274_v62  ;;  %v924_v23 = vld [vmem:[%s1185_s1] sm:$0xff] }
  0x19   : > { %628 = vmatpush.bf16.msra.mxu1 %v936_v13  ;;  %v303_v43 = vadd.f32 %v295_v24, %v285_v33  ;;  %v307_v44 = vadd.f32 %v295_v24, %v289_v34  ;;  %v304_v50 = vadd.f32 %v296_v27, %v286_v39  ;;  %v308_v51 = vadd.f32 %v296_v27, %v290_v40  ;;  %v336_v7 = vld [vmem:[%s1188_s4 + $0x8] sm:$0xff]  ;;  %v932_v24 = vld [vmem:[%s1185_s1 + $0x40] sm:$0xff]  ;;  %v342_v35 = vld [vmem:[%s1188_s4 + $0x38] sm:$0xff] }
  0x1a   : > { %642 = vmatpush.bf16.msra.mxu2 %v944_v14  ;;  %v305_v60 = vadd.f32 %v297_v41, %v287_v45  ;;  %v309_v61 = vadd.f32 %v297_v41, %v291_v46  ;;  %v340_v8 = vld [vmem:[%s1188_s4 + $0x28] sm:$0xff]  ;;  %v288_v13 = vmul.f32 %v280_v53, %v270_v52  ;;  %v940_v20 = vld [vmem:[%s1185_s1 + $0x80] sm:$0xff]  ;;  %v310_v29 = vadd.f32 %v298_v17, %v292_v16 }
  0x1b   : > { %656 = vmatpush.bf16.msra.mxu3 %v952_v15  ;;  %vm311_vm0 = vcmp.gt.f32.partialorder %v303_v43, 0.0  ;;  %vm315_vm1 = vcmp.gt.f32.partialorder %v307_v44, 0.0  ;;  %v319_v54 = vmul.f32 0.2, %v303_v43  ;;  %v323_v55 = vmul.f32 0.2, %v307_v44 }
  0x1c   : > { %615 = vmatpush.bf16.msra.mxu0 %v927_v31  ;;  %vm312_vm2 = vcmp.gt.f32.partialorder %v304_v50, 0.0  ;;  %vm316_vm3 = vcmp.gt.f32.partialorder %v308_v51, 0.0  ;;  %v320_v56 = vmul.f32 0.2, %v304_v50  ;;  %v324_v57 = vmul.f32 0.2, %v308_v51 }
  0x1d   : > { %629 = vmatpush.bf16.msra.mxu1 %v935_v32  ;;  %v327_v0 = vsel %vm311_vm0, %v303_v43, %v319_v54  ;;  %v331_v1 = vsel %vm315_vm1, %v307_v44, %v323_v55  ;;  %vm313_vm4 = vcmp.gt.f32.partialorder %v305_v60, 0.0  ;;  %vm317_vm5 = vcmp.gt.f32.partialorder %v309_v61, 0.0  ;;  %v948_v28 = vld [vmem:[%s1185_s1 + $0xc0] sm:$0xff]  ;;  %v338_v31 = vld [vmem:[%s1188_s4 + $0x18] sm:$0xff] }
  0x1e   : > { %643 = vmatpush.bf16.msra.mxu2 %v943_v37  ;;  %v328_v5 = vsel %vm312_vm2, %v304_v50, %v320_v56  ;;  %v332_v6 = vsel %vm316_vm3, %v308_v51, %v324_v57  ;;  %v321_v9 = vmul.f32 0.2, %v305_v60  ;;  %v325_v10 = vmul.f32 0.2, %v309_v61 }
  0x1f   : > { %657 = vmatpush.bf16.msra.mxu3 %v951_v38  ;;  %v343_v14 = vmul.f32 %v335_v2, %v327_v0  ;;  %v347_v15 = vmul.f32 %v339_v3, %v331_v1  ;;  %v344_v18 = vmul.f32 %v336_v7, %v328_v5  ;;  %v348_v19 = vmul.f32 %v340_v8, %v332_v6 }
  0x20   : > { %616 = vmatpush.bf16.msra.mxu0 %v926_v42  ;;  %v329_v21 = vsel %vm313_vm4, %v305_v60, %v321_v9  ;;  %v333_v22 = vsel %vm317_vm5, %v309_v61, %v325_v10  ;;  %v306_v27 = vadd.f32 %v298_v17, %v288_v13  ;;  %vm318_vm7 = vcmp.gt.f32.partialorder %v310_v29, 0.0 }
  0x21   : > { %630 = vmatpush.bf16.msra.mxu1 %v934_v47  ;;  %v345_v25 = vmul.f32 %v337_v11, %v329_v21  ;;  %v349_v26 = vmul.f32 %v341_v12, %v333_v22  ;;  %v351_v32 = vpack.c.bf16 %v347_v15, %v343_v14  ;;  %v352_v33 = vpack.c.bf16 %v348_v19, %v344_v18 }
  0x22   : > { %644 = vmatpush.bf16.msra.mxu2 %v942_v48  ;;  %vm314_vm6 = vcmp.gt.f32.partialorder %v306_v27, 0.0  ;;  %v322_v30 = vmul.f32 0.2, %v306_v27  ;;  %v326_v34 = vmul.f32 0.2, %v310_v29 }
  0x23   : > { %658 = vmatpush.bf16.msra.mxu3 %v950_v49  ;;  %v353_v36 = vpack.c.bf16 %v349_v26, %v345_v25 }
  0x24   : > { %617 = vmatpush.bf16.msra.mxu0 %v925_v58  ;;  %v330_v37 = vsel %vm314_vm6, %v306_v27, %v322_v30  ;;  %v334_v38 = vsel %vm318_vm7, %v310_v29, %v326_v34 }
  0x25   : > { %631 = vmatpush.bf16.msra.mxu1 %v933_v59  ;;  %v346_v39 = vmul.f32 %v338_v31, %v330_v37  ;;  %v350_v40 = vmul.f32 %v342_v35, %v334_v38 }
  0x26   : > { %645 = vmatpush.bf16.msra.mxu2 %v941_v63 }
  0x27   : > { %659 = vmatpush.bf16.msra.mxu3 %v949_v4  ;;  %v354_v41 = vpack.c.bf16 %v350_v40, %v346_v39 }
  0x28   : > { %618 = vmatpush.bf16.msra.mxu0 %v924_v23 }
  0x29   : > { %632 = vmatpush.bf16.msra.mxu1 %v932_v24 }
  0x2a   : > { %646 = vmatpush.bf16.msra.mxu2 %v940_v20 }
  0x2b   : > { %660 = vmatpush.bf16.msra.mxu3 %v948_v28  ;;  %619 = vmatmul.bf16.vlgmr.msra.gmra.mxu0 %v351_v32 }
  0x2c   : > { %633 = vmatmul.bf16.vlgmr.msra.gmra.mxu1 %v352_v33 }
  0x2d   : > { %647 = vmatmul.bf16.vlgmr.msra.gmra.mxu2 %v353_v36 }
  0x2e   : > { %661 = vmatmul.bf16.vlgmr.msra.gmra.mxu3 %v354_v41 }
  0xa8   : > { %v620_v42 = vpop.f32.mrf.mxu0 }
  0xa9   : > { %v634_v43 = vpop.f32.mrf.mxu1 }
  0xaa   : > { %v635_v44 = vadd.f32 %v634_v43, %v620_v42 }
  0xb0   : > { %v648_v45 = vpop.f32.mrf.mxu2  ;;  %v622_v49 = vpop.f32.mrf.mxu0 }
  0xb1   : > { %v649_v46 = vadd.f32 %v648_v45, %v635_v44  ;;  %v662_v47 = vpop.f32.mrf.mxu3  ;;  %v636_v50 = vpop.f32.mrf.mxu1 }
  0xb2   : > { %v637_v52 = vadd.f32 %v636_v50, %v622_v49 }
  0xb3   : > { %v663_v48 = vadd.f32 %v662_v47, %v649_v46 }
  0xb5   : > { %v667_v51 = vpack.c.bf16 %v663_v48, %v663_v48  ;;  %v682_v56 = vmul.f32 %v663_v48, %v663_v48  ;;  %v673_v58 = vsel %vm672_vm9, %v663_v48, 0.0 }
  0xb7   : > { %670 = vst.msk [vmem:[%s258_s26] sm:$0xf] %vm669_vm8, %v667_v51  ;;  %v684_v63 = vsel %vm672_vm9, %v682_v56, 0.0 }
  0xb8   : > { %v650_v53 = vpop.f32.mrf.mxu2 }
  0xb9   : > { %v651_v54 = vadd.f32 %v650_v53, %v637_v52  ;;  %v664_v55 = vpop.f32.mrf.mxu3 }
  0xbb   : > { %v665_v57 = vadd.f32 %v664_v55, %v651_v54 }
  0xbd   : > { %v668_v59 = vpack.c.bf16 %v665_v57, %v665_v57  ;;  %v674_v60 = vsel %vm672_vm9, %v665_v57, 0.0  ;;  %v683_v61 = vmul.f32 %v665_v57, %v665_v57 }
  0xbe   : > { %v675_v62 = vadd.f32 %v674_v60, %v673_v58 }
  0xbf   : > { %671 = vst.msk [vmem:[%s258_s26 + $0x4] sm:$0xf] %vm669_vm8, %v668_v59  ;;  %v685_v0 = vsel %vm672_vm9, %v683_v61, 0.0 }
  0xc0   : > { %v676_v1 = vrot.slane %v675_v62, 4  ;;  %v686_v2 = vadd.f32 %v685_v0, %v684_v63 }
  0xc2   : > { %v677_v3 = vadd.f32 %v676_v1, %v675_v62  ;;  %v687_v4 = vrot.slane %v686_v2, 4 }
  0xc4   : > { %v678_v5 = vrot.slane %v677_v3, 2  ;;  %v688_v6 = vadd.f32 %v687_v4, %v686_v2 }
  0xc6   : > { %v679_v7 = vadd.f32 %v678_v5, %v677_v3  ;;  %v689_v8 = vrot.slane %v688_v6, 2 }
  0xc8   : > { %v680_v9 = vrot.slane %v679_v7, 1  ;;  %v690_v10 = vadd.f32 %v689_v8, %v688_v6 }
  0xca   : > { %v681_v11 = vadd.f32 %v680_v9, %v679_v7  ;;  %v691_v12 = vrot.slane %v690_v10, 1 }
  0xcc   : > { %v692_v13 = vadd.f32 %v691_v12, %v690_v10  ;;  %694 = vst.msk [vmem:[%s262_s30] sm:$0x1] %vm693_vm10, %v681_v11 }
  0xce   : > { %695 = vst.msk [vmem:[%s262_s30 + $0x1] sm:$0x1] %vm693_vm10, %v692_v13 }
  0xcf PF: > { %s17_s21 = sadd.s32 1, %s970_s21  }
  0xd0   : > { %p14_p4 = scmp.ge.s32.totalorder %s17_s21, 4  }
  0xd2   :  { %16 = sbr.rel (!%p14_p4) target bundleno = 1 (0x1), region = 82 }

// kernel: discriminator64x64_forward.9
= control target key start
LH: loop header
LB: loop body
LE: loop exit
PB: predicated region body
PF: predicated region fallthrough
CT: control target
= control target key end

     0   :  { %s363_s15 = smov 0   ;;  %s396_s0 = inlined_call_operand.vmem [shape: bf16[2,16,64], index: 0, kind: input, shape index: {}]   ;;  %s397_s1 = inlined_call_operand.vmem [shape: f32[1,64], index: 1, kind: input, shape index: {}]   ;;  %s398_s2 = inlined_call_operand.vmem [shape: f32[1,64], index: 2, kind: input, shape index: {}]   ;;  %s399_s3 = inlined_call_operand.vmem [shape: f32[16,64], index: 3, kind: input, shape index: {}]   ;;  %s400_s4 = inlined_call_operand.vmem [shape: f32[2,1,128], index: 4, kind: output, shape index: {}]  }
   0x1 LB: > { %s301_s16 = sadd.s32 4294967295, %s336_s15   ;;  %p305_p0 = scmp.ge.s32.totalorder %s336_s15, 1  ;;  %s336_s15 = sphi %s363_s15, %s14_s15  }
   0x2   : > { %p162_p1 = scmp.lt.s32.totalorder %s336_s15, 3 }
   0x4   : > { %p163_p2 = pnand %p305_p0, %p162_p1 }
   0x5   : > { %p186_p3 = scmp.lt.s32.totalorder (!%p163_p2), %s301_s16, 1 }
   0x6   : > { %166 = sbr.rel (%p163_p2) target bundleno = 194 (0xc2), region = 36 }
   0xb   : > { %s402_s16 = smov (!%p186_p3, %s301_s16), 1  ;;  %v324_v0 = vld [vmem:[%s397_s1] ss:$0 sm:$0xff]  ;;  %vm220_vm2 = vcmask 523264   ;;  %v217_v15 = vld [vmem:[%s399_s3 + $0x8] sm:$0xff] }
   0xc   : > { %s311_s17 = sshll.u32 %s402_s16, 3  ;;  %v325_v3 = vld [vmem:[%s398_s2] ss:$0 sm:$0xff]  ;;  %s193_s5 = scalar_lea.vmem %s400_s4, %s402_s16 }
   0xd   : > { %s190_s20 = scalar_lea.vmem %s396_s0, %s311_s17  ;;  %v216_v10 = vld [vmem:[%s399_s3] sm:$0xff] }
   0xe   : > { %v313_v1 = vld [vmem:[%s190_s20] sm:$0xff]  }
   0xf   : > { %v314_v2 = vunpack.c.l.bf16 %v313_v1  ;;  %v315_v4 = vunpack.c.h.bf16 %v313_v1 }
  0x11   : > { %v202_v5 = vmul.f32 %v324_v0, %v314_v2  ;;  %v203_v6 = vmul.f32 %v324_v0, %v315_v4 }
  0x13   : > { %v208_v7 = vadd.f32 %v325_v3, %v202_v5  ;;  %v209_v8 = vadd.f32 %v325_v3, %v203_v6 }
  0x15   : > { %vm210_vm0 = vcmp.gt.f32.partialorder %v208_v7, 0.0  ;;  %v212_v9 = vmul.f32 0.2, %v208_v7  ;;  %v213_v11 = vmul.f32 0.2, %v209_v8  ;;  %vm211_vm1 = vcmp.gt.f32.partialorder %v209_v8, 0.0 }
  0x17   : > { %v214_v12 = vsel %vm210_vm0, %v208_v7, %v212_v9  ;;  %v215_v14 = vsel %vm211_vm1, %v209_v8, %v213_v11 }
  0x18   : > { %v218_v13 = vmul.f32 %v216_v10, %v214_v12  ;;  %v219_v17 = vmul.f32 %v217_v15, %v215_v14 }
  0x1a   : > { %v221_v16 = vsel %vm220_vm2, %v218_v13, 0.0  ;;  %v224_v18 = vsel %vm220_vm2, %v219_v17, 0.0 }
  0x1b   : > { %222 = vadd.xlane.f32.xlu0 %v221_v16 }
  0x23   : > { %225 = vadd.xlane.f32.xlu0 %v224_v18 }
  0x8e   : > { %v223_v19 = vpop.xlane.xlu0 %222 }
  0x96   : > { %v226_v20 = vpop.xlane.xlu0 %225 }
  0x97   : > { %v227_v21 = vadd.f32 %v226_v20, %v223_v19 }
  0x99   : > { %v228_v22 = vrot.slane %v227_v21, 4 }
  0x9b   : > { %v229_v23 = vadd.f32 %v228_v22, %v227_v21 }
  0x9d   : > { %v230_v24 = vrot.slane %v229_v23, 2 }
  0x9f   : > { %v231_v25 = vadd.f32 %v230_v24, %v229_v23 }
  0xa1   : > { %v232_v26 = vrot.slane %v231_v25, 1 }
  0xa3   : > { %v233_v27 = vadd.f32 %v232_v26, %v231_v25 }
  0xa5   : > { %v308_v28 = vmul.f32 -1.442695, %v233_v27 }
  0xa7   : > { %326 = vpow2.f32 %v308_v28 }
  0xad   : > { %v327_v29 = vpop.eup %326 }
  0xae   : > { %v237_v30 = vadd.f32 1.0, %v327_v29 }
  0xb0   : > { %328 = vrcp.f32 %v237_v30  ;;  %v249_v34 = vand.u32 2147483648, %v237_v30  ;;  %v247_v36 = vand.u32 2147483647, %v237_v30  ;;  %vm243_vm4 = vweird.f32 %v237_v30 }
  0xb2   : > { %v250_v38 = vor.u32 1.1754944e-38, %v249_v34  ;;  %vm248_vm6 = vcmp.eq.f32.partialorder %v247_v36, 8.507059e+37 }
  0xb6   : > { %v329_v31 = vpop.eup %328 }
  0xb7   : > { %v239_v32 = vmul.f32 %v329_v31, %v237_v30  ;;  %vm244_vm3 = vweird.f32 %v329_v31 }
  0xb8   : > { %vm245_vm5 = vmor %vm243_vm4, %vm244_vm3 }
  0xb9   : > { %v240_v33 = vsub.f32 1.0, %v239_v32 }
  0xbb   : > { %v241_v35 = vmul.f32 %v329_v31, %v240_v33 }
  0xbd   : > { %v242_v37 = vadd.f32 %v329_v31, %v241_v35 }
  0xbf   : > { %v246_v39 = vsel %vm245_vm5, %v329_v31, %v242_v37 }
  0xc0   : > { %v251_v40 = vsel %vm248_vm6, %v250_v38, %v246_v39 }
  0xc1   : > { %253 = vst [vmem:[%s193_s5] sm:$0x1] %v251_v40 }
  0xc2 PF: > { %s14_s15 = sadd.s32 1, %s336_s15  }
  0xc3   : > { %p11_p4 = scmp.ge.s32.totalorder %s14_s15, 4  }
  0xc5   :  { %13 = sbr.rel (!%p11_p4) target bundleno = 1 (0x1), region = 66 }

</bundles_post_ra>
